<compile_context>
chip_gen: v7x
topology: tpu7x:2x2x1
jax: 0.10.0
libtpu: 0.0.40
codegen_flags: <defaults>
</compile_context>

<pallas_src>
import functools
import math

import jax
import jax.numpy as jnp
from jax import lax
from jax.experimental import pallas as pl
from jax.experimental.pallas import tpu as pltpu


_VMEM_LIMIT = 32 * 1024 * 1024  # safe on v5e/v6e (128 MiB) and v7x (64 MiB physical)


def _round_up(x, m):
    return ((x + m - 1) // m) * m


def _ceil_div(a, b):
    return -(-a // b)


# ----------------------------------------------------------------------------
# Kernel 1a: conv-as-matmul (+ optional fused LeakyReLU), no stats
# ----------------------------------------------------------------------------
def _conv_mm_kernel(a_ref, b_ref, o_ref, *, act):
    acc = jnp.dot(a_ref[...], b_ref[...], preferred_element_type=jnp.float32)
    if act == "lrelu":
        acc = jnp.where(acc >= 0, acc, 0.2 * acc)  # epilogue kept in f32
    o_ref[...] = acc.astype(o_ref.dtype)


# ----------------------------------------------------------------------------
# Kernel 1b: conv-as-matmul + per-tile BatchNorm partial stats (sum, sum^2)
# ----------------------------------------------------------------------------
def _conv_mm_stats_kernel(a_ref, b_ref, o_ref, stats_ref):
    acc = jnp.dot(a_ref[...], b_ref[...], preferred_element_type=jnp.float32)
    # Two direct sublane assignments -- no concatenate/relayout in the epilogue.
    stats_ref[0:1, :] = jnp.sum(acc, axis=0, keepdims=True)
    stats_ref[1:2, :] = jnp.sum(acc * acc, axis=0, keepdims=True)
    o_ref[...] = acc.astype(o_ref.dtype)


def _choose_tm(M, tm_cap=4096):
    # >=2 tiles whenever M allows two >=16-row tiles (v7x: 2 TCs share the
    # "parallel" grid axis); tm rounded to 16 for bf16 sublane packing.
    n_tiles = max(2, _ceil_div(M, tm_cap)) if M >= 32 else 1
    tm = _round_up(_ceil_div(M, n_tiles), 16)
    return tm


def conv_matmul(a, b, *, act="none", with_stats=False):
    """(M,K)@(K,N), tiled over M. Operands cast to bf16, f32 MXU accumulation.

    Returns bf16 out, plus f32 per-tile (sum, sumsq) stats if with_stats.
    """
    M, K = a.shape
    _, N = b.shape
    tm = _choose_tm(M)
    Mp = _round_up(M, tm)
    if Mp != M:
        a = jnp.pad(a, ((0, Mp - M), (0, 0)))  # zero rows -> zero stats contribution
    num_tiles = Mp // tm
    a = a.astype(jnp.bfloat16)
    b = b.astype(jnp.bfloat16)

    in_specs = [
        pl.BlockSpec((tm, K), lambda i: (i, 0)),
        pl.BlockSpec((K, N), lambda i: (0, 0)),
    ]
    cp = pltpu.CompilerParams(
        dimension_semantics=("parallel",), vmem_limit_bytes=_VMEM_LIMIT
    )

    if with_stats:
        out, stats = pl.pallas_call(
            _conv_mm_stats_kernel,
            grid=(num_tiles,),
            in_specs=in_specs,
            out_specs=(
                pl.BlockSpec((tm, N), lambda i: (i, 0)),
                pl.BlockSpec((None, 2, N), lambda i: (i, 0, 0)),
            ),
            out_shape=(
                jax.ShapeDtypeStruct((Mp, N), jnp.bfloat16),
                jax.ShapeDtypeStruct((num_tiles, 2, N), jnp.float32),
            ),
            compiler_params=cp,
        )(a, b)
        if Mp != M:
            out = out[:M]
        return out, stats

    out = pl.pallas_call(
        functools.partial(_conv_mm_kernel, act=act),
        grid=(num_tiles,),
        in_specs=in_specs,
        out_specs=pl.BlockSpec((tm, N), lambda i: (i, 0)),
        out_shape=jax.ShapeDtypeStruct((Mp, N), jnp.bfloat16),
        compiler_params=cp,
    )(a, b)
    if Mp != M:
        out = out[:M]
    return out


# ----------------------------------------------------------------------------
# Kernel 2: BatchNorm apply + LeakyReLU (elementwise, lane-dense)
# ----------------------------------------------------------------------------
def _bn_lrelu_apply_kernel(y_ref, scale_ref, shift_ref, o_ref):
    z = y_ref[...].astype(jnp.float32) * scale_ref[...] + shift_ref[...]
    o_ref[...] = jnp.where(z >= 0, z, 0.2 * z).astype(o_ref.dtype)


def bn_lrelu_apply(y, scale, shift):
    """y: (M, C) bf16 pre-activation. Lane-dense: fold r rows into the lane axis
    so stores operate on width r*C (>=512 when possible, multiple of 128)."""
    M, C = y.shape
    target_r = max(1, 512 // C)
    r = math.gcd(M, target_r)
    W = r * C
    Mr = M // r
    y2 = y.reshape(Mr, W)
    scale_w = jnp.tile(scale.reshape(1, C), (1, r)).astype(jnp.float32)
    shift_w = jnp.tile(shift.reshape(1, C), (1, r)).astype(jnp.float32)

    n_tiles = 2 if Mr >= 32 else 1            # keep both v7x TCs busy when possible
    n_tiles = max(n_tiles, _ceil_div(Mr, 512))  # cap rows/tile for VMEM headroom
    tr = _round_up(_ceil_div(Mr, n_tiles), 16)
    Mrp = _round_up(Mr, tr)
    if Mrp != Mr:
        y2 = jnp.pad(y2, ((0, Mrp - Mr), (0, 0)))

    out = pl.pallas_call(
        _bn_lrelu_apply_kernel,
        grid=(Mrp // tr,),
        in_specs=[
            pl.BlockSpec((tr, W), lambda i: (i, 0)),
            pl.BlockSpec((1, W), lambda i: (0, 0)),
            pl.BlockSpec((1, W), lambda i: (0, 0)),
        ],
        out_specs=pl.BlockSpec((tr, W), lambda i: (i, 0)),
        out_shape=jax.ShapeDtypeStruct((Mrp, W), jnp.bfloat16),
        compiler_params=pltpu.CompilerParams(
            dimension_semantics=("parallel",), vmem_limit_bytes=_VMEM_LIMIT
        ),
    )(y2, scale_w, shift_w)
    if Mrp != Mr:
        out = out[:Mr]
    return out.reshape(M, C)


def bn_scale_shift(stats, m_true, gamma, beta, eps=1e-5):
    """Reduce per-tile (sum, sumsq) partials -> per-channel scale/shift (training BN)."""
    s = jnp.sum(stats[:, 0, :], axis=0)
    ss = jnp.sum(stats[:, 1, :], axis=0)
    mean = s / m_true
    var = jnp.maximum(ss / m_true - mean * mean, 0.0)  # biased batch variance
    scale = gamma * lax.rsqrt(var + eps)
    shift = beta - mean * scale
    return (scale.reshape(1, -1).astype(jnp.float32),
            shift.reshape(1, -1).astype(jnp.float32))


# ----------------------------------------------------------------------------
# Kernel 3: SelfAttention (q/k/v projections + query-tiled softmax + residual)
# ----------------------------------------------------------------------------
def _self_attn_kernel(x_ref, wq_ref, wk_ref, wv_ref, bq_ref, bk_ref, bv_ref,
                      gamma_ref, o_ref, q_scr, *, q_blk):
    x = x_ref[...]                                       # (HW, C) bf16
    hw = x.shape[0]
    # Three separate projections: q/k/v land directly in their own values, no
    # lane-offset slicing of a fused qkv matrix (slices are not views).
    q_scr[...] = (jnp.dot(x, wq_ref[...], preferred_element_type=jnp.float32)
                  + bq_ref[...]).astype(jnp.bfloat16)
    k = (jnp.dot(x, wk_ref[...], preferred_element_type=jnp.float32)
         + bk_ref[...]).astype(jnp.bfloat16)
    v = (jnp.dot(x, wv_ref[...], preferred_element_type=jnp.float32)
         + bv_ref[...]).astype(jnp.bfloat16)
    gamma = gamma_ref[...]                               # (1, 1) f32

    def _process(start):
        qi = q_scr[pl.ds(start, q_blk), :]               # (q_blk, ch)
        # energy[i, j] = q[i] . k[j]   (no explicit transpose of k)
        energy = lax.dot_general(qi, k, (((1,), (1,)), ((), ())),
                                 preferred_element_type=jnp.float32)  # (q_blk, HW)
        energy = energy - jnp.max(energy, axis=-1, keepdims=True)
        p = jnp.exp(energy)
        attn = p * pl.reciprocal(jnp.sum(p, axis=-1, keepdims=True), approx=True)
        out = jnp.dot(attn.astype(jnp.bfloat16), v,
                      preferred_element_type=jnp.float32)             # (q_blk, C)
        xi = x_ref[pl.ds(start, q_blk), :].astype(jnp.float32)
        o_ref[pl.ds(start, q_blk), :] = (gamma * out + xi).astype(o_ref.dtype)

    n_blk = hw // q_blk
    if n_blk == 1:
        _process(0)
    else:
        def body(i, carry):
            _process(pl.multiple_of(i * q_blk, q_blk))
            return carry
        lax.fori_loop(0, n_blk, body, 0)


def self_attention(x_nhwc, ap):
    N, H, W, C = x_nhwc.shape
    HW = H * W
    ch = C // 2
    xs = x_nhwc.reshape(N, HW, C).astype(jnp.bfloat16)
    # 1x1 convs == matmuls.
    wq = ap["wq"].reshape(ch, C).T.astype(jnp.bfloat16)   # (C, ch)
    wk = ap["wk"].reshape(ch, C).T.astype(jnp.bfloat16)   # (C, ch)
    wv = ap["wv"].reshape(C, C).T.astype(jnp.bfloat16)    # (C, C)
    bq = ap["bq"].reshape(1, ch).astype(jnp.float32)
    bk = ap["bk"].reshape(1, ch).astype(jnp.float32)
    bv = ap["bv"].reshape(1, C).astype(jnp.float32)
    gamma = ap["gamma"].reshape(1, 1).astype(jnp.float32)
    q_blk = min(128, HW)   # bound the live (q_blk, HW) energy tile

    out = pl.pallas_call(
        functools.partial(_self_attn_kernel, q_blk=q_blk),
        grid=(N,),
        in_specs=[
            pl.BlockSpec((None, HW, C), lambda b: (b, 0, 0)),
            pl.BlockSpec((C, ch), lambda b: (0, 0)),
            pl.BlockSpec((C, ch), lambda b: (0, 0)),
            pl.BlockSpec((C, C), lambda b: (0, 0)),
            pl.BlockSpec((1, ch), lambda b: (0, 0)),
            pl.BlockSpec((1, ch), lambda b: (0, 0)),
            pl.BlockSpec((1, C), lambda b: (0, 0)),
            pl.BlockSpec((1, 1), lambda b: (0, 0)),
        ],
        out_specs=pl.BlockSpec((None, HW, C), lambda b: (b, 0, 0)),
        out_shape=jax.ShapeDtypeStruct((N, HW, C), jnp.bfloat16),
        scratch_shapes=[pltpu.VMEM((HW, ch), jnp.bfloat16)],
        compiler_params=pltpu.CompilerParams(
            dimension_semantics=("parallel",), vmem_limit_bytes=_VMEM_LIMIT
        ),
    )(xs, wq, wk, wv, bq, bk, bv, gamma)
    return out.reshape(N, H, W, C)


# ----------------------------------------------------------------------------
# JAX glue: im2col, weight reshaping, spectral norm, parameter init
# ----------------------------------------------------------------------------
def im2col(x_nhwc, k, s, p):
    x = x_nhwc
    if p > 0:
        x = jnp.pad(x, ((0, 0), (p, p), (p, p), (0, 0)))
    N, Hp, Wp, C = x.shape
    Ho = (Hp - k) // s + 1
    Wo = (Wp - k) // s + 1
    cols = []
    for i in range(k):
        for j in range(k):
            cols.append(x[:, i:i + s * (Ho - 1) + 1:s, j:j + s * (Wo - 1) + 1:s, :])
    patches = jnp.stack(cols, axis=3)                 # (N, Ho, Wo, k*k, C)
    return patches.reshape(N * Ho * Wo, k * k * C), (N, Ho, Wo)


def conv_as_matmul_weight(w):
    # w: (Cout, Cin, kh, kw) -> (kh*kw*Cin, Cout), matching im2col ordering.
    cout = w.shape[0]
    return jnp.transpose(w, (2, 3, 1, 0)).reshape(-1, cout)


def spectral_normalize(w, key, n_iter=3):
    cout = w.shape[0]
    w2d = w.reshape(cout, -1)
    u = jax.random.normal(key, (cout,), jnp.float32)
    u = u / (jnp.linalg.norm(u) + 1e-12)
    v = None
    for _ in range(n_iter):
        v = w2d.T @ u
        v = v / (jnp.linalg.norm(v) + 1e-12)
        u = w2d @ v
        u = u / (jnp.linalg.norm(u) + 1e-12)
    sigma = u @ (w2d @ v)
    return w / sigma


def init_params(key, ndf):
    ks = jax.random.split(key, 24)
    sc = 0.05

    def conv_w(k, cout, cin, ksz):
        return sc * jax.random.normal(k, (cout, cin, ksz, ksz), jnp.float32)

    def attn_params(kq, kk, kv, kg, c):
        return {
            "wq": sc * jax.random.normal(kq, (c // 2, c, 1, 1), jnp.float32),
            "bq": sc * jax.random.normal(jax.random.fold_in(kq, 1), (c // 2,), jnp.float32),
            "wk": sc * jax.random.normal(kk, (c // 2, c, 1, 1), jnp.float32),
            "bk": sc * jax.random.normal(jax.random.fold_in(kk, 1), (c // 2,), jnp.float32),
            "wv": sc * jax.random.normal(kv, (c, c, 1, 1), jnp.float32),
            "bv": sc * jax.random.normal(jax.random.fold_in(kv, 1), (c,), jnp.float32),
            # PyTorch inits gamma to 0; use 0.1 so the attention path is exercised.
            "gamma": jnp.full((1,), 0.1, jnp.float32),
        }

    p = {
        "w1": spectral_normalize(conv_w(ks[0], ndf, 3, 4), ks[1]),
        "w2": spectral_normalize(conv_w(ks[2], 2 * ndf, ndf, 4), ks[3]),
        "g2": jnp.ones((2 * ndf,), jnp.float32), "b2": jnp.zeros((2 * ndf,), jnp.float32),
        "w3": spectral_normalize(conv_w(ks[4], 4 * ndf, 2 * ndf, 4), ks[5]),
        "g3": jnp.ones((4 * ndf,), jnp.float32), "b3": jnp.zeros((4 * ndf,), jnp.float32),
        "attn1": attn_params(ks[6], ks[7], ks[8], ks[9], 4 * ndf),
        "w4": spectral_normalize(conv_w(ks[10], 8 * ndf, 4 * ndf, 4), ks[11]),
        "g4": jnp.ones((8 * ndf,), jnp.float32), "b4": jnp.zeros((8 * ndf,), jnp.float32),
        "attn2": attn_params(ks[12], ks[13], ks[14], ks[15], 8 * ndf),
        "w5": spectral_normalize(conv_w(ks[16], 16 * ndf, 8 * ndf, 4), ks[17]),
        "g5": jnp.ones((16 * ndf,), jnp.float32), "b5": jnp.zeros((16 * ndf,), jnp.float32),
        "w6": conv_w(ks[18], 1, 16 * ndf, 4),
    }
    return p


# ----------------------------------------------------------------------------
# Discriminator forward
# ----------------------------------------------------------------------------
def discriminator_forward(x_nchw, p, ndf):
    # augment_module = Identity (training path), as in the PyTorch code.
    x = jnp.transpose(x_nchw, (0, 2, 3, 1)).astype(jnp.bfloat16)   # NHWC, bf16 activations

    # conv1 (SN) + LeakyReLU fused into the matmul epilogue; no BN stats needed.
    a, (N, Ho, Wo) = im2col(x, 4, 2, 1)
    y = conv_matmul(a, conv_as_matmul_weight(p["w1"]), act="lrelu", with_stats=False)
    x = y.reshape(N, Ho, Wo, ndf)

    def conv_bn_block(x, w, g, b, cout):
        a, (N, Ho, Wo) = im2col(x, 4, 2, 1)
        y, stats = conv_matmul(a, conv_as_matmul_weight(w), with_stats=True)
        scale, shift = bn_scale_shift(stats, a.shape[0], g, b)     # tiny per-channel glue
        y = bn_lrelu_apply(y, scale, shift)                        # lane-dense tiled apply
        return y.reshape(N, Ho, Wo, cout)

    x = conv_bn_block(x, p["w2"], p["g2"], p["b2"], 2 * ndf)   # conv2 + BN + LReLU
    x = conv_bn_block(x, p["w3"], p["g3"], p["b3"], 4 * ndf)   # conv3 + BN + LReLU
    x = self_attention(x, p["attn1"])                          # SelfAttention(4*ndf)
    x = conv_bn_block(x, p["w4"], p["g4"], p["b4"], 8 * ndf)   # conv4 + BN + LReLU
    x = self_attention(x, p["attn2"])                          # SelfAttention(8*ndf)
    x = conv_bn_block(x, p["w5"], p["g5"], p["b5"], 16 * ndf)  # conv5 + BN + LReLU

    # Final 4x4 head conv (16*ndf -> 1, stride 1, no pad) + Sigmoid: M=N, K=2048,
    # Cout=1 is pure overhead as a Pallas call -> plain JAX.
    a, (N, Ho, Wo) = im2col(x, 4, 1, 0)                        # (N, 2048)
    w6 = conv_as_matmul_weight(p["w6"]).astype(jnp.float32)
    logits = jax.nn.sigmoid(jnp.dot(a.astype(jnp.float32), w6))

    # PyTorch: x.squeeze()[:, None] -> (N, 1)
    return logits.reshape(N, 1)


if __name__ == "__main__":
    key = jax.random.PRNGKey(0)
    ndf = 8          # small filter count; spatial must be 128 for the 4x4 head conv
    batch = 2
    k_x, k_p = jax.random.split(key)
    inputs = jax.random.normal(k_x, (batch, 3, 128, 128), jnp.float32)
    params = init_params(k_p, ndf)

    out = discriminator_forward(inputs, params, ndf)
    out = jax.block_until_ready(out)
    assert out.shape == (batch, 1)
    assert bool(jnp.all(jnp.isfinite(out)))
    print("KERNEL_OK")
</pallas_src>

<mosaic_0001>
module attributes {stable_mosaic.version = 11 : i64} {
  func.func @_conv_mm_kernel(%arg0: i32, %arg1: memref<4096x48xbf16, #tpu.memory_space<vmem>>, %arg2: memref<48x8xbf16, #tpu.memory_space<vmem>>, %arg3: memref<4096x8xbf16, #tpu.memory_space<vmem>>) attributes {dimension_semantics = [#tpu.dimension_semantics<parallel>], iteration_bounds = array<i64: 2>, scalar_prefetch = 0 : i64, scratch_operands = 0 : i64, tpu.core_type = #tpu.core_type<tc>, window_params = [{transform_indices = @transform_0, window_bounds = array<i64: 4096, 48>}, {pipeline_mode = #tpu.pipeline_mode<synchronous>, transform_indices = @transform_1, window_bounds = array<i64: 48, 8>}, {transform_indices = @transform_2, window_bounds = array<i64: 4096, 8>}]} {
    %c0 = arith.constant 0 : index
    %c0_0 = arith.constant 0 : index
    %0 = vector.load %arg1[%c0, %c0_0] : memref<4096x48xbf16, #tpu.memory_space<vmem>>, vector<4096x48xbf16>
    %c0_1 = arith.constant 0 : index
    %c0_2 = arith.constant 0 : index
    %1 = vector.load %arg2[%c0_1, %c0_2] : memref<48x8xbf16, #tpu.memory_space<vmem>>, vector<48x8xbf16>
    %cst = arith.constant dense<0.000000e+00> : vector<4096x8xf32>
    %2 = tpu.matmul %0, %1, %cst {dimension_numbers = #tpu.dot_dimension_numbers<[1], [0], [0], [1], [0, 0, 1, 1], [], []>} : vector<4096x48xbf16>, vector<48x8xbf16>, vector<4096x8xf32> -> vector<4096x8xf32>
    %cst_3 = arith.constant 0.000000e+00 : f32
    %3 = vector.broadcast %cst_3 : f32 to vector<4096x8xf32>
    %4 = arith.cmpf oge, %2, %3 : vector<4096x8xf32>
    %cst_4 = arith.constant 2.000000e-01 : f32
    %5 = vector.broadcast %cst_4 : f32 to vector<4096x8xf32>
    %6 = arith.mulf %5, %2 : vector<4096x8xf32>
    %7 = arith.select %4, %2, %6 : vector<4096x8xi1>, vector<4096x8xf32>
    %8 = arith.truncf %7 : vector<4096x8xf32> to vector<4096x8xbf16>
    %c0_5 = arith.constant 0 : index
    %c0_6 = arith.constant 0 : index
    %9 = vector.load %arg3[%c0_5, %c0_6] : memref<4096x8xbf16, #tpu.memory_space<vmem>>, vector<4096x8xbf16>
    tpu.vector_store %arg3[%c0_5, %c0_6], %8 {strides = array<i32>} : memref<4096x8xbf16, #tpu.memory_space<vmem>>, vector<4096x8xbf16>,
    return
  }
  func.func @transform_0(%arg0: i32) -> (i32, i32) {
    %c0_i32 = arith.constant 0 : i32
    %c0_i32_0 = arith.constant 0 : i32
    return %arg0, %c0_i32 : i32, i32
  }
  func.func @transform_1(%arg0: i32) -> (i32, i32) {
    %c0_i32 = arith.constant 0 : i32
    %c0_i32_0 = arith.constant 0 : i32
    %c0_i32_1 = arith.constant 0 : i32
    return %c0_i32, %c0_i32_0 : i32, i32
  }
  func.func @transform_2(%arg0: i32) -> (i32, i32) {
    %c0_i32 = arith.constant 0 : i32
    %c0_i32_0 = arith.constant 0 : i32
    return %arg0, %c0_i32 : i32, i32
  }
}

</mosaic_0001>

<bundles_post_ra>
// kernel: tpu_custom_call.1
= control target key start
LH: loop header
LB: loop body
LE: loop exit
PB: predicated region body
PF: predicated region fallthrough
CT: control target
= control target key end

     0   :  { %s11590_s9 = smov 0   ;;  %s13166_s0 = inlined_call_operand.vmem [shape: bf16[8192,48], index: 0, kind: input, shape index: {}]   ;;  %s13167_s1 = inlined_call_operand.vmem [shape: bf16[48,8], index: 1, kind: input, shape index: {}]   ;;  %s13168_s2 = inlined_call_operand.vmem [shape: bf16[8192,8], index: 2, kind: output, shape index: {}]  }
   0x1 LB: > { %s8967_s10 = sadd.s32 4294967295, %s11573_s9   ;;  %p8971_p0 = scmp.ge.s32.totalorder %s11573_s9, 1  ;;  %s11573_s9 = sphi %s11590_s9, %s12_s9  }
   0x2   : > { %p113_p1 = scmp.lt.s32.totalorder %s11573_s9, 3 }
   0x4   : > { %p114_p2 = pnand %p8971_p0, %p113_p1 }
   0x5   : > { %v11308_v0 = vld [vmem:[%s13167_s1] sm:$0xff] (!%p114_p2)   ;;  %s8972_s13 = sshll.u32 (!%p114_p2), %s8967_s10, 9  ;;  %v11309_v1 = vld [vmem:[%s13167_s1 + $0x8] sm:$0xff] (!%p114_p2)   ;;  %v11310_v2 = vld [vmem:[%s13167_s1 + $0x10] sm:$0xff] (!%p114_p2)   ;;  %vm1964_vm0 = vcmask (!%p114_p2), 392192   ;;  %vm8398_vm1 = vcmask (!%p114_p2), 60416  }
   0x6   : > { %117 = sbr.rel (%p114_p2) target bundleno = 771 (0x303), region = 28  ;;  %p136_p3 = scmp.lt.s32.totalorder (!%p114_p2), %s8972_s13, 1023  ;;  %10776 = vmatprep.subr.bf16.mxu0 (!%p114_p2), %v11308_v0  ;;  %11294 = vmatprep.subr.bf16.mxu1 (!%p114_p2), %v11308_v0 }
   0x7   : > { %10777 = vmatpush3.bf16.msra.mxu0 (!%p114_p2), %v11308_v0  ;;  %11297 = vmatpush3.bf16.msra.mxu1 (!%p114_p2), %v11308_v0 }
   0x8   : > { %10778 = vmatprep.subr.bf16.mxu0 (!%p114_p2), %v11309_v1  ;;  %11295 = vmatprep.subr.bf16.mxu1 (!%p114_p2), %v11309_v1 }
   0xb   : > { %10779 = vmatpush3.bf16.msra.mxu0 (!%p114_p2), %v11309_v1  ;;  %11298 = vmatpush3.bf16.msra.mxu1 (!%p114_p2), %v11309_v1 }
   0xc   : > { %10780 = vmatprep.subr.bf16.mxu0 (!%p114_p2), %v11310_v2  ;;  %11296 = vmatprep.subr.bf16.mxu1 (!%p114_p2), %v11310_v2 }
   0xd   : > { %s13170_s13 = smov (!%p136_p3, %s8972_s13), 1023 }
   0xe   : > { %s8973_s18 = sshll.u32 %s13170_s13, 2 }
   0xf   : > { %s11615_s21 = scalar_lea.vmem %s13166_s0, %s8973_s18  ;;  %10781 = vmatpush3.bf16.msra.mxu0 %v11310_v2  ;;  %11299 = vmatpush3.bf16.msra.mxu1 %v11310_v2  ;;  %s11846_s24 = scalar_lea.vmem %s13168_s2, %s8973_s18 }
  0x10   : > { %v11311_v3 = vld [vmem:[%s11615_s21] sm:$0xff]   ;;  %v11313_v5 = vld [vmem:[%s11615_s21 + $0x8] sm:$0xff]   ;;  %v11315_v7 = vld [vmem:[%s11615_s21 + $0x10] sm:$0xff]  }
  0x11   : > { %v11312_v4 = vld [vmem:[%s11615_s21 + $0x400] sm:$0xff]   ;;  %10782 = vmatprep.mubr.msk.bf16.mxu0 %vm1964_vm0, %v11311_v3  ;;  %v11314_v6 = vld [vmem:[%s11615_s21 + $0x408] sm:$0xff]   ;;  %v11316_v8 = vld [vmem:[%s11615_s21 + $0x410] sm:$0xff]  }
  0x12   : > { %11038 = vmatprep.mubr.msk.bf16.mxu1 %vm1964_vm0, %v11312_v4  ;;  %10783 = vmatmul.mubr.msk.bf16.vlgmr.msra.gmra.mrb[0].mxu0 %vm1964_vm0, %v11313_v5  ;;  %v11317_v9 = vld [vmem:[%s11615_s21 + $0x18] sm:$0xff]   ;;  %v11319_v11 = vld [vmem:[%s11615_s21 + $0x20] sm:$0xff]   ;;  %v11321_v13 = vld [vmem:[%s11615_s21 + $0x28] sm:$0xff]  }
  0x13   : > { %11039 = vmatmul.mubr.msk.bf16.vlgmr.msra.gmra.mrb[0].mxu1 %vm1964_vm0, %v11314_v6  ;;  %10786 = vmatprep.mubr.msk.bf16.mxu0 %vm1964_vm0, %v11315_v7  ;;  %v11318_v10 = vld [vmem:[%s11615_s21 + $0x418] sm:$0xff]   ;;  %v11320_v12 = vld [vmem:[%s11615_s21 + $0x420] sm:$0xff]   ;;  %v11322_v14 = vld [vmem:[%s11615_s21 + $0x428] sm:$0xff]  }
  0x14   : > { %11042 = vmatprep.mubr.msk.bf16.mxu1 %vm1964_vm0, %v11316_v8  ;;  %v11323_v15 = vld [vmem:[%s11615_s21 + $0x30] sm:$0xff]   ;;  %v11325_v17 = vld [vmem:[%s11615_s21 + $0x38] sm:$0xff]   ;;  %v11327_v19 = vld [vmem:[%s11615_s21 + $0x40] sm:$0xff]  }
  0x15   : > { %v11324_v16 = vld [vmem:[%s11615_s21 + $0x430] sm:$0xff]   ;;  %v11326_v18 = vld [vmem:[%s11615_s21 + $0x438] sm:$0xff]   ;;  %v11328_v20 = vld [vmem:[%s11615_s21 + $0x440] sm:$0xff]  }
  0x16   : > { %v11329_v21 = vld [vmem:[%s11615_s21 + $0x48] sm:$0xff]   ;;  %v11331_v23 = vld [vmem:[%s11615_s21 + $0x50] sm:$0xff]   ;;  %v11333_v25 = vld [vmem:[%s11615_s21 + $0x58] sm:$0xff]  }
  0x17   : > { %v11330_v22 = vld [vmem:[%s11615_s21 + $0x448] sm:$0xff]   ;;  %v11332_v24 = vld [vmem:[%s11615_s21 + $0x450] sm:$0xff]   ;;  %v11334_v26 = vld [vmem:[%s11615_s21 + $0x458] sm:$0xff]  }
  0x18   : > { %v11335_v27 = vld [vmem:[%s11615_s21 + $0x60] sm:$0xff]   ;;  %v11337_v29 = vld [vmem:[%s11615_s21 + $0x68] sm:$0xff]   ;;  %v11339_v31 = vld [vmem:[%s11615_s21 + $0x70] sm:$0xff]  }
  0x19   : > { %v11336_v28 = vld [vmem:[%s11615_s21 + $0x460] sm:$0xff]   ;;  %v11338_v30 = vld [vmem:[%s11615_s21 + $0x468] sm:$0xff]   ;;  %v11340_v32 = vld [vmem:[%s11615_s21 + $0x470] sm:$0xff]  }
  0x1a   : > { %10787 = vmatmul.mubr.msk.bf16.gmra.mrb[4].mxu0 %vm1964_vm0, %v11317_v9  ;;  %v11341_v33 = vld [vmem:[%s11615_s21 + $0x78] sm:$0xff]   ;;  %v11343_v35 = vld [vmem:[%s11615_s21 + $0x80] sm:$0xff]   ;;  %v11345_v37 = vld [vmem:[%s11615_s21 + $0x88] sm:$0xff]  }
  0x1b   : > { %11043 = vmatmul.mubr.msk.bf16.gmra.mrb[4].mxu1 %vm1964_vm0, %v11318_v10  ;;  %10790 = vmatprep.mubr.msk.bf16.mxu0 %vm1964_vm0, %v11319_v11  ;;  %v11342_v34 = vld [vmem:[%s11615_s21 + $0x478] sm:$0xff]   ;;  %v11344_v36 = vld [vmem:[%s11615_s21 + $0x480] sm:$0xff]   ;;  %v11346_v38 = vld [vmem:[%s11615_s21 + $0x488] sm:$0xff]  }
  0x1c   : > { %11046 = vmatprep.mubr.msk.bf16.mxu1 %vm1964_vm0, %v11320_v12  ;;  %v11347_v39 = vld [vmem:[%s11615_s21 + $0x90] sm:$0xff]   ;;  %v11349_v41 = vld [vmem:[%s11615_s21 + $0x98] sm:$0xff]   ;;  %v11351_v43 = vld [vmem:[%s11615_s21 + $0xa0] sm:$0xff]  }
  0x1d   : > { %v11348_v40 = vld [vmem:[%s11615_s21 + $0x490] sm:$0xff]   ;;  %v11350_v42 = vld [vmem:[%s11615_s21 + $0x498] sm:$0xff]   ;;  %v11352_v44 = vld [vmem:[%s11615_s21 + $0x4a0] sm:$0xff]  }
  0x1e   : > { %v11353_v45 = vld [vmem:[%s11615_s21 + $0xa8] sm:$0xff]   ;;  %v11355_v47 = vld [vmem:[%s11615_s21 + $0xb0] sm:$0xff]   ;;  %v11357_v49 = vld [vmem:[%s11615_s21 + $0xb8] sm:$0xff]  }
  0x1f   : > { %v11354_v46 = vld [vmem:[%s11615_s21 + $0x4a8] sm:$0xff]   ;;  %v11356_v48 = vld [vmem:[%s11615_s21 + $0x4b0] sm:$0xff]   ;;  %v11358_v50 = vld [vmem:[%s11615_s21 + $0x4b8] sm:$0xff]  }
  0x20   : > { %v11359_v51 = vld [vmem:[%s11615_s21 + $0xc0] sm:$0xff]   ;;  %v11361_v53 = vld [vmem:[%s11615_s21 + $0xc8] sm:$0xff]   ;;  %v11363_v55 = vld [vmem:[%s11615_s21 + $0xd0] sm:$0xff]  }
  0x21   : > { %v11360_v52 = vld [vmem:[%s11615_s21 + $0x4c0] sm:$0xff]   ;;  %v11362_v54 = vld [vmem:[%s11615_s21 + $0x4c8] sm:$0xff]   ;;  %v11364_v56 = vld [vmem:[%s11615_s21 + $0x4d0] sm:$0xff]  }
  0x22   : > { %10791 = vmatmul.mubr.msk.bf16.gmra.mrb[8].mxu0 %vm1964_vm0, %v11321_v13  ;;  %v11365_v57 = vld [vmem:[%s11615_s21 + $0xd8] sm:$0xff]   ;;  %v11367_v59 = vld [vmem:[%s11615_s21 + $0xe0] sm:$0xff]   ;;  %v11369_v61 = vld [vmem:[%s11615_s21 + $0xe8] sm:$0xff]  }
  0x23   : > { %11047 = vmatmul.mubr.msk.bf16.gmra.mrb[8].mxu1 %vm1964_vm0, %v11322_v14  ;;  %10794 = vmatprep.mubr.msk.bf16.mxu0 %vm1964_vm0, %v11323_v15  ;;  %v11366_v58 = vld [vmem:[%s11615_s21 + $0x4d8] sm:$0xff]   ;;  %v11368_v60 = vld [vmem:[%s11615_s21 + $0x4e0] sm:$0xff]   ;;  %v11370_v62 = vld [vmem:[%s11615_s21 + $0x4e8] sm:$0xff]  }
  0x24   : > { %11050 = vmatprep.mubr.msk.bf16.mxu1 %vm1964_vm0, %v11324_v16  ;;  %v11371_v63 = vld [vmem:[%s11615_s21 + $0xf0] sm:$0xff]   ;;  %v11373_v1 = vld [vmem:[%s11615_s21 + $0xf8] sm:$0xff]   ;;  %v11375_v3 = vld [vmem:[%s11615_s21 + $0x100] sm:$0xff]  }
  0x25   : > { %v11372_v0 = vld [vmem:[%s11615_s21 + $0x4f0] sm:$0xff]   ;;  %v11374_v2 = vld [vmem:[%s11615_s21 + $0x4f8] sm:$0xff]   ;;  %v11376_v4 = vld [vmem:[%s11615_s21 + $0x500] sm:$0xff]  }
  0x26   : > { %v11377_v5 = vld [vmem:[%s11615_s21 + $0x108] sm:$0xff]   ;;  %v11379_v7 = vld [vmem:[%s11615_s21 + $0x110] sm:$0xff]   ;;  %v11381_v9 = vld [vmem:[%s11615_s21 + $0x118] sm:$0xff]  }
  0x27   : > { %v11378_v6 = vld [vmem:[%s11615_s21 + $0x508] sm:$0xff]   ;;  %v11380_v8 = vld [vmem:[%s11615_s21 + $0x510] sm:$0xff]   ;;  %v11382_v10 = vld [vmem:[%s11615_s21 + $0x518] sm:$0xff]  }
  0x28   : > { %v11383_v11 = vld [vmem:[%s11615_s21 + $0x120] sm:$0xff]   ;;  %v11385_v13 = vld [vmem:[%s11615_s21 + $0x128] sm:$0xff]   ;;  %v11387_v15 = vld [vmem:[%s11615_s21 + $0x130] sm:$0xff]  }
  0x29   : > { %v11384_v12 = vld [vmem:[%s11615_s21 + $0x520] sm:$0xff]   ;;  %v11386_v14 = vld [vmem:[%s11615_s21 + $0x528] sm:$0xff]   ;;  %v11388_v16 = vld [vmem:[%s11615_s21 + $0x530] sm:$0xff]  }
  0x2a   : > { %10795 = vmatmul.mubr.msk.bf16.gmra.mrb[12].mxu0 %vm1964_vm0, %v11325_v17  ;;  %v11389_v17 = vld [vmem:[%s11615_s21 + $0x138] sm:$0xff]  }
  0x2b   : > { %11051 = vmatmul.mubr.msk.bf16.gmra.mrb[12].mxu1 %vm1964_vm0, %v11326_v18  ;;  %10798 = vmatprep.mubr.msk.bf16.mxu0 %vm1964_vm0, %v11327_v19  ;;  %v11390_v18 = vld [vmem:[%s11615_s21 + $0x538] sm:$0xff]   ;;  %v11391_v19 = vld [vmem:[%s11615_s21 + $0x140] sm:$0xff]  }
  0x2c   : > { %11054 = vmatprep.mubr.msk.bf16.mxu1 %vm1964_vm0, %v11328_v20  ;;  %v11392_v20 = vld [vmem:[%s11615_s21 + $0x540] sm:$0xff]  }
  0x32   : > { %10799 = vmatmul.mubr.msk.bf16.gmra.mrb[16].mxu0 %vm1964_vm0, %v11329_v21  ;;  %v11393_v21 = vld [vmem:[%s11615_s21 + $0x148] sm:$0xff]  }
  0x33   : > { %11055 = vmatmul.mubr.msk.bf16.gmra.mrb[16].mxu1 %vm1964_vm0, %v11330_v22  ;;  %10802 = vmatprep.mubr.msk.bf16.mxu0 %vm1964_vm0, %v11331_v23  ;;  %v11394_v22 = vld [vmem:[%s11615_s21 + $0x548] sm:$0xff]   ;;  %v11395_v23 = vld [vmem:[%s11615_s21 + $0x150] sm:$0xff]  }
  0x34   : > { %11058 = vmatprep.mubr.msk.bf16.mxu1 %vm1964_vm0, %v11332_v24  ;;  %v11396_v24 = vld [vmem:[%s11615_s21 + $0x550] sm:$0xff]  }
  0x3a   : > { %10803 = vmatmul.mubr.msk.bf16.gmra.mrb[20].mxu0 %vm1964_vm0, %v11333_v25  ;;  %v11397_v25 = vld [vmem:[%s11615_s21 + $0x158] sm:$0xff]  }
  0x3b   : > { %11059 = vmatmul.mubr.msk.bf16.gmra.mrb[20].mxu1 %vm1964_vm0, %v11334_v26  ;;  %10806 = vmatprep.mubr.msk.bf16.mxu0 %vm1964_vm0, %v11335_v27  ;;  %v11398_v26 = vld [vmem:[%s11615_s21 + $0x558] sm:$0xff]   ;;  %v11399_v27 = vld [vmem:[%s11615_s21 + $0x160] sm:$0xff]  }
  0x3c   : > { %11062 = vmatprep.mubr.msk.bf16.mxu1 %vm1964_vm0, %v11336_v28  ;;  %v11400_v28 = vld [vmem:[%s11615_s21 + $0x560] sm:$0xff]  }
  0x42   : > { %10807 = vmatmul.mubr.msk.bf16.gmra.mrb[24].mxu0 %vm1964_vm0, %v11337_v29  ;;  %v11401_v29 = vld [vmem:[%s11615_s21 + $0x168] sm:$0xff]  }
  0x43   : > { %11063 = vmatmul.mubr.msk.bf16.gmra.mrb[24].mxu1 %vm1964_vm0, %v11338_v30  ;;  %10810 = vmatprep.mubr.msk.bf16.mxu0 %vm1964_vm0, %v11339_v31  ;;  %v11402_v30 = vld [vmem:[%s11615_s21 + $0x568] sm:$0xff]   ;;  %v11403_v31 = vld [vmem:[%s11615_s21 + $0x170] sm:$0xff]  }
  0x44   : > { %11066 = vmatprep.mubr.msk.bf16.mxu1 %vm1964_vm0, %v11340_v32  ;;  %v11404_v32 = vld [vmem:[%s11615_s21 + $0x570] sm:$0xff]  }
  0x4a   : > { %10811 = vmatmul.mubr.msk.bf16.gmra.mrb[28].mxu0 %vm1964_vm0, %v11341_v33  ;;  %v11405_v33 = vld [vmem:[%s11615_s21 + $0x178] sm:$0xff]  }
  0x4b   : > { %11067 = vmatmul.mubr.msk.bf16.gmra.mrb[28].mxu1 %vm1964_vm0, %v11342_v34  ;;  %10814 = vmatprep.mubr.msk.bf16.mxu0 %vm1964_vm0, %v11343_v35  ;;  %v11406_v34 = vld [vmem:[%s11615_s21 + $0x578] sm:$0xff]   ;;  %v11407_v35 = vld [vmem:[%s11615_s21 + $0x180] sm:$0xff]  }
  0x4c   : > { %11070 = vmatprep.mubr.msk.bf16.mxu1 %vm1964_vm0, %v11344_v36  ;;  %v11408_v36 = vld [vmem:[%s11615_s21 + $0x580] sm:$0xff]  }
  0x52   : > { %10815 = vmatmul.mubr.msk.bf16.gmra.mrb[32].mxu0 %vm1964_vm0, %v11345_v37  ;;  %v11409_v37 = vld [vmem:[%s11615_s21 + $0x188] sm:$0xff]  }
  0x53   : > { %11071 = vmatmul.mubr.msk.bf16.gmra.mrb[32].mxu1 %vm1964_vm0, %v11346_v38  ;;  %10818 = vmatprep.mubr.msk.bf16.mxu0 %vm1964_vm0, %v11347_v39  ;;  %v11410_v38 = vld [vmem:[%s11615_s21 + $0x588] sm:$0xff]   ;;  %v11411_v39 = vld [vmem:[%s11615_s21 + $0x190] sm:$0xff]  }
  0x54   : > { %11074 = vmatprep.mubr.msk.bf16.mxu1 %vm1964_vm0, %v11348_v40  ;;  %v11412_v40 = vld [vmem:[%s11615_s21 + $0x590] sm:$0xff]  }
  0x5a   : > { %10819 = vmatmul.mubr.msk.bf16.gmra.mrb[36].mxu0 %vm1964_vm0, %v11349_v41  ;;  %v11413_v41 = vld [vmem:[%s11615_s21 + $0x198] sm:$0xff]  }
  0x5b   : > { %11075 = vmatmul.mubr.msk.bf16.gmra.mrb[36].mxu1 %vm1964_vm0, %v11350_v42  ;;  %10822 = vmatprep.mubr.msk.bf16.mxu0 %vm1964_vm0, %v11351_v43  ;;  %v11414_v42 = vld [vmem:[%s11615_s21 + $0x598] sm:$0xff]   ;;  %v11415_v43 = vld [vmem:[%s11615_s21 + $0x1a0] sm:$0xff]  }
  0x5c   : > { %11078 = vmatprep.mubr.msk.bf16.mxu1 %vm1964_vm0, %v11352_v44  ;;  %v11416_v44 = vld [vmem:[%s11615_s21 + $0x5a0] sm:$0xff]  }
  0x62   : > { %10823 = vmatmul.mubr.msk.bf16.gmra.mrb[40].mxu0 %vm1964_vm0, %v11353_v45  ;;  %v11417_v45 = vld [vmem:[%s11615_s21 + $0x1a8] sm:$0xff]  }
  0x63   : > { %11079 = vmatmul.mubr.msk.bf16.gmra.mrb[40].mxu1 %vm1964_vm0, %v11354_v46  ;;  %10826 = vmatprep.mubr.msk.bf16.mxu0 %vm1964_vm0, %v11355_v47  ;;  %v11418_v46 = vld [vmem:[%s11615_s21 + $0x5a8] sm:$0xff]   ;;  %v11419_v47 = vld [vmem:[%s11615_s21 + $0x1b0] sm:$0xff]  }
  0x64   : > { %11082 = vmatprep.mubr.msk.bf16.mxu1 %vm1964_vm0, %v11356_v48  ;;  %v11420_v48 = vld [vmem:[%s11615_s21 + $0x5b0] sm:$0xff]  }
  0x6a   : > { %10827 = vmatmul.mubr.msk.bf16.gmra.mrb[44].mxu0 %vm1964_vm0, %v11357_v49  ;;  %v11421_v49 = vld [vmem:[%s11615_s21 + $0x1b8] sm:$0xff]  }
  0x6b   : > { %11083 = vmatmul.mubr.msk.bf16.gmra.mrb[44].mxu1 %vm1964_vm0, %v11358_v50  ;;  %10830 = vmatprep.mubr.msk.bf16.mxu0 %vm1964_vm0, %v11359_v51  ;;  %v11422_v50 = vld [vmem:[%s11615_s21 + $0x5b8] sm:$0xff]  }
  0x6c   : > { %11086 = vmatprep.mubr.msk.bf16.mxu1 %vm1964_vm0, %v11360_v52 }
  0x72   : > { %10831 = vmatmul.mubr.msk.bf16.gmra.mrb[48].mxu0 %vm1964_vm0, %v11361_v53  ;;  %v11423_v53 = vld [vmem:[%s11615_s21 + $0x1c0] sm:$0xff]  }
  0x73   : > { %11087 = vmatmul.mubr.msk.bf16.gmra.mrb[48].mxu1 %vm1964_vm0, %v11362_v54  ;;  %10834 = vmatprep.mubr.msk.bf16.mxu0 %vm1964_vm0, %v11363_v55  ;;  %v11424_v54 = vld [vmem:[%s11615_s21 + $0x5c0] sm:$0xff]  }
  0x74   : > { %11090 = vmatprep.mubr.msk.bf16.mxu1 %vm1964_vm0, %v11364_v56 }
  0x7a   : > { %10835 = vmatmul.mubr.msk.bf16.gmra.mrb[52].mxu0 %vm1964_vm0, %v11365_v57 }
  0x7b   : > { %11091 = vmatmul.mubr.msk.bf16.gmra.mrb[52].mxu1 %vm1964_vm0, %v11366_v58  ;;  %10838 = vmatprep.mubr.msk.bf16.mxu0 %vm1964_vm0, %v11367_v59 }
  0x7c   : > { %11094 = vmatprep.mubr.msk.bf16.mxu1 %vm1964_vm0, %v11368_v60 }
  0x82   : > { %10839 = vmatmul.mubr.msk.bf16.gmra.mrb[56].mxu0 %vm1964_vm0, %v11369_v61 }
  0x83   : > { %11095 = vmatmul.mubr.msk.bf16.gmra.mrb[56].mxu1 %vm1964_vm0, %v11370_v62  ;;  %10842 = vmatprep.mubr.msk.bf16.mxu0 %vm1964_vm0, %v11371_v63 }
  0x84   : > { %11098 = vmatprep.mubr.msk.bf16.mxu1 %vm1964_vm0, %v11372_v0 }
  0x8a   : > { %10843 = vmatmul.mubr.msk.bf16.gmra.mrb[60].mxu0 %vm1964_vm0, %v11373_v1 }
  0x8b   : > { %11099 = vmatmul.mubr.msk.bf16.gmra.mrb[60].mxu1 %vm1964_vm0, %v11374_v2  ;;  %10846 = vmatprep.mubr.msk.bf16.mxu0 %vm1964_vm0, %v11375_v3 }
  0x8c   : > { %11102 = vmatprep.mubr.msk.bf16.mxu1 %vm1964_vm0, %v11376_v4 }
  0x92   : > { %10847 = vmatmul.mubr.msk.bf16.gmra.mrb[64].mxu0 %vm1964_vm0, %v11377_v5 }
  0x93   : > { %11103 = vmatmul.mubr.msk.bf16.gmra.mrb[64].mxu1 %vm1964_vm0, %v11378_v6  ;;  %10850 = vmatprep.mubr.msk.bf16.mxu0 %vm1964_vm0, %v11379_v7 }
  0x94   : > { %11106 = vmatprep.mubr.msk.bf16.mxu1 %vm1964_vm0, %v11380_v8 }
  0x9a   : > { %10851 = vmatmul.mubr.msk.bf16.gmra.mrb[68].mxu0 %vm1964_vm0, %v11381_v9 }
  0x9b   : > { %11107 = vmatmul.mubr.msk.bf16.gmra.mrb[68].mxu1 %vm1964_vm0, %v11382_v10  ;;  %10854 = vmatprep.mubr.msk.bf16.mxu0 %vm1964_vm0, %v11383_v11 }
  0x9c   : > { %11110 = vmatprep.mubr.msk.bf16.mxu1 %vm1964_vm0, %v11384_v12 }
  0xa2   : > { %10855 = vmatmul.mubr.msk.bf16.gmra.mrb[72].mxu0 %vm1964_vm0, %v11385_v13  ;;  %v11425_v13 = vld [vmem:[%s11615_s21 + $0x1c8] sm:$0xff]  }
  0xa3   : > { %11111 = vmatmul.mubr.msk.bf16.gmra.mrb[72].mxu1 %vm1964_vm0, %v11386_v14  ;;  %10858 = vmatprep.mubr.msk.bf16.mxu0 %vm1964_vm0, %v11387_v15  ;;  %v11426_v14 = vld [vmem:[%s11615_s21 + $0x5c8] sm:$0xff]  }
  0xa4   : > { %11114 = vmatprep.mubr.msk.bf16.mxu1 %vm1964_vm0, %v11388_v16 }
  0xaa   : > { %10859 = vmatmul.mubr.msk.bf16.gmra.mrb[76].mxu0 %vm1964_vm0, %v11389_v17 }
  0xab   : > { %11115 = vmatmul.mubr.msk.bf16.gmra.mrb[76].mxu1 %vm1964_vm0, %v11390_v18  ;;  %10862 = vmatprep.mubr.msk.bf16.mxu0 %vm1964_vm0, %v11391_v19 }
  0xac   : > { %11118 = vmatprep.mubr.msk.bf16.mxu1 %vm1964_vm0, %v11392_v20 }
  0xb2   : > { %10863 = vmatmul.mubr.msk.bf16.gmra.mrb[80].mxu0 %vm1964_vm0, %v11393_v21 }
  0xb3   : > { %11119 = vmatmul.mubr.msk.bf16.gmra.mrb[80].mxu1 %vm1964_vm0, %v11394_v22  ;;  %10866 = vmatprep.mubr.msk.bf16.mxu0 %vm1964_vm0, %v11395_v23 }
  0xb4   : > { %11122 = vmatprep.mubr.msk.bf16.mxu1 %vm1964_vm0, %v11396_v24 }
  0xba   : > { %10867 = vmatmul.mubr.msk.bf16.gmra.mrb[84].mxu0 %vm1964_vm0, %v11397_v25  ;;  %v11427_v25 = vld [vmem:[%s11615_s21 + $0x1d0] sm:$0xff]  }
  0xbb   : > { %11123 = vmatmul.mubr.msk.bf16.gmra.mrb[84].mxu1 %vm1964_vm0, %v11398_v26  ;;  %10870 = vmatprep.mubr.msk.bf16.mxu0 %vm1964_vm0, %v11399_v27 }
  0xbc   : > { %11126 = vmatprep.mubr.msk.bf16.mxu1 %vm1964_vm0, %v11400_v28 }
  0xc2   : > { %10871 = vmatmul.mubr.msk.bf16.gmra.mrb[88].mxu0 %vm1964_vm0, %v11401_v29 }
  0xc3   : > { %11127 = vmatmul.mubr.msk.bf16.gmra.mrb[88].mxu1 %vm1964_vm0, %v11402_v30  ;;  %10874 = vmatprep.mubr.msk.bf16.mxu0 %vm1964_vm0, %v11403_v31  ;;  %v11428_v31 = vld [vmem:[%s11615_s21 + $0x5d0] sm:$0xff]  }
  0xc4   : > { %11130 = vmatprep.mubr.msk.bf16.mxu1 %vm1964_vm0, %v11404_v32 }
  0xca   : > { %10875 = vmatmul.mubr.msk.bf16.gmra.mrb[92].mxu0 %vm1964_vm0, %v11405_v33 }
  0xcb   : > { %11131 = vmatmul.mubr.msk.bf16.gmra.mrb[92].mxu1 %vm1964_vm0, %v11406_v34  ;;  %10878 = vmatprep.mubr.msk.bf16.mxu0 %vm1964_vm0, %v11407_v35 }
  0xcc   : > { %11134 = vmatprep.mubr.msk.bf16.mxu1 %vm1964_vm0, %v11408_v36 }
  0xd2   : > { %10879 = vmatmul.mubr.msk.bf16.gmra.mrb[96].mxu0 %vm1964_vm0, %v11409_v37 }
  0xd3   : > { %11135 = vmatmul.mubr.msk.bf16.gmra.mrb[96].mxu1 %vm1964_vm0, %v11410_v38  ;;  %10882 = vmatprep.mubr.msk.bf16.mxu0 %vm1964_vm0, %v11411_v39 }
  0xd4   : > { %11138 = vmatprep.mubr.msk.bf16.mxu1 %vm1964_vm0, %v11412_v40 }
  0xda   : > { %10883 = vmatmul.mubr.msk.bf16.gmra.mrb[100].mxu0 %vm1964_vm0, %v11413_v41 }
  0xdb   : > { %11139 = vmatmul.mubr.msk.bf16.gmra.mrb[100].mxu1 %vm1964_vm0, %v11414_v42  ;;  %10886 = vmatprep.mubr.msk.bf16.mxu0 %vm1964_vm0, %v11415_v43 }
  0xdc   : > { %11142 = vmatprep.mubr.msk.bf16.mxu1 %vm1964_vm0, %v11416_v44 }
  0xe2   : > { %10887 = vmatmul.mubr.msk.bf16.gmra.mrb[104].mxu0 %vm1964_vm0, %v11417_v45 }
  0xe3   : > { %11143 = vmatmul.mubr.msk.bf16.gmra.mrb[104].mxu1 %vm1964_vm0, %v11418_v46  ;;  %10890 = vmatprep.mubr.msk.bf16.mxu0 %vm1964_vm0, %v11419_v47 }
  0xe4   : > { %11146 = vmatprep.mubr.msk.bf16.mxu1 %vm1964_vm0, %v11420_v48 }
  0xe5   : > { %v10784_v51 = vpop.f32.mrb[0].mxu0 }
  0xe6   : > { %v11040_v52 = vpop.f32.mrb[0].mxu1  ;;  %vm4816_vm2 = vcmp.ge.f32.partialorder %v10784_v51, 0.0  ;;  %v5328_v55 = vmul.f32 0.2, %v10784_v51  ;;  %v2767_v57 = vpop.f32.mrb[1].mxu0 }
  0xe7   : > { %vm5072_vm3 = vcmp.ge.f32.partialorder %v11040_v52, 0.0  ;;  %v5584_v56 = vmul.f32 0.2, %v11040_v52  ;;  %v3791_v58 = vpop.f32.mrb[1].mxu1  ;;  %vm4814_vm4 = vcmp.ge.f32.partialorder %v2767_v57, 0.0  ;;  %v10785_v62 = vpop.f32.mrb[2].mxu0 }
  0xe8   : > { %v5840_v59 = vsel %vm4816_vm2, %v10784_v51, %v5328_v55  ;;  %v5326_v61 = vmul.f32 0.2, %v2767_v57  ;;  %v11041_v63 = vpop.f32.mrb[2].mxu1  ;;  %vm5070_vm5 = vcmp.ge.f32.partialorder %v3791_v58, 0.0  ;;  %v5582_v2 = vmul.f32 0.2, %v3791_v58 }
  0xe9   : > { %v6096_v60 = vsel %vm5072_vm3, %v11040_v52, %v5584_v56  ;;  %v10007_v0 = vpack.c.bf16 %v5840_v59, %v5840_v59  ;;  %v2770_v3 = vpop.f32.mrb[3].mxu0  ;;  %v3794_v4 = vpop.f32.mrb[3].mxu1  ;;  %vm4817_vm6 = vcmp.ge.f32.partialorder %v10785_v62, 0.0  ;;  %v5329_v6 = vmul.f32 0.2, %v10785_v62  ;;  %v11430_v55 = vld [vmem:[%s11615_s21 + $0x5d8] sm:$0xff]  }
  0xea   : > { %v10263_v1 = vpack.c.bf16 %v6096_v60, %v6096_v60  ;;  %v5838_v5 = vsel %vm4814_vm4, %v2767_v57, %v5326_v61  ;;  %vm5073_vm7 = vcmp.ge.f32.partialorder %v11041_v63, 0.0  ;;  %10891 = vmatmul.mubr.msk.bf16.gmra.mrb[108].mxu0 %vm1964_vm0, %v11421_v49  ;;  %v6094_v8 = vsel %vm5070_vm5, %v3791_v58, %v5582_v2  ;;  %v11429_v49 = vld [vmem:[%s11615_s21 + $0x1d8] sm:$0xff]   ;;  %v11431_v61 = vld [vmem:[%s11615_s21 + $0x1e0] sm:$0xff]  }
  0xeb   : > { %11147 = vmatmul.mubr.msk.bf16.gmra.mrb[108].mxu1 %vm1964_vm0, %v11422_v50  ;;  %8401 = vst.msk [vmem:[%s11846_s24 + $0x8] sm:$0xf] %vm8398_vm1, %v10007_v0  ;;  %v10005_v7 = vpack.c.bf16 %v5838_v5, %v5838_v5  ;;  %v5585_v9 = vmul.f32 0.2, %v11041_v63  ;;  %vm4815_vm8 = vcmp.ge.f32.partialorder %v2770_v3, 0.0  ;;  %10894 = vmatprep.mubr.msk.bf16.mxu0 %vm1964_vm0, %v11423_v53  ;;  %v10261_v10 = vpack.c.bf16 %v6094_v8, %v6094_v8 }
  0xec   : > { %8657 = vst.msk [vmem:[%s11846_s24 + $0x408] sm:$0xf] %vm8398_vm1, %v10263_v1  ;;  %11150 = vmatprep.mubr.msk.bf16.mxu1 %vm1964_vm0, %v11424_v54  ;;  %v5841_v11 = vsel %vm4817_vm6, %v10785_v62, %v5329_v6  ;;  %v5327_v12 = vmul.f32 0.2, %v2770_v3  ;;  %vm5071_vm9 = vcmp.ge.f32.partialorder %v3794_v4, 0.0 }
  0xed   : > { %8399 = vst.msk [vmem:[%s11846_s24] sm:$0xf] %vm8398_vm1, %v10005_v7  ;;  %v10008_v15 = vpack.c.bf16 %v5841_v11, %v5841_v11  ;;  %v6097_v16 = vsel %vm5073_vm7, %v11041_v63, %v5585_v9  ;;  %v5583_v17 = vmul.f32 0.2, %v3794_v4  ;;  %v10788_v18 = vpop.f32.mrb[4].mxu0 }
  0xee   : > { %v11044_v19 = vpop.f32.mrb[4].mxu1  ;;  %8655 = vst.msk [vmem:[%s11846_s24 + $0x400] sm:$0xf] %vm8398_vm1, %v10261_v10  ;;  %v10264_v20 = vpack.c.bf16 %v6097_v16, %v6097_v16  ;;  %v5839_v21 = vsel %vm4815_vm8, %v2770_v3, %v5327_v12  ;;  %vm4820_vm10 = vcmp.ge.f32.partialorder %v10788_v18, 0.0  ;;  %v5332_v22 = vmul.f32 0.2, %v10788_v18 }
  0xef   : > { %v2783_v23 = vpop.f32.mrb[5].mxu0  ;;  %v3807_v24 = vpop.f32.mrb[5].mxu1  ;;  %8402 = vst.msk [vmem:[%s11846_s24 + $0xc] sm:$0xf] %vm8398_vm1, %v10008_v15  ;;  %v10006_v26 = vpack.c.bf16 %v5839_v21, %v5839_v21  ;;  %v6095_v27 = vsel %vm5071_vm9, %v3794_v4, %v5583_v17  ;;  %vm5076_vm11 = vcmp.ge.f32.partialorder %v11044_v19, 0.0  ;;  %v11432_v3 = vld [vmem:[%s11615_s21 + $0x5e0] sm:$0xff]  }
  0xf0   : > { %v5588_v28 = vmul.f32 0.2, %v11044_v19  ;;  %v10789_v29 = vpop.f32.mrb[6].mxu0  ;;  %v11045_v30 = vpop.f32.mrb[6].mxu1  ;;  %8658 = vst.msk [vmem:[%s11846_s24 + $0x40c] sm:$0xf] %vm8398_vm1, %v10264_v20  ;;  %v10262_v32 = vpack.c.bf16 %v6095_v27, %v6095_v27  ;;  %v5844_v33 = vsel %vm4820_vm10, %v10788_v18, %v5332_v22 }
  0xf1   : > { %vm4818_vm12 = vcmp.ge.f32.partialorder %v2783_v23, 0.0  ;;  %v5330_v34 = vmul.f32 0.2, %v2783_v23  ;;  %v2786_v35 = vpop.f32.mrb[7].mxu0  ;;  %v3810_v36 = vpop.f32.mrb[7].mxu1  ;;  %v10011_v37 = vpack.c.bf16 %v5844_v33, %v5844_v33  ;;  %vm5074_vm13 = vcmp.ge.f32.partialorder %v3807_v24, 0.0 }
  0xf2   : > { %8400 = vst.msk [vmem:[%s11846_s24 + $0x4] sm:$0xf] %vm8398_vm1, %v10006_v26  ;;  %v6100_v38 = vsel %vm5076_vm11, %v11044_v19, %v5588_v28  ;;  %v5586_v39 = vmul.f32 0.2, %v3807_v24  ;;  %8656 = vst.msk [vmem:[%s11846_s24 + $0x404] sm:$0xf] %vm8398_vm1, %v10262_v32  ;;  %10895 = vmatmul.mubr.msk.bf16.gmra.mrb[112].mxu0 %vm1964_vm0, %v11425_v13 }
  0xf3   : > { %v10267_v40 = vpack.c.bf16 %v6100_v38, %v6100_v38  ;;  %v5842_v41 = vsel %vm4818_vm12, %v2783_v23, %v5330_v34  ;;  %vm4821_vm14 = vcmp.ge.f32.partialorder %v10789_v29, 0.0  ;;  %v5333_v42 = vmul.f32 0.2, %v10789_v29  ;;  %11151 = vmatmul.mubr.msk.bf16.gmra.mrb[112].mxu1 %vm1964_vm0, %v11426_v14  ;;  %8405 = vst.msk [vmem:[%s11846_s24 + $0x18] sm:$0xf] %vm8398_vm1, %v10011_v37  ;;  %10898 = vmatprep.mubr.msk.bf16.mxu0 %vm1964_vm0, %v11427_v25  ;;  %v11433_v21 = vld [vmem:[%s11615_s21 + $0x1e8] sm:$0xff]  }
  0xf4   : > { %v10009_v43 = vpack.c.bf16 %v5842_v41, %v5842_v41  ;;  %v6098_v44 = vsel %vm5074_vm13, %v3807_v24, %v5586_v39  ;;  %vm5077_vm15 = vcmp.ge.f32.partialorder %v11045_v30, 0.0  ;;  %v5589_v45 = vmul.f32 0.2, %v11045_v30  ;;  %11154 = vmatprep.mubr.msk.bf16.mxu1 %vm1964_vm0, %v11428_v31  ;;  %v11434_v27 = vld [vmem:[%s11615_s21 + $0x5e8] sm:$0xff]   ;;  %v11435_v33 = vld [vmem:[%s11615_s21 + $0x1f0] sm:$0xff]  }
  0xf5   : > { %8661 = vst.msk [vmem:[%s11846_s24 + $0x418] sm:$0xf] %vm8398_vm1, %v10267_v40  ;;  %v10265_v46 = vpack.c.bf16 %v6098_v44, %v6098_v44  ;;  %v5845_v47 = vsel %vm4821_vm14, %v10789_v29, %v5333_v42  ;;  %vm4819_vm2 = vcmp.ge.f32.partialorder %v2786_v35, 0.0  ;;  %v5331_v48 = vmul.f32 0.2, %v2786_v35  ;;  %v10792_v53 = vpop.f32.mrb[8].mxu0 }
  0xf6   : > { %8403 = vst.msk [vmem:[%s11846_s24 + $0x10] sm:$0xf] %vm8398_vm1, %v10009_v43  ;;  %v10012_v50 = vpack.c.bf16 %v5845_v47, %v5845_v47  ;;  %v6101_v51 = vsel %vm5077_vm15, %v11045_v30, %v5589_v45  ;;  %vm5075_vm3 = vcmp.ge.f32.partialorder %v3810_v36, 0.0  ;;  %v5587_v52 = vmul.f32 0.2, %v3810_v36  ;;  %v11048_v54 = vpop.f32.mrb[8].mxu1 }
  0xf7   : > { %8659 = vst.msk [vmem:[%s11846_s24 + $0x410] sm:$0xf] %vm8398_vm1, %v10265_v46  ;;  %v10268_v56 = vpack.c.bf16 %v6101_v51, %v6101_v51  ;;  %v5843_v57 = vsel %vm4819_vm2, %v2786_v35, %v5331_v48  ;;  %vm4824_vm4 = vcmp.ge.f32.partialorder %v10792_v53, 0.0  ;;  %v5336_v58 = vmul.f32 0.2, %v10792_v53  ;;  %v2799_v59 = vpop.f32.mrb[9].mxu0 }
  0xf8   : > { %v3823_v60 = vpop.f32.mrb[9].mxu1  ;;  %8406 = vst.msk [vmem:[%s11846_s24 + $0x1c] sm:$0xf] %vm8398_vm1, %v10012_v50  ;;  %v10010_v62 = vpack.c.bf16 %v5843_v57, %v5843_v57  ;;  %v6099_v63 = vsel %vm5075_vm3, %v3810_v36, %v5587_v52  ;;  %vm5080_vm5 = vcmp.ge.f32.partialorder %v11048_v54, 0.0  ;;  %v5592_v0 = vmul.f32 0.2, %v11048_v54 }
  0xf9   : > { %v10793_v1 = vpop.f32.mrb[10].mxu0  ;;  %v11049_v2 = vpop.f32.mrb[10].mxu1  ;;  %8662 = vst.msk [vmem:[%s11846_s24 + $0x41c] sm:$0xf] %vm8398_vm1, %v10268_v56  ;;  %v10266_v4 = vpack.c.bf16 %v6099_v63, %v6099_v63  ;;  %v5848_v5 = vsel %vm4824_vm4, %v10792_v53, %v5336_v58  ;;  %vm4822_vm6 = vcmp.ge.f32.partialorder %v2799_v59, 0.0  ;;  %vm5078_vm7 = vcmp.ge.f32.partialorder %v3823_v60, 0.0 }
  0xfa   : > { %v5334_v6 = vmul.f32 0.2, %v2799_v59  ;;  %v2802_v7 = vpop.f32.mrb[11].mxu0  ;;  %v3826_v8 = vpop.f32.mrb[11].mxu1  ;;  %8404 = vst.msk [vmem:[%s11846_s24 + $0x14] sm:$0xf] %vm8398_vm1, %v10010_v62  ;;  %v10015_v9 = vpack.c.bf16 %v5848_v5, %v5848_v5  ;;  %v6104_v10 = vsel %vm5080_vm5, %v11048_v54, %v5592_v0  ;;  %10899 = vmatmul.mubr.msk.bf16.gmra.mrb[116].mxu0 %vm1964_vm0, %v11429_v49 }
  0xfb   : > { %v5590_v11 = vmul.f32 0.2, %v3823_v60  ;;  %8660 = vst.msk [vmem:[%s11846_s24 + $0x414] sm:$0xf] %vm8398_vm1, %v10266_v4  ;;  %v10271_v12 = vpack.c.bf16 %v6104_v10, %v6104_v10  ;;  %vm4825_vm8 = vcmp.ge.f32.partialorder %v10793_v1, 0.0  ;;  %11155 = vmatmul.mubr.msk.bf16.gmra.mrb[116].mxu1 %vm1964_vm0, %v11430_v55  ;;  %vm5081_vm9 = vcmp.ge.f32.partialorder %v11049_v2, 0.0  ;;  %10902 = vmatprep.mubr.msk.bf16.mxu0 %vm1964_vm0, %v11431_v61 }
  0xfc   : > { %v5846_v13 = vsel %vm4822_vm6, %v2799_v59, %v5334_v6  ;;  %v5337_v14 = vmul.f32 0.2, %v10793_v1  ;;  %8409 = vst.msk [vmem:[%s11846_s24 + $0x28] sm:$0xf] %vm8398_vm1, %v10015_v9  ;;  %v5593_v17 = vmul.f32 0.2, %v11049_v2  ;;  %11158 = vmatprep.mubr.msk.bf16.mxu1 %vm1964_vm0, %v11432_v3 }
  0xfd   : > { %v10013_v15 = vpack.c.bf16 %v5846_v13, %v5846_v13  ;;  %v6102_v16 = vsel %vm5078_vm7, %v3823_v60, %v5590_v11  ;;  %8665 = vst.msk [vmem:[%s11846_s24 + $0x428] sm:$0xf] %vm8398_vm1, %v10271_v12  ;;  %vm4823_vm10 = vcmp.ge.f32.partialorder %v2802_v7, 0.0  ;;  %v5335_v20 = vmul.f32 0.2, %v2802_v7  ;;  %v10796_v25 = vpop.f32.mrb[12].mxu0 }
  0xfe   : > { %v10269_v18 = vpack.c.bf16 %v6102_v16, %v6102_v16  ;;  %v5849_v19 = vsel %vm4825_vm8, %v10793_v1, %v5337_v14  ;;  %v6105_v23 = vsel %vm5081_vm9, %v11049_v2, %v5593_v17  ;;  %vm5079_vm11 = vcmp.ge.f32.partialorder %v3826_v8, 0.0  ;;  %v11052_v26 = vpop.f32.mrb[12].mxu1  ;;  %v2815_v31 = vpop.f32.mrb[13].mxu0  ;;  %v11436_v39 = vld [vmem:[%s11615_s21 + $0x5f0] sm:$0xff]   ;;  %v11437_v57 = vld [vmem:[%s11615_s21 + $0x1f8] sm:$0xff]   ;;  %v11439_v5 = vld [vmem:[%s11615_s21 + $0x200] sm:$0xff]  }
  0xff   : > { %8407 = vst.msk [vmem:[%s11846_s24 + $0x20] sm:$0xf] %vm8398_vm1, %v10013_v15  ;;  %v10016_v22 = vpack.c.bf16 %v5849_v19, %v5849_v19  ;;  %v5591_v24 = vmul.f32 0.2, %v3826_v8  ;;  %v10272_v28 = vpack.c.bf16 %v6105_v23, %v6105_v23  ;;  %v5847_v29 = vsel %vm4823_vm10, %v2802_v7, %v5335_v20  ;;  %v3839_v32 = vpop.f32.mrb[13].mxu1  ;;  %v10797_v37 = vpop.f32.mrb[14].mxu0 }
 0x100   : > { %8663 = vst.msk [vmem:[%s11846_s24 + $0x420] sm:$0xf] %vm8398_vm1, %v10269_v18  ;;  %vm4828_vm12 = vcmp.ge.f32.partialorder %v10796_v25, 0.0  ;;  %v5340_v30 = vmul.f32 0.2, %v10796_v25  ;;  %v10014_v34 = vpack.c.bf16 %v5847_v29, %v5847_v29  ;;  %vm5084_vm13 = vcmp.ge.f32.partialorder %v11052_v26, 0.0 }
 0x101   : > { %8410 = vst.msk [vmem:[%s11846_s24 + $0x2c] sm:$0xf] %vm8398_vm1, %v10016_v22  ;;  %v6103_v35 = vsel %vm5079_vm11, %v3826_v8, %v5591_v24  ;;  %v5596_v36 = vmul.f32 0.2, %v11052_v26  ;;  %v11053_v38 = vpop.f32.mrb[14].mxu1  ;;  %vm4826_vm14 = vcmp.ge.f32.partialorder %v2815_v31, 0.0 }
 0x102   : > { %8666 = vst.msk [vmem:[%s11846_s24 + $0x42c] sm:$0xf] %vm8398_vm1, %v10272_v28  ;;  %v10270_v40 = vpack.c.bf16 %v6103_v35, %v6103_v35  ;;  %v5852_v41 = vsel %vm4828_vm12, %v10796_v25, %v5340_v30  ;;  %v5338_v42 = vmul.f32 0.2, %v2815_v31  ;;  %v2818_v43 = vpop.f32.mrb[15].mxu0  ;;  %v3842_v44 = vpop.f32.mrb[15].mxu1  ;;  %10903 = vmatmul.mubr.msk.bf16.gmra.mrb[120].mxu0 %vm1964_vm0, %v11433_v21 }
 0x103   : > { %8408 = vst.msk [vmem:[%s11846_s24 + $0x24] sm:$0xf] %vm8398_vm1, %v10014_v34  ;;  %v10019_v45 = vpack.c.bf16 %v5852_v41, %v5852_v41  ;;  %v6108_v46 = vsel %vm5084_vm13, %v11052_v26, %v5596_v36  ;;  %vm5082_vm15 = vcmp.ge.f32.partialorder %v3839_v32, 0.0  ;;  %v5594_v47 = vmul.f32 0.2, %v3839_v32  ;;  %11159 = vmatmul.mubr.msk.bf16.gmra.mrb[120].mxu1 %vm1964_vm0, %v11434_v27  ;;  %10906 = vmatprep.mubr.msk.bf16.mxu0 %vm1964_vm0, %v11435_v33  ;;  %v11438_v63 = vld [vmem:[%s11615_s21 + $0x5f8] sm:$0xff]  }
 0x104   : > { %8664 = vst.msk [vmem:[%s11846_s24 + $0x424] sm:$0xf] %vm8398_vm1, %v10270_v40  ;;  %v10275_v48 = vpack.c.bf16 %v6108_v46, %v6108_v46  ;;  %v5850_v49 = vsel %vm4826_vm14, %v2815_v31, %v5338_v42  ;;  %vm4829_vm2 = vcmp.ge.f32.partialorder %v10797_v37, 0.0  ;;  %v5341_v50 = vmul.f32 0.2, %v10797_v37  ;;  %11162 = vmatprep.mubr.msk.bf16.mxu1 %vm1964_vm0, %v11436_v39  ;;  %v11440_v11 = vld [vmem:[%s11615_s21 + $0x600] sm:$0xff]  }
 0x105   : > { %8413 = vst.msk [vmem:[%s11846_s24 + $0x38] sm:$0xf] %vm8398_vm1, %v10019_v45  ;;  %v10017_v51 = vpack.c.bf16 %v5850_v49, %v5850_v49  ;;  %v6106_v52 = vsel %vm5082_vm15, %v3839_v32, %v5594_v47  ;;  %vm5085_vm3 = vcmp.ge.f32.partialorder %v11053_v38, 0.0  ;;  %v5597_v53 = vmul.f32 0.2, %v11053_v38  ;;  %v10800_v61 = vpop.f32.mrb[16].mxu0 }
 0x106   : > { %8669 = vst.msk [vmem:[%s11846_s24 + $0x438] sm:$0xf] %vm8398_vm1, %v10275_v48  ;;  %v10273_v54 = vpack.c.bf16 %v6106_v52, %v6106_v52  ;;  %v5853_v55 = vsel %vm4829_vm2, %v10797_v37, %v5341_v50  ;;  %vm4827_vm4 = vcmp.ge.f32.partialorder %v2818_v43, 0.0  ;;  %v5339_v56 = vmul.f32 0.2, %v2818_v43  ;;  %v11056_v62 = vpop.f32.mrb[16].mxu1 }
 0x107   : > { %8411 = vst.msk [vmem:[%s11846_s24 + $0x30] sm:$0xf] %vm8398_vm1, %v10017_v51  ;;  %v10020_v58 = vpack.c.bf16 %v5853_v55, %v5853_v55  ;;  %v6109_v59 = vsel %vm5085_vm3, %v11053_v38, %v5597_v53  ;;  %vm5083_vm5 = vcmp.ge.f32.partialorder %v3842_v44, 0.0  ;;  %v5595_v60 = vmul.f32 0.2, %v3842_v44  ;;  %v2831_v3 = vpop.f32.mrb[17].mxu0 }
 0x108   : > { %8667 = vst.msk [vmem:[%s11846_s24 + $0x430] sm:$0xf] %vm8398_vm1, %v10273_v54  ;;  %v10276_v0 = vpack.c.bf16 %v6109_v59, %v6109_v59  ;;  %v5851_v1 = vsel %vm4827_vm4, %v2818_v43, %v5339_v56  ;;  %vm4832_vm6 = vcmp.ge.f32.partialorder %v10800_v61, 0.0  ;;  %v5344_v2 = vmul.f32 0.2, %v10800_v61  ;;  %v3855_v4 = vpop.f32.mrb[17].mxu1 }
 0x109   : > { %8414 = vst.msk [vmem:[%s11846_s24 + $0x3c] sm:$0xf] %vm8398_vm1, %v10020_v58  ;;  %v10018_v6 = vpack.c.bf16 %v5851_v1, %v5851_v1  ;;  %v6107_v7 = vsel %vm5083_vm5, %v3842_v44, %v5595_v60  ;;  %vm5088_vm7 = vcmp.ge.f32.partialorder %v11056_v62, 0.0  ;;  %v5600_v8 = vmul.f32 0.2, %v11056_v62  ;;  %v10801_v9 = vpop.f32.mrb[18].mxu0 }
 0x10a   : > { %v11057_v10 = vpop.f32.mrb[18].mxu1  ;;  %8670 = vst.msk [vmem:[%s11846_s24 + $0x43c] sm:$0xf] %vm8398_vm1, %v10276_v0  ;;  %v10274_v12 = vpack.c.bf16 %v6107_v7, %v6107_v7  ;;  %v5856_v13 = vsel %vm4832_vm6, %v10800_v61, %v5344_v2  ;;  %vm4830_vm8 = vcmp.ge.f32.partialorder %v2831_v3, 0.0  ;;  %v5342_v14 = vmul.f32 0.2, %v2831_v3  ;;  %10907 = vmatmul.mubr.msk.bf16.gmra.mrb[124].mxu0 %vm1964_vm0, %v11437_v57 }
 0x10b   : > { %v2834_v15 = vpop.f32.mrb[19].mxu0  ;;  %v3858_v16 = vpop.f32.mrb[19].mxu1  ;;  %8412 = vst.msk [vmem:[%s11846_s24 + $0x34] sm:$0xf] %vm8398_vm1, %v10018_v6  ;;  %v10023_v17 = vpack.c.bf16 %v5856_v13, %v5856_v13  ;;  %v6112_v18 = vsel %vm5088_vm7, %v11056_v62, %v5600_v8  ;;  %vm5086_vm9 = vcmp.ge.f32.partialorder %v3855_v4, 0.0  ;;  %vm4833_vm10 = vcmp.ge.f32.partialorder %v10801_v9, 0.0  ;;  %11163 = vmatmul.mubr.msk.bf16.gmra.mrb[124].mxu1 %vm1964_vm0, %v11438_v63  ;;  %10910 = vmatprep.mubr.msk.bf16.mxu0 %vm1964_vm0, %v11439_v5 }
 0x10c   : > { %v5598_v19 = vmul.f32 0.2, %v3855_v4  ;;  %8668 = vst.msk [vmem:[%s11846_s24 + $0x434] sm:$0xf] %vm8398_vm1, %v10274_v12  ;;  %v10279_v20 = vpack.c.bf16 %v6112_v18, %v6112_v18  ;;  %v5854_v21 = vsel %vm4830_vm8, %v2831_v3, %v5342_v14  ;;  %v5345_v22 = vmul.f32 0.2, %v10801_v9  ;;  %11166 = vmatprep.mubr.msk.bf16.mxu1 %vm1964_vm0, %v11440_v11 }
 0x10d   : > { %8417 = vst.msk [vmem:[%s11846_s24 + $0x48] sm:$0xf] %vm8398_vm1, %v10023_v17  ;;  %v10021_v23 = vpack.c.bf16 %v5854_v21, %v5854_v21  ;;  %vm5089_vm11 = vcmp.ge.f32.partialorder %v11057_v10, 0.0  ;;  %v5601_v25 = vmul.f32 0.2, %v11057_v10  ;;  %vm4831_vm12 = vcmp.ge.f32.partialorder %v2834_v15, 0.0 }
 0x10e   : > { %v6110_v24 = vsel %vm5086_vm9, %v3855_v4, %v5598_v19  ;;  %8673 = vst.msk [vmem:[%s11846_s24 + $0x448] sm:$0xf] %vm8398_vm1, %v10279_v20  ;;  %v5857_v27 = vsel %vm4833_vm10, %v10801_v9, %v5345_v22  ;;  %v5343_v28 = vmul.f32 0.2, %v2834_v15  ;;  %v11441_v29 = vld [vmem:[%s11615_s21 + $0x208] sm:$0xff]   ;;  %vm5087_vm13 = vcmp.ge.f32.partialorder %v3858_v16, 0.0 }
 0x10f   : > { %v10277_v26 = vpack.c.bf16 %v6110_v24, %v6110_v24  ;;  %8415 = vst.msk [vmem:[%s11846_s24 + $0x40] sm:$0xf] %vm8398_vm1, %v10021_v23  ;;  %v10024_v30 = vpack.c.bf16 %v5857_v27, %v5857_v27  ;;  %v6113_v31 = vsel %vm5089_vm11, %v11057_v10, %v5601_v25  ;;  %v5599_v32 = vmul.f32 0.2, %v3858_v16  ;;  %v10804_v33 = vpop.f32.mrb[20].mxu0  ;;  %v11060_v34 = vpop.f32.mrb[20].mxu1 }
 0x110   : > { %v11442_v35 = vld [vmem:[%s11615_s21 + $0x608] sm:$0xff]   ;;  %v10280_v36 = vpack.c.bf16 %v6113_v31, %v6113_v31  ;;  %v5855_v37 = vsel %vm4831_vm12, %v2834_v15, %v5343_v28  ;;  %vm4836_vm14 = vcmp.ge.f32.partialorder %v10804_v33, 0.0  ;;  %v5348_v38 = vmul.f32 0.2, %v10804_v33  ;;  %v2847_v39 = vpop.f32.mrb[21].mxu0  ;;  %v3871_v40 = vpop.f32.mrb[21].mxu1 }
 0x111   : > { %8671 = vst.msk [vmem:[%s11846_s24 + $0x440] sm:$0xf] %vm8398_vm1, %v10277_v26  ;;  %v11443_v41 = vld [vmem:[%s11615_s21 + $0x210] sm:$0xff]   ;;  %8418 = vst.msk [vmem:[%s11846_s24 + $0x4c] sm:$0xf] %vm8398_vm1, %v10024_v30  ;;  %v10022_v42 = vpack.c.bf16 %v5855_v37, %v5855_v37  ;;  %v6111_v43 = vsel %vm5087_vm13, %v3858_v16, %v5599_v32  ;;  %vm5092_vm15 = vcmp.ge.f32.partialorder %v11060_v34, 0.0 }
 0x112   : > { %v5604_v44 = vmul.f32 0.2, %v11060_v34  ;;  %v10805_v45 = vpop.f32.mrb[22].mxu0  ;;  %v11061_v46 = vpop.f32.mrb[22].mxu1  ;;  %v11444_v47 = vld [vmem:[%s11615_s21 + $0x610] sm:$0xff]   ;;  %v10278_v48 = vpack.c.bf16 %v6111_v43, %v6111_v43  ;;  %v5860_v49 = vsel %vm4836_vm14, %v10804_v33, %v5348_v38  ;;  %vm4834_vm2 = vcmp.ge.f32.partialorder %v2847_v39, 0.0  ;;  %10911 = vmatmul.mubr.msk.bf16.gmra.mrb[128].mxu0 %vm1964_vm0, %v11441_v29 }
 0x113   : > { %8674 = vst.msk [vmem:[%s11846_s24 + $0x44c] sm:$0xf] %vm8398_vm1, %v10280_v36  ;;  %v5346_v50 = vmul.f32 0.2, %v2847_v39  ;;  %v2850_v51 = vpop.f32.mrb[23].mxu0  ;;  %v3874_v52 = vpop.f32.mrb[23].mxu1  ;;  %v10027_v53 = vpack.c.bf16 %v5860_v49, %v5860_v49  ;;  %11167 = vmatmul.mubr.msk.bf16.gmra.mrb[128].mxu1 %vm1964_vm0, %v11442_v35  ;;  %10914 = vmatprep.mubr.msk.bf16.mxu0 %vm1964_vm0, %v11443_v41 }
 0x114   : > { %8416 = vst.msk [vmem:[%s11846_s24 + $0x44] sm:$0xf] %vm8398_vm1, %v10022_v42  ;;  %v6116_v54 = vsel %vm5092_vm15, %v11060_v34, %v5604_v44  ;;  %vm5090_vm3 = vcmp.ge.f32.partialorder %v3871_v40, 0.0  ;;  %v5602_v55 = vmul.f32 0.2, %v3871_v40  ;;  %vm4837_vm4 = vcmp.ge.f32.partialorder %v10805_v45, 0.0  ;;  %11170 = vmatprep.mubr.msk.bf16.mxu1 %vm1964_vm0, %v11444_v47 }
 0x115   : > { %8672 = vst.msk [vmem:[%s11846_s24 + $0x444] sm:$0xf] %vm8398_vm1, %v10278_v48  ;;  %v10283_v56 = vpack.c.bf16 %v6116_v54, %v6116_v54  ;;  %v5858_v57 = vsel %vm4834_vm2, %v2847_v39, %v5346_v50  ;;  %v5349_v58 = vmul.f32 0.2, %v10805_v45  ;;  %8421 = vst.msk [vmem:[%s11846_s24 + $0x58] sm:$0xf] %vm8398_vm1, %v10027_v53 }
 0x116   : > { %v10025_v59 = vpack.c.bf16 %v5858_v57, %v5858_v57  ;;  %v6114_v60 = vsel %vm5090_vm3, %v3871_v40, %v5602_v55  ;;  %vm5093_vm5 = vcmp.ge.f32.partialorder %v11061_v46, 0.0  ;;  %v5605_v61 = vmul.f32 0.2, %v11061_v46  ;;  %v11445_v1 = vld [vmem:[%s11615_s21 + $0x218] sm:$0xff]   ;;  %v10808_v5 = vpop.f32.mrb[24].mxu0  ;;  %v11064_v6 = vpop.f32.mrb[24].mxu1 }
 0x117   : > { %8677 = vst.msk [vmem:[%s11846_s24 + $0x458] sm:$0xf] %vm8398_vm1, %v10283_v56  ;;  %v10281_v62 = vpack.c.bf16 %v6114_v60, %v6114_v60  ;;  %v5861_v63 = vsel %vm4837_vm4, %v10805_v45, %v5349_v58  ;;  %vm4835_vm6 = vcmp.ge.f32.partialorder %v2850_v51, 0.0  ;;  %v5347_v0 = vmul.f32 0.2, %v2850_v51  ;;  %v11446_v7 = vld [vmem:[%s11615_s21 + $0x618] sm:$0xff]  }
 0x118   : > { %8419 = vst.msk [vmem:[%s11846_s24 + $0x50] sm:$0xf] %vm8398_vm1, %v10025_v59  ;;  %v10028_v2 = vpack.c.bf16 %v5861_v63, %v5861_v63  ;;  %v6117_v3 = vsel %vm5093_vm5, %v11061_v46, %v5605_v61  ;;  %vm5091_vm7 = vcmp.ge.f32.partialorder %v3874_v52, 0.0  ;;  %v5603_v4 = vmul.f32 0.2, %v3874_v52  ;;  %v2863_v11 = vpop.f32.mrb[25].mxu0 }
 0x119   : > { %8675 = vst.msk [vmem:[%s11846_s24 + $0x450] sm:$0xf] %vm8398_vm1, %v10281_v62  ;;  %v10284_v8 = vpack.c.bf16 %v6117_v3, %v6117_v3  ;;  %v5859_v9 = vsel %vm4835_vm6, %v2850_v51, %v5347_v0  ;;  %vm4840_vm8 = vcmp.ge.f32.partialorder %v10808_v5, 0.0  ;;  %v5352_v10 = vmul.f32 0.2, %v10808_v5  ;;  %v3887_v12 = vpop.f32.mrb[25].mxu1 }
 0x11a   : > { %v11447_v13 = vld [vmem:[%s11615_s21 + $0x220] sm:$0xff]   ;;  %8422 = vst.msk [vmem:[%s11846_s24 + $0x5c] sm:$0xf] %vm8398_vm1, %v10028_v2  ;;  %v10026_v14 = vpack.c.bf16 %v5859_v9, %v5859_v9  ;;  %v6115_v15 = vsel %vm5091_vm7, %v3874_v52, %v5603_v4  ;;  %vm5096_vm9 = vcmp.ge.f32.partialorder %v11064_v6, 0.0  ;;  %v5608_v16 = vmul.f32 0.2, %v11064_v6  ;;  %10915 = vmatmul.mubr.msk.bf16.gmra.mrb[132].mxu0 %vm1964_vm0, %v11445_v1 }
 0x11b   : > { %v10809_v17 = vpop.f32.mrb[26].mxu0  ;;  %v11065_v18 = vpop.f32.mrb[26].mxu1  ;;  %v11448_v19 = vld [vmem:[%s11615_s21 + $0x620] sm:$0xff]   ;;  %8678 = vst.msk [vmem:[%s11846_s24 + $0x45c] sm:$0xf] %vm8398_vm1, %v10284_v8  ;;  %v10282_v20 = vpack.c.bf16 %v6115_v15, %v6115_v15  ;;  %v5864_v21 = vsel %vm4840_vm8, %v10808_v5, %v5352_v10  ;;  %vm4838_vm10 = vcmp.ge.f32.partialorder %v2863_v11, 0.0  ;;  %11171 = vmatmul.mubr.msk.bf16.gmra.mrb[132].mxu1 %vm1964_vm0, %v11446_v7  ;;  %10918 = vmatprep.mubr.msk.bf16.mxu0 %vm1964_vm0, %v11447_v13 }
 0x11c   : > { %v5350_v22 = vmul.f32 0.2, %v2863_v11  ;;  %v2866_v23 = vpop.f32.mrb[27].mxu0  ;;  %v3890_v24 = vpop.f32.mrb[27].mxu1  ;;  %8420 = vst.msk [vmem:[%s11846_s24 + $0x54] sm:$0xf] %vm8398_vm1, %v10026_v14  ;;  %v10031_v25 = vpack.c.bf16 %v5864_v21, %v5864_v21  ;;  %v6120_v26 = vsel %vm5096_vm9, %v11064_v6, %v5608_v16  ;;  %11174 = vmatprep.mubr.msk.bf16.mxu1 %vm1964_vm0, %v11448_v19 }
 0x11d   : > { %vm5094_vm11 = vcmp.ge.f32.partialorder %v3887_v12, 0.0  ;;  %v5606_v27 = vmul.f32 0.2, %v3887_v12  ;;  %8676 = vst.msk [vmem:[%s11846_s24 + $0x454] sm:$0xf] %vm8398_vm1, %v10282_v20  ;;  %v10287_v28 = vpack.c.bf16 %v6120_v26, %v6120_v26  ;;  %vm4841_vm12 = vcmp.ge.f32.partialorder %v10809_v17, 0.0 }
 0x11e   : > { %v5862_v29 = vsel %vm4838_vm10, %v2863_v11, %v5350_v22  ;;  %v5353_v30 = vmul.f32 0.2, %v10809_v17  ;;  %8425 = vst.msk [vmem:[%s11846_s24 + $0x68] sm:$0xf] %vm8398_vm1, %v10031_v25  ;;  %vm5097_vm13 = vcmp.ge.f32.partialorder %v11065_v18, 0.0  ;;  %vm4839_vm14 = vcmp.ge.f32.partialorder %v2866_v23, 0.0 }
 0x11f   : > { %v10029_v31 = vpack.c.bf16 %v5862_v29, %v5862_v29  ;;  %v6118_v32 = vsel %vm5094_vm11, %v3887_v12, %v5606_v27  ;;  %v5609_v33 = vmul.f32 0.2, %v11065_v18  ;;  %8681 = vst.msk [vmem:[%s11846_s24 + $0x468] sm:$0xf] %vm8398_vm1, %v10287_v28  ;;  %v5351_v36 = vmul.f32 0.2, %v2866_v23 }
 0x120   : > { %v10285_v34 = vpack.c.bf16 %v6118_v32, %v6118_v32  ;;  %v5865_v35 = vsel %vm4841_vm12, %v10809_v17, %v5353_v30  ;;  %v11449_v37 = vld [vmem:[%s11615_s21 + $0x228] sm:$0xff]   ;;  %vm5095_vm15 = vcmp.ge.f32.partialorder %v3890_v24, 0.0  ;;  %v5607_v40 = vmul.f32 0.2, %v3890_v24  ;;  %v10812_v41 = vpop.f32.mrb[28].mxu0  ;;  %v11068_v42 = vpop.f32.mrb[28].mxu1 }
 0x121   : > { %8423 = vst.msk [vmem:[%s11846_s24 + $0x60] sm:$0xf] %vm8398_vm1, %v10029_v31  ;;  %v10032_v38 = vpack.c.bf16 %v5865_v35, %v5865_v35  ;;  %v6121_v39 = vsel %vm5097_vm13, %v11065_v18, %v5609_v33  ;;  %v11450_v43 = vld [vmem:[%s11615_s21 + $0x628] sm:$0xff]   ;;  %v5863_v45 = vsel %vm4839_vm14, %v2866_v23, %v5351_v36  ;;  %vm4844_vm2 = vcmp.ge.f32.partialorder %v10812_v41, 0.0  ;;  %v2879_v47 = vpop.f32.mrb[29].mxu0  ;;  %v3903_v48 = vpop.f32.mrb[29].mxu1 }
 0x122   : > { %8679 = vst.msk [vmem:[%s11846_s24 + $0x460] sm:$0xf] %vm8398_vm1, %v10285_v34  ;;  %v10288_v44 = vpack.c.bf16 %v6121_v39, %v6121_v39  ;;  %v5356_v46 = vmul.f32 0.2, %v10812_v41  ;;  %v11451_v49 = vld [vmem:[%s11615_s21 + $0x230] sm:$0xff]   ;;  %v10030_v50 = vpack.c.bf16 %v5863_v45, %v5863_v45  ;;  %v6119_v51 = vsel %vm5095_vm15, %v3890_v24, %v5607_v40  ;;  %v10813_v53 = vpop.f32.mrb[30].mxu0  ;;  %10919 = vmatmul.mubr.msk.bf16.gmra.mrb[136].mxu0 %vm1964_vm0, %v11449_v37 }
 0x123   : > { %8426 = vst.msk [vmem:[%s11846_s24 + $0x6c] sm:$0xf] %vm8398_vm1, %v10032_v38  ;;  %vm5100_vm3 = vcmp.ge.f32.partialorder %v11068_v42, 0.0  ;;  %v5612_v52 = vmul.f32 0.2, %v11068_v42  ;;  %v11069_v54 = vpop.f32.mrb[30].mxu1  ;;  %v10286_v56 = vpack.c.bf16 %v6119_v51, %v6119_v51  ;;  %11175 = vmatmul.mubr.msk.bf16.gmra.mrb[136].mxu1 %vm1964_vm0, %v11450_v43  ;;  %10922 = vmatprep.mubr.msk.bf16.mxu0 %vm1964_vm0, %v11451_v49 }
 0x124   : > { %v11452_v55 = vld [vmem:[%s11615_s21 + $0x630] sm:$0xff]   ;;  %8682 = vst.msk [vmem:[%s11846_s24 + $0x46c] sm:$0xf] %vm8398_vm1, %v10288_v44  ;;  %v5868_v57 = vsel %vm4844_vm2, %v10812_v41, %v5356_v46  ;;  %vm4842_vm4 = vcmp.ge.f32.partialorder %v2879_v47, 0.0  ;;  %v5354_v58 = vmul.f32 0.2, %v2879_v47 }
 0x125   : > { %v2882_v59 = vpop.f32.mrb[31].mxu0  ;;  %v3906_v60 = vpop.f32.mrb[31].mxu1  ;;  %8424 = vst.msk [vmem:[%s11846_s24 + $0x64] sm:$0xf] %vm8398_vm1, %v10030_v50  ;;  %v10035_v61 = vpack.c.bf16 %v5868_v57, %v5868_v57  ;;  %v6124_v62 = vsel %vm5100_vm3, %v11068_v42, %v5612_v52  ;;  %vm5098_vm5 = vcmp.ge.f32.partialorder %v3903_v48, 0.0  ;;  %vm4845_vm6 = vcmp.ge.f32.partialorder %v10813_v53, 0.0  ;;  %11178 = vmatprep.mubr.msk.bf16.mxu1 %vm1964_vm0, %v11452_v55 }
 0x126   : > { %v5610_v63 = vmul.f32 0.2, %v3903_v48  ;;  %8680 = vst.msk [vmem:[%s11846_s24 + $0x464] sm:$0xf] %vm8398_vm1, %v10286_v56  ;;  %v10291_v0 = vpack.c.bf16 %v6124_v62, %v6124_v62  ;;  %v5866_v1 = vsel %vm4842_vm4, %v2879_v47, %v5354_v58  ;;  %v5357_v2 = vmul.f32 0.2, %v10813_v53 }
 0x127   : > { %8429 = vst.msk [vmem:[%s11846_s24 + $0x78] sm:$0xf] %vm8398_vm1, %v10035_v61  ;;  %v10033_v3 = vpack.c.bf16 %v5866_v1, %v5866_v1  ;;  %vm5101_vm7 = vcmp.ge.f32.partialorder %v11069_v54, 0.0  ;;  %v5613_v5 = vmul.f32 0.2, %v11069_v54  ;;  %vm4843_vm8 = vcmp.ge.f32.partialorder %v2882_v59, 0.0 }
 0x128   : > { %v6122_v4 = vsel %vm5098_vm5, %v3903_v48, %v5610_v63  ;;  %8685 = vst.msk [vmem:[%s11846_s24 + $0x478] sm:$0xf] %vm8398_vm1, %v10291_v0  ;;  %v5869_v7 = vsel %vm4845_vm6, %v10813_v53, %v5357_v2  ;;  %v5355_v8 = vmul.f32 0.2, %v2882_v59  ;;  %v11453_v9 = vld [vmem:[%s11615_s21 + $0x238] sm:$0xff]   ;;  %vm5099_vm9 = vcmp.ge.f32.partialorder %v3906_v60, 0.0 }
 0x129   : > { %v10289_v6 = vpack.c.bf16 %v6122_v4, %v6122_v4  ;;  %8427 = vst.msk [vmem:[%s11846_s24 + $0x70] sm:$0xf] %vm8398_vm1, %v10033_v3  ;;  %v10036_v10 = vpack.c.bf16 %v5869_v7, %v5869_v7  ;;  %v6125_v11 = vsel %vm5101_vm7, %v11069_v54, %v5613_v5  ;;  %v5611_v12 = vmul.f32 0.2, %v3906_v60  ;;  %v10816_v13 = vpop.f32.mrb[32].mxu0  ;;  %v11072_v14 = vpop.f32.mrb[32].mxu1 }
 0x12a   : > { %v11454_v15 = vld [vmem:[%s11615_s21 + $0x638] sm:$0xff]   ;;  %v10292_v16 = vpack.c.bf16 %v6125_v11, %v6125_v11  ;;  %v5867_v17 = vsel %vm4843_vm8, %v2882_v59, %v5355_v8  ;;  %vm4848_vm10 = vcmp.ge.f32.partialorder %v10816_v13, 0.0  ;;  %v5360_v18 = vmul.f32 0.2, %v10816_v13  ;;  %v2895_v19 = vpop.f32.mrb[33].mxu0  ;;  %v3919_v20 = vpop.f32.mrb[33].mxu1  ;;  %10923 = vmatmul.mubr.msk.bf16.gmra.mrb[140].mxu0 %vm1964_vm0, %v11453_v9 }
 0x12b   : > { %8683 = vst.msk [vmem:[%s11846_s24 + $0x470] sm:$0xf] %vm8398_vm1, %v10289_v6  ;;  %v11455_v21 = vld [vmem:[%s11615_s21 + $0x240] sm:$0xff]   ;;  %8430 = vst.msk [vmem:[%s11846_s24 + $0x7c] sm:$0xf] %vm8398_vm1, %v10036_v10  ;;  %v10034_v22 = vpack.c.bf16 %v5867_v17, %v5867_v17  ;;  %v6123_v23 = vsel %vm5099_vm9, %v3906_v60, %v5611_v12  ;;  %vm5104_vm11 = vcmp.ge.f32.partialorder %v11072_v14, 0.0  ;;  %11179 = vmatmul.mubr.msk.bf16.gmra.mrb[140].mxu1 %vm1964_vm0, %v11454_v15 }
 0x12c   : > { %v5616_v24 = vmul.f32 0.2, %v11072_v14  ;;  %v10817_v25 = vpop.f32.mrb[34].mxu0  ;;  %v11073_v26 = vpop.f32.mrb[34].mxu1  ;;  %v11456_v27 = vld [vmem:[%s11615_s21 + $0x640] sm:$0xff]   ;;  %v10290_v28 = vpack.c.bf16 %v6123_v23, %v6123_v23  ;;  %v5872_v29 = vsel %vm4848_vm10, %v10816_v13, %v5360_v18  ;;  %vm4846_vm12 = vcmp.ge.f32.partialorder %v2895_v19, 0.0  ;;  %10926 = vmatprep.mubr.msk.bf16.mxu0 %vm1964_vm0, %v11455_v21 }
 0x12d   : > { %8686 = vst.msk [vmem:[%s11846_s24 + $0x47c] sm:$0xf] %vm8398_vm1, %v10292_v16  ;;  %v5358_v30 = vmul.f32 0.2, %v2895_v19  ;;  %v2898_v31 = vpop.f32.mrb[35].mxu0  ;;  %v3922_v32 = vpop.f32.mrb[35].mxu1  ;;  %v10039_v33 = vpack.c.bf16 %v5872_v29, %v5872_v29  ;;  %11182 = vmatprep.mubr.msk.bf16.mxu1 %vm1964_vm0, %v11456_v27 }
 0x12e   : > { %8428 = vst.msk [vmem:[%s11846_s24 + $0x74] sm:$0xf] %vm8398_vm1, %v10034_v22  ;;  %v6128_v34 = vsel %vm5104_vm11, %v11072_v14, %v5616_v24  ;;  %vm5102_vm13 = vcmp.ge.f32.partialorder %v3919_v20, 0.0  ;;  %v5614_v35 = vmul.f32 0.2, %v3919_v20  ;;  %vm4849_vm14 = vcmp.ge.f32.partialorder %v10817_v25, 0.0 }
 0x12f   : > { %8684 = vst.msk [vmem:[%s11846_s24 + $0x474] sm:$0xf] %vm8398_vm1, %v10290_v28  ;;  %v10295_v36 = vpack.c.bf16 %v6128_v34, %v6128_v34  ;;  %v5870_v37 = vsel %vm4846_vm12, %v2895_v19, %v5358_v30  ;;  %v5361_v38 = vmul.f32 0.2, %v10817_v25  ;;  %8433 = vst.msk [vmem:[%s11846_s24 + $0x88] sm:$0xf] %vm8398_vm1, %v10039_v33 }
 0x130   : > { %v10037_v39 = vpack.c.bf16 %v5870_v37, %v5870_v37  ;;  %v6126_v40 = vsel %vm5102_vm13, %v3919_v20, %v5614_v35  ;;  %vm5105_vm15 = vcmp.ge.f32.partialorder %v11073_v26, 0.0  ;;  %v5617_v41 = vmul.f32 0.2, %v11073_v26  ;;  %v11457_v45 = vld [vmem:[%s11615_s21 + $0x248] sm:$0xff]   ;;  %v10820_v49 = vpop.f32.mrb[36].mxu0  ;;  %v11076_v50 = vpop.f32.mrb[36].mxu1 }
 0x131   : > { %8689 = vst.msk [vmem:[%s11846_s24 + $0x488] sm:$0xf] %vm8398_vm1, %v10295_v36  ;;  %v10293_v42 = vpack.c.bf16 %v6126_v40, %v6126_v40  ;;  %v5873_v43 = vsel %vm4849_vm14, %v10817_v25, %v5361_v38  ;;  %vm4847_vm2 = vcmp.ge.f32.partialorder %v2898_v31, 0.0  ;;  %v5359_v44 = vmul.f32 0.2, %v2898_v31  ;;  %v11458_v51 = vld [vmem:[%s11615_s21 + $0x648] sm:$0xff]  }
 0x132   : > { %8431 = vst.msk [vmem:[%s11846_s24 + $0x80] sm:$0xf] %vm8398_vm1, %v10037_v39  ;;  %v10040_v46 = vpack.c.bf16 %v5873_v43, %v5873_v43  ;;  %v6129_v47 = vsel %vm5105_vm15, %v11073_v26, %v5617_v41  ;;  %vm5103_vm3 = vcmp.ge.f32.partialorder %v3922_v32, 0.0  ;;  %v5615_v48 = vmul.f32 0.2, %v3922_v32  ;;  %v2911_v55 = vpop.f32.mrb[37].mxu0  ;;  %10927 = vmatmul.mubr.msk.bf16.gmra.mrb[144].mxu0 %vm1964_vm0, %v11457_v45 }
 0x133   : > { %8687 = vst.msk [vmem:[%s11846_s24 + $0x480] sm:$0xf] %vm8398_vm1, %v10293_v42  ;;  %v10296_v52 = vpack.c.bf16 %v6129_v47, %v6129_v47  ;;  %v5871_v53 = vsel %vm4847_vm2, %v2898_v31, %v5359_v44  ;;  %vm4852_vm4 = vcmp.ge.f32.partialorder %v10820_v49, 0.0  ;;  %v5364_v54 = vmul.f32 0.2, %v10820_v49  ;;  %v3935_v56 = vpop.f32.mrb[37].mxu1  ;;  %11183 = vmatmul.mubr.msk.bf16.gmra.mrb[144].mxu1 %vm1964_vm0, %v11458_v51 }
 0x134   : > { %v11459_v57 = vld [vmem:[%s11615_s21 + $0x250] sm:$0xff]   ;;  %8434 = vst.msk [vmem:[%s11846_s24 + $0x8c] sm:$0xf] %vm8398_vm1, %v10040_v46  ;;  %v10038_v58 = vpack.c.bf16 %v5871_v53, %v5871_v53  ;;  %v6127_v59 = vsel %vm5103_vm3, %v3922_v32, %v5615_v48  ;;  %vm5108_vm5 = vcmp.ge.f32.partialorder %v11076_v50, 0.0  ;;  %v5620_v60 = vmul.f32 0.2, %v11076_v50 }
 0x135   : > { %v10821_v61 = vpop.f32.mrb[38].mxu0  ;;  %v11077_v62 = vpop.f32.mrb[38].mxu1  ;;  %v11460_v63 = vld [vmem:[%s11615_s21 + $0x650] sm:$0xff]   ;;  %8690 = vst.msk [vmem:[%s11846_s24 + $0x48c] sm:$0xf] %vm8398_vm1, %v10296_v52  ;;  %v10294_v0 = vpack.c.bf16 %v6127_v59, %v6127_v59  ;;  %v5876_v1 = vsel %vm4852_vm4, %v10820_v49, %v5364_v54  ;;  %vm4850_vm6 = vcmp.ge.f32.partialorder %v2911_v55, 0.0  ;;  %10930 = vmatprep.mubr.msk.bf16.mxu0 %vm1964_vm0, %v11459_v57 }
 0x136   : > { %v5362_v2 = vmul.f32 0.2, %v2911_v55  ;;  %v2914_v3 = vpop.f32.mrb[39].mxu0  ;;  %v3938_v4 = vpop.f32.mrb[39].mxu1  ;;  %8432 = vst.msk [vmem:[%s11846_s24 + $0x84] sm:$0xf] %vm8398_vm1, %v10038_v58  ;;  %v10043_v5 = vpack.c.bf16 %v5876_v1, %v5876_v1  ;;  %v6132_v6 = vsel %vm5108_vm5, %v11076_v50, %v5620_v60  ;;  %11186 = vmatprep.mubr.msk.bf16.mxu1 %vm1964_vm0, %v11460_v63 }
 0x137   : > { %vm5106_vm7 = vcmp.ge.f32.partialorder %v3935_v56, 0.0  ;;  %v5618_v7 = vmul.f32 0.2, %v3935_v56  ;;  %8688 = vst.msk [vmem:[%s11846_s24 + $0x484] sm:$0xf] %vm8398_vm1, %v10294_v0  ;;  %v10299_v8 = vpack.c.bf16 %v6132_v6, %v6132_v6  ;;  %vm4853_vm8 = vcmp.ge.f32.partialorder %v10821_v61, 0.0 }
 0x138   : > { %v5874_v9 = vsel %vm4850_vm6, %v2911_v55, %v5362_v2  ;;  %v5365_v10 = vmul.f32 0.2, %v10821_v61  ;;  %8437 = vst.msk [vmem:[%s11846_s24 + $0x98] sm:$0xf] %vm8398_vm1, %v10043_v5  ;;  %vm5109_vm9 = vcmp.ge.f32.partialorder %v11077_v62, 0.0  ;;  %vm4851_vm10 = vcmp.ge.f32.partialorder %v2914_v3, 0.0 }
 0x139   : > { %v10041_v11 = vpack.c.bf16 %v5874_v9, %v5874_v9  ;;  %v6130_v12 = vsel %vm5106_vm7, %v3935_v56, %v5618_v7  ;;  %v5621_v13 = vmul.f32 0.2, %v11077_v62  ;;  %8693 = vst.msk [vmem:[%s11846_s24 + $0x498] sm:$0xf] %vm8398_vm1, %v10299_v8  ;;  %v5363_v16 = vmul.f32 0.2, %v2914_v3 }
 0x13a   : > { %v10297_v14 = vpack.c.bf16 %v6130_v12, %v6130_v12  ;;  %v5877_v15 = vsel %vm4853_vm8, %v10821_v61, %v5365_v10  ;;  %v11461_v17 = vld [vmem:[%s11615_s21 + $0x258] sm:$0xff]   ;;  %vm5107_vm11 = vcmp.ge.f32.partialorder %v3938_v4, 0.0  ;;  %v5619_v20 = vmul.f32 0.2, %v3938_v4  ;;  %v10824_v21 = vpop.f32.mrb[40].mxu0  ;;  %v11080_v22 = vpop.f32.mrb[40].mxu1 }
 0x13b   : > { %8435 = vst.msk [vmem:[%s11846_s24 + $0x90] sm:$0xf] %vm8398_vm1, %v10041_v11  ;;  %v10044_v18 = vpack.c.bf16 %v5877_v15, %v5877_v15  ;;  %v6133_v19 = vsel %vm5109_vm9, %v11077_v62, %v5621_v13  ;;  %v11462_v23 = vld [vmem:[%s11615_s21 + $0x658] sm:$0xff]   ;;  %v5875_v25 = vsel %vm4851_vm10, %v2914_v3, %v5363_v16  ;;  %vm4856_vm12 = vcmp.ge.f32.partialorder %v10824_v21, 0.0  ;;  %v2927_v27 = vpop.f32.mrb[41].mxu0  ;;  %v3951_v28 = vpop.f32.mrb[41].mxu1  ;;  %10931 = vmatmul.mubr.msk.bf16.gmra.mrb[148].mxu0 %vm1964_vm0, %v11461_v17 }
 0x13c   : > { %8691 = vst.msk [vmem:[%s11846_s24 + $0x490] sm:$0xf] %vm8398_vm1, %v10297_v14  ;;  %v10300_v24 = vpack.c.bf16 %v6133_v19, %v6133_v19  ;;  %v5368_v26 = vmul.f32 0.2, %v10824_v21  ;;  %v11463_v29 = vld [vmem:[%s11615_s21 + $0x260] sm:$0xff]   ;;  %v10042_v30 = vpack.c.bf16 %v5875_v25, %v5875_v25  ;;  %v6131_v31 = vsel %vm5107_vm11, %v3938_v4, %v5619_v20  ;;  %v10825_v33 = vpop.f32.mrb[42].mxu0  ;;  %11187 = vmatmul.mubr.msk.bf16.gmra.mrb[148].mxu1 %vm1964_vm0, %v11462_v23 }
 0x13d   : > { %8438 = vst.msk [vmem:[%s11846_s24 + $0x9c] sm:$0xf] %vm8398_vm1, %v10044_v18  ;;  %vm5112_vm13 = vcmp.ge.f32.partialorder %v11080_v22, 0.0  ;;  %v5624_v32 = vmul.f32 0.2, %v11080_v22  ;;  %v11081_v34 = vpop.f32.mrb[42].mxu1  ;;  %v10298_v36 = vpack.c.bf16 %v6131_v31, %v6131_v31  ;;  %10934 = vmatprep.mubr.msk.bf16.mxu0 %vm1964_vm0, %v11463_v29 }
 0x13e   : > { %v11464_v35 = vld [vmem:[%s11615_s21 + $0x660] sm:$0xff]   ;;  %8694 = vst.msk [vmem:[%s11846_s24 + $0x49c] sm:$0xf] %vm8398_vm1, %v10300_v24  ;;  %v5880_v37 = vsel %vm4856_vm12, %v10824_v21, %v5368_v26  ;;  %vm4854_vm14 = vcmp.ge.f32.partialorder %v2927_v27, 0.0  ;;  %v5366_v38 = vmul.f32 0.2, %v2927_v27 }
 0x13f   : > { %v2930_v39 = vpop.f32.mrb[43].mxu0  ;;  %v3954_v40 = vpop.f32.mrb[43].mxu1  ;;  %8436 = vst.msk [vmem:[%s11846_s24 + $0x94] sm:$0xf] %vm8398_vm1, %v10042_v30  ;;  %v10047_v41 = vpack.c.bf16 %v5880_v37, %v5880_v37  ;;  %v6136_v42 = vsel %vm5112_vm13, %v11080_v22, %v5624_v32  ;;  %vm5110_vm15 = vcmp.ge.f32.partialorder %v3951_v28, 0.0  ;;  %vm4857_vm2 = vcmp.ge.f32.partialorder %v10825_v33, 0.0  ;;  %11190 = vmatprep.mubr.msk.bf16.mxu1 %vm1964_vm0, %v11464_v35 }
 0x140   : > { %v5622_v43 = vmul.f32 0.2, %v3951_v28  ;;  %8692 = vst.msk [vmem:[%s11846_s24 + $0x494] sm:$0xf] %vm8398_vm1, %v10298_v36  ;;  %v10303_v44 = vpack.c.bf16 %v6136_v42, %v6136_v42  ;;  %v5878_v45 = vsel %vm4854_vm14, %v2927_v27, %v5366_v38  ;;  %v5369_v46 = vmul.f32 0.2, %v10825_v33 }
 0x141   : > { %8441 = vst.msk [vmem:[%s11846_s24 + $0xa8] sm:$0xf] %vm8398_vm1, %v10047_v41  ;;  %v10045_v47 = vpack.c.bf16 %v5878_v45, %v5878_v45  ;;  %vm5113_vm3 = vcmp.ge.f32.partialorder %v11081_v34, 0.0  ;;  %v5625_v49 = vmul.f32 0.2, %v11081_v34  ;;  %vm4855_vm4 = vcmp.ge.f32.partialorder %v2930_v39, 0.0 }
 0x142   : > { %v6134_v48 = vsel %vm5110_vm15, %v3951_v28, %v5622_v43  ;;  %8697 = vst.msk [vmem:[%s11846_s24 + $0x4a8] sm:$0xf] %vm8398_vm1, %v10303_v44  ;;  %v5881_v51 = vsel %vm4857_vm2, %v10825_v33, %v5369_v46  ;;  %v5367_v52 = vmul.f32 0.2, %v2930_v39  ;;  %v11465_v53 = vld [vmem:[%s11615_s21 + $0x268] sm:$0xff]   ;;  %vm5111_vm5 = vcmp.ge.f32.partialorder %v3954_v40, 0.0 }
 0x143   : > { %v10301_v50 = vpack.c.bf16 %v6134_v48, %v6134_v48  ;;  %8439 = vst.msk [vmem:[%s11846_s24 + $0xa0] sm:$0xf] %vm8398_vm1, %v10045_v47  ;;  %v10048_v54 = vpack.c.bf16 %v5881_v51, %v5881_v51  ;;  %v6137_v55 = vsel %vm5113_vm3, %v11081_v34, %v5625_v49  ;;  %v5623_v56 = vmul.f32 0.2, %v3954_v40  ;;  %v10828_v57 = vpop.f32.mrb[44].mxu0  ;;  %v11084_v58 = vpop.f32.mrb[44].mxu1  ;;  %10935 = vmatmul.mubr.msk.bf16.gmra.mrb[152].mxu0 %vm1964_vm0, %v11465_v53 }
 0x144   : > { %v11466_v59 = vld [vmem:[%s11615_s21 + $0x668] sm:$0xff]   ;;  %v10304_v60 = vpack.c.bf16 %v6137_v55, %v6137_v55  ;;  %v5879_v61 = vsel %vm4855_vm4, %v2930_v39, %v5367_v52  ;;  %vm4860_vm6 = vcmp.ge.f32.partialorder %v10828_v57, 0.0  ;;  %v5372_v62 = vmul.f32 0.2, %v10828_v57  ;;  %v2943_v63 = vpop.f32.mrb[45].mxu0  ;;  %v3967_v0 = vpop.f32.mrb[45].mxu1 }
 0x145   : > { %8695 = vst.msk [vmem:[%s11846_s24 + $0x4a0] sm:$0xf] %vm8398_vm1, %v10301_v50  ;;  %v11467_v1 = vld [vmem:[%s11615_s21 + $0x270] sm:$0xff]   ;;  %8442 = vst.msk [vmem:[%s11846_s24 + $0xac] sm:$0xf] %vm8398_vm1, %v10048_v54  ;;  %v10046_v2 = vpack.c.bf16 %v5879_v61, %v5879_v61  ;;  %v6135_v3 = vsel %vm5111_vm5, %v3954_v40, %v5623_v56  ;;  %vm5116_vm7 = vcmp.ge.f32.partialorder %v11084_v58, 0.0  ;;  %11191 = vmatmul.mubr.msk.bf16.gmra.mrb[152].mxu1 %vm1964_vm0, %v11466_v59 }
 0x146   : > { %v5628_v4 = vmul.f32 0.2, %v11084_v58  ;;  %v10829_v5 = vpop.f32.mrb[46].mxu0  ;;  %v11085_v6 = vpop.f32.mrb[46].mxu1  ;;  %v11468_v7 = vld [vmem:[%s11615_s21 + $0x670] sm:$0xff]   ;;  %v10302_v8 = vpack.c.bf16 %v6135_v3, %v6135_v3  ;;  %v5884_v9 = vsel %vm4860_vm6, %v10828_v57, %v5372_v62  ;;  %vm4858_vm8 = vcmp.ge.f32.partialorder %v2943_v63, 0.0  ;;  %10938 = vmatprep.mubr.msk.bf16.mxu0 %vm1964_vm0, %v11467_v1 }
 0x147   : > { %8698 = vst.msk [vmem:[%s11846_s24 + $0x4ac] sm:$0xf] %vm8398_vm1, %v10304_v60  ;;  %v5370_v10 = vmul.f32 0.2, %v2943_v63  ;;  %v2946_v11 = vpop.f32.mrb[47].mxu0  ;;  %v3970_v12 = vpop.f32.mrb[47].mxu1  ;;  %v10051_v13 = vpack.c.bf16 %v5884_v9, %v5884_v9  ;;  %11194 = vmatprep.mubr.msk.bf16.mxu1 %vm1964_vm0, %v11468_v7 }
 0x148   : > { %8440 = vst.msk [vmem:[%s11846_s24 + $0xa4] sm:$0xf] %vm8398_vm1, %v10046_v2  ;;  %v6140_v14 = vsel %vm5116_vm7, %v11084_v58, %v5628_v4  ;;  %vm5114_vm9 = vcmp.ge.f32.partialorder %v3967_v0, 0.0  ;;  %v5626_v15 = vmul.f32 0.2, %v3967_v0  ;;  %vm4861_vm10 = vcmp.ge.f32.partialorder %v10829_v5, 0.0 }
 0x149   : > { %8696 = vst.msk [vmem:[%s11846_s24 + $0x4a4] sm:$0xf] %vm8398_vm1, %v10302_v8  ;;  %v10307_v16 = vpack.c.bf16 %v6140_v14, %v6140_v14  ;;  %v5882_v17 = vsel %vm4858_vm8, %v2943_v63, %v5370_v10  ;;  %v5373_v18 = vmul.f32 0.2, %v10829_v5  ;;  %8445 = vst.msk [vmem:[%s11846_s24 + $0xb8] sm:$0xf] %vm8398_vm1, %v10051_v13 }
 0x14a   : > { %v10049_v19 = vpack.c.bf16 %v5882_v17, %v5882_v17  ;;  %v6138_v20 = vsel %vm5114_vm9, %v3967_v0, %v5626_v15  ;;  %vm5117_vm11 = vcmp.ge.f32.partialorder %v11085_v6, 0.0  ;;  %v5629_v21 = vmul.f32 0.2, %v11085_v6  ;;  %v11469_v25 = vld [vmem:[%s11615_s21 + $0x278] sm:$0xff]   ;;  %v10832_v29 = vpop.f32.mrb[48].mxu0  ;;  %v11088_v30 = vpop.f32.mrb[48].mxu1 }
 0x14b   : > { %8701 = vst.msk [vmem:[%s11846_s24 + $0x4b8] sm:$0xf] %vm8398_vm1, %v10307_v16  ;;  %v10305_v22 = vpack.c.bf16 %v6138_v20, %v6138_v20  ;;  %v5885_v23 = vsel %vm4861_vm10, %v10829_v5, %v5373_v18  ;;  %vm4859_vm12 = vcmp.ge.f32.partialorder %v2946_v11, 0.0  ;;  %v5371_v24 = vmul.f32 0.2, %v2946_v11  ;;  %v11470_v31 = vld [vmem:[%s11615_s21 + $0x678] sm:$0xff]   ;;  %10939 = vmatmul.mubr.msk.bf16.gmra.mrb[156].mxu0 %vm1964_vm0, %v11469_v25 }
 0x14c   : > { %8443 = vst.msk [vmem:[%s11846_s24 + $0xb0] sm:$0xf] %vm8398_vm1, %v10049_v19  ;;  %v10052_v26 = vpack.c.bf16 %v5885_v23, %v5885_v23  ;;  %v6141_v27 = vsel %vm5117_vm11, %v11085_v6, %v5629_v21  ;;  %vm5115_vm13 = vcmp.ge.f32.partialorder %v3970_v12, 0.0  ;;  %v5627_v28 = vmul.f32 0.2, %v3970_v12  ;;  %v2959_v35 = vpop.f32.mrb[49].mxu0 }
 0x14d   : > { %8699 = vst.msk [vmem:[%s11846_s24 + $0x4b0] sm:$0xf] %vm8398_vm1, %v10305_v22  ;;  %v10308_v32 = vpack.c.bf16 %v6141_v27, %v6141_v27  ;;  %v5883_v33 = vsel %vm4859_vm12, %v2946_v11, %v5371_v24  ;;  %vm4864_vm14 = vcmp.ge.f32.partialorder %v10832_v29, 0.0  ;;  %v5376_v34 = vmul.f32 0.2, %v10832_v29  ;;  %v3983_v36 = vpop.f32.mrb[49].mxu1  ;;  %11195 = vmatmul.mubr.msk.bf16.gmra.mrb[156].mxu1 %vm1964_vm0, %v11470_v31 }
 0x14e   : > { %v11471_v37 = vld [vmem:[%s11615_s21 + $0x280] sm:$0xff]   ;;  %8446 = vst.msk [vmem:[%s11846_s24 + $0xbc] sm:$0xf] %vm8398_vm1, %v10052_v26  ;;  %v10050_v38 = vpack.c.bf16 %v5883_v33, %v5883_v33  ;;  %v6139_v39 = vsel %vm5115_vm13, %v3970_v12, %v5627_v28  ;;  %vm5120_vm15 = vcmp.ge.f32.partialorder %v11088_v30, 0.0  ;;  %v5632_v40 = vmul.f32 0.2, %v11088_v30 }
 0x14f   : > { %v10833_v41 = vpop.f32.mrb[50].mxu0  ;;  %v11089_v42 = vpop.f32.mrb[50].mxu1  ;;  %v11472_v43 = vld [vmem:[%s11615_s21 + $0x680] sm:$0xff]   ;;  %8702 = vst.msk [vmem:[%s11846_s24 + $0x4bc] sm:$0xf] %vm8398_vm1, %v10308_v32  ;;  %v10306_v44 = vpack.c.bf16 %v6139_v39, %v6139_v39  ;;  %v5888_v45 = vsel %vm4864_vm14, %v10832_v29, %v5376_v34  ;;  %vm4862_vm2 = vcmp.ge.f32.partialorder %v2959_v35, 0.0  ;;  %10942 = vmatprep.mubr.msk.bf16.mxu0 %vm1964_vm0, %v11471_v37 }
 0x150   : > { %v5374_v46 = vmul.f32 0.2, %v2959_v35  ;;  %v2962_v47 = vpop.f32.mrb[51].mxu0  ;;  %v3986_v48 = vpop.f32.mrb[51].mxu1  ;;  %8444 = vst.msk [vmem:[%s11846_s24 + $0xb4] sm:$0xf] %vm8398_vm1, %v10050_v38  ;;  %v10055_v49 = vpack.c.bf16 %v5888_v45, %v5888_v45  ;;  %v6144_v50 = vsel %vm5120_vm15, %v11088_v30, %v5632_v40  ;;  %11198 = vmatprep.mubr.msk.bf16.mxu1 %vm1964_vm0, %v11472_v43 }
 0x151   : > { %vm5118_vm3 = vcmp.ge.f32.partialorder %v3983_v36, 0.0  ;;  %v5630_v51 = vmul.f32 0.2, %v3983_v36  ;;  %8700 = vst.msk [vmem:[%s11846_s24 + $0x4b4] sm:$0xf] %vm8398_vm1, %v10306_v44  ;;  %v10311_v52 = vpack.c.bf16 %v6144_v50, %v6144_v50  ;;  %vm4865_vm4 = vcmp.ge.f32.partialorder %v10833_v41, 0.0 }
 0x152   : > { %v5886_v53 = vsel %vm4862_vm2, %v2959_v35, %v5374_v46  ;;  %v5377_v54 = vmul.f32 0.2, %v10833_v41  ;;  %8449 = vst.msk [vmem:[%s11846_s24 + $0xc8] sm:$0xf] %vm8398_vm1, %v10055_v49  ;;  %vm5121_vm5 = vcmp.ge.f32.partialorder %v11089_v42, 0.0  ;;  %vm4863_vm6 = vcmp.ge.f32.partialorder %v2962_v47, 0.0 }
 0x153   : > { %v10053_v55 = vpack.c.bf16 %v5886_v53, %v5886_v53  ;;  %v6142_v56 = vsel %vm5118_vm3, %v3983_v36, %v5630_v51  ;;  %v5633_v57 = vmul.f32 0.2, %v11089_v42  ;;  %8705 = vst.msk [vmem:[%s11846_s24 + $0x4c8] sm:$0xf] %vm8398_vm1, %v10311_v52  ;;  %v5375_v60 = vmul.f32 0.2, %v2962_v47 }
 0x154   : > { %v10309_v58 = vpack.c.bf16 %v6142_v56, %v6142_v56  ;;  %v5889_v59 = vsel %vm4865_vm4, %v10833_v41, %v5377_v54  ;;  %v11473_v61 = vld [vmem:[%s11615_s21 + $0x288] sm:$0xff]   ;;  %vm5119_vm7 = vcmp.ge.f32.partialorder %v3986_v48, 0.0  ;;  %v5631_v0 = vmul.f32 0.2, %v3986_v48  ;;  %v10836_v1 = vpop.f32.mrb[52].mxu0  ;;  %v11092_v2 = vpop.f32.mrb[52].mxu1 }
 0x155   : > { %8447 = vst.msk [vmem:[%s11846_s24 + $0xc0] sm:$0xf] %vm8398_vm1, %v10053_v55  ;;  %v10056_v62 = vpack.c.bf16 %v5889_v59, %v5889_v59  ;;  %v6145_v63 = vsel %vm5121_vm5, %v11089_v42, %v5633_v57  ;;  %v11474_v3 = vld [vmem:[%s11615_s21 + $0x688] sm:$0xff]   ;;  %v5887_v5 = vsel %vm4863_vm6, %v2962_v47, %v5375_v60  ;;  %vm4868_vm8 = vcmp.ge.f32.partialorder %v10836_v1, 0.0  ;;  %v2975_v7 = vpop.f32.mrb[53].mxu0  ;;  %v3999_v8 = vpop.f32.mrb[53].mxu1  ;;  %10943 = vmatmul.mubr.msk.bf16.gmra.mrb[160].mxu0 %vm1964_vm0, %v11473_v61 }
 0x156   : > { %8703 = vst.msk [vmem:[%s11846_s24 + $0x4c0] sm:$0xf] %vm8398_vm1, %v10309_v58  ;;  %v10312_v4 = vpack.c.bf16 %v6145_v63, %v6145_v63  ;;  %v5380_v6 = vmul.f32 0.2, %v10836_v1  ;;  %v11475_v9 = vld [vmem:[%s11615_s21 + $0x290] sm:$0xff]   ;;  %v10054_v10 = vpack.c.bf16 %v5887_v5, %v5887_v5  ;;  %v6143_v11 = vsel %vm5119_vm7, %v3986_v48, %v5631_v0  ;;  %v10837_v13 = vpop.f32.mrb[54].mxu0  ;;  %11199 = vmatmul.mubr.msk.bf16.gmra.mrb[160].mxu1 %vm1964_vm0, %v11474_v3 }
 0x157   : > { %8450 = vst.msk [vmem:[%s11846_s24 + $0xcc] sm:$0xf] %vm8398_vm1, %v10056_v62  ;;  %vm5124_vm9 = vcmp.ge.f32.partialorder %v11092_v2, 0.0  ;;  %v5636_v12 = vmul.f32 0.2, %v11092_v2  ;;  %v11093_v14 = vpop.f32.mrb[54].mxu1  ;;  %v10310_v16 = vpack.c.bf16 %v6143_v11, %v6143_v11  ;;  %10946 = vmatprep.mubr.msk.bf16.mxu0 %vm1964_vm0, %v11475_v9 }
 0x158   : > { %v11476_v15 = vld [vmem:[%s11615_s21 + $0x690] sm:$0xff]   ;;  %8706 = vst.msk [vmem:[%s11846_s24 + $0x4cc] sm:$0xf] %vm8398_vm1, %v10312_v4  ;;  %v5892_v17 = vsel %vm4868_vm8, %v10836_v1, %v5380_v6  ;;  %vm4866_vm10 = vcmp.ge.f32.partialorder %v2975_v7, 0.0  ;;  %v5378_v18 = vmul.f32 0.2, %v2975_v7 }
 0x159   : > { %v2978_v19 = vpop.f32.mrb[55].mxu0  ;;  %v4002_v20 = vpop.f32.mrb[55].mxu1  ;;  %8448 = vst.msk [vmem:[%s11846_s24 + $0xc4] sm:$0xf] %vm8398_vm1, %v10054_v10  ;;  %v10059_v21 = vpack.c.bf16 %v5892_v17, %v5892_v17  ;;  %v6148_v22 = vsel %vm5124_vm9, %v11092_v2, %v5636_v12  ;;  %vm5122_vm11 = vcmp.ge.f32.partialorder %v3999_v8, 0.0  ;;  %vm4869_vm12 = vcmp.ge.f32.partialorder %v10837_v13, 0.0  ;;  %11202 = vmatprep.mubr.msk.bf16.mxu1 %vm1964_vm0, %v11476_v15 }
 0x15a   : > { %v5634_v23 = vmul.f32 0.2, %v3999_v8  ;;  %8704 = vst.msk [vmem:[%s11846_s24 + $0x4c4] sm:$0xf] %vm8398_vm1, %v10310_v16  ;;  %v10315_v24 = vpack.c.bf16 %v6148_v22, %v6148_v22  ;;  %v5890_v25 = vsel %vm4866_vm10, %v2975_v7, %v5378_v18  ;;  %v5381_v26 = vmul.f32 0.2, %v10837_v13 }
 0x15b   : > { %8453 = vst.msk [vmem:[%s11846_s24 + $0xd8] sm:$0xf] %vm8398_vm1, %v10059_v21  ;;  %v10057_v27 = vpack.c.bf16 %v5890_v25, %v5890_v25  ;;  %vm5125_vm13 = vcmp.ge.f32.partialorder %v11093_v14, 0.0  ;;  %v5637_v29 = vmul.f32 0.2, %v11093_v14  ;;  %vm4867_vm14 = vcmp.ge.f32.partialorder %v2978_v19, 0.0 }
 0x15c   : > { %v6146_v28 = vsel %vm5122_vm11, %v3999_v8, %v5634_v23  ;;  %8709 = vst.msk [vmem:[%s11846_s24 + $0x4d8] sm:$0xf] %vm8398_vm1, %v10315_v24  ;;  %v5893_v31 = vsel %vm4869_vm12, %v10837_v13, %v5381_v26  ;;  %v5379_v32 = vmul.f32 0.2, %v2978_v19  ;;  %v11477_v33 = vld [vmem:[%s11615_s21 + $0x298] sm:$0xff]   ;;  %vm5123_vm15 = vcmp.ge.f32.partialorder %v4002_v20, 0.0 }
 0x15d   : > { %v10313_v30 = vpack.c.bf16 %v6146_v28, %v6146_v28  ;;  %8451 = vst.msk [vmem:[%s11846_s24 + $0xd0] sm:$0xf] %vm8398_vm1, %v10057_v27  ;;  %v10060_v34 = vpack.c.bf16 %v5893_v31, %v5893_v31  ;;  %v6149_v35 = vsel %vm5125_vm13, %v11093_v14, %v5637_v29  ;;  %v5635_v36 = vmul.f32 0.2, %v4002_v20  ;;  %v10840_v37 = vpop.f32.mrb[56].mxu0  ;;  %v11096_v38 = vpop.f32.mrb[56].mxu1  ;;  %10947 = vmatmul.mubr.msk.bf16.gmra.mrb[164].mxu0 %vm1964_vm0, %v11477_v33 }
 0x15e   : > { %v11478_v39 = vld [vmem:[%s11615_s21 + $0x698] sm:$0xff]   ;;  %v10316_v40 = vpack.c.bf16 %v6149_v35, %v6149_v35  ;;  %v5891_v41 = vsel %vm4867_vm14, %v2978_v19, %v5379_v32  ;;  %vm4872_vm2 = vcmp.ge.f32.partialorder %v10840_v37, 0.0  ;;  %v5384_v42 = vmul.f32 0.2, %v10840_v37  ;;  %v2991_v43 = vpop.f32.mrb[57].mxu0  ;;  %v4015_v44 = vpop.f32.mrb[57].mxu1 }
 0x15f   : > { %8707 = vst.msk [vmem:[%s11846_s24 + $0x4d0] sm:$0xf] %vm8398_vm1, %v10313_v30  ;;  %v11479_v45 = vld [vmem:[%s11615_s21 + $0x2a0] sm:$0xff]   ;;  %8454 = vst.msk [vmem:[%s11846_s24 + $0xdc] sm:$0xf] %vm8398_vm1, %v10060_v34  ;;  %v10058_v46 = vpack.c.bf16 %v5891_v41, %v5891_v41  ;;  %v6147_v47 = vsel %vm5123_vm15, %v4002_v20, %v5635_v36  ;;  %vm5128_vm3 = vcmp.ge.f32.partialorder %v11096_v38, 0.0  ;;  %11203 = vmatmul.mubr.msk.bf16.gmra.mrb[164].mxu1 %vm1964_vm0, %v11478_v39 }
 0x160   : > { %v5640_v48 = vmul.f32 0.2, %v11096_v38  ;;  %v10841_v49 = vpop.f32.mrb[58].mxu0  ;;  %v11097_v50 = vpop.f32.mrb[58].mxu1  ;;  %v11480_v51 = vld [vmem:[%s11615_s21 + $0x6a0] sm:$0xff]   ;;  %v10314_v52 = vpack.c.bf16 %v6147_v47, %v6147_v47  ;;  %v5896_v53 = vsel %vm4872_vm2, %v10840_v37, %v5384_v42  ;;  %vm4870_vm4 = vcmp.ge.f32.partialorder %v2991_v43, 0.0  ;;  %10950 = vmatprep.mubr.msk.bf16.mxu0 %vm1964_vm0, %v11479_v45 }
 0x161   : > { %8710 = vst.msk [vmem:[%s11846_s24 + $0x4dc] sm:$0xf] %vm8398_vm1, %v10316_v40  ;;  %v5382_v54 = vmul.f32 0.2, %v2991_v43  ;;  %v2994_v55 = vpop.f32.mrb[59].mxu0  ;;  %v4018_v56 = vpop.f32.mrb[59].mxu1  ;;  %v10063_v57 = vpack.c.bf16 %v5896_v53, %v5896_v53  ;;  %11206 = vmatprep.mubr.msk.bf16.mxu1 %vm1964_vm0, %v11480_v51 }
 0x162   : > { %8452 = vst.msk [vmem:[%s11846_s24 + $0xd4] sm:$0xf] %vm8398_vm1, %v10058_v46  ;;  %v6152_v58 = vsel %vm5128_vm3, %v11096_v38, %v5640_v48  ;;  %vm5126_vm5 = vcmp.ge.f32.partialorder %v4015_v44, 0.0  ;;  %v5638_v59 = vmul.f32 0.2, %v4015_v44  ;;  %vm4873_vm6 = vcmp.ge.f32.partialorder %v10841_v49, 0.0 }
 0x163   : > { %8708 = vst.msk [vmem:[%s11846_s24 + $0x4d4] sm:$0xf] %vm8398_vm1, %v10314_v52  ;;  %v10319_v60 = vpack.c.bf16 %v6152_v58, %v6152_v58  ;;  %v5894_v61 = vsel %vm4870_vm4, %v2991_v43, %v5382_v54  ;;  %v5385_v62 = vmul.f32 0.2, %v10841_v49  ;;  %8457 = vst.msk [vmem:[%s11846_s24 + $0xe8] sm:$0xf] %vm8398_vm1, %v10063_v57 }
 0x164   : > { %v10061_v63 = vpack.c.bf16 %v5894_v61, %v5894_v61  ;;  %v6150_v0 = vsel %vm5126_vm5, %v4015_v44, %v5638_v59  ;;  %vm5129_vm7 = vcmp.ge.f32.partialorder %v11097_v50, 0.0  ;;  %v5641_v1 = vmul.f32 0.2, %v11097_v50  ;;  %v11481_v5 = vld [vmem:[%s11615_s21 + $0x2a8] sm:$0xff]   ;;  %v10844_v9 = vpop.f32.mrb[60].mxu0  ;;  %v11100_v10 = vpop.f32.mrb[60].mxu1 }
 0x165   : > { %8713 = vst.msk [vmem:[%s11846_s24 + $0x4e8] sm:$0xf] %vm8398_vm1, %v10319_v60  ;;  %v10317_v2 = vpack.c.bf16 %v6150_v0, %v6150_v0  ;;  %v5897_v3 = vsel %vm4873_vm6, %v10841_v49, %v5385_v62  ;;  %vm4871_vm8 = vcmp.ge.f32.partialorder %v2994_v55, 0.0  ;;  %v5383_v4 = vmul.f32 0.2, %v2994_v55  ;;  %v11482_v11 = vld [vmem:[%s11615_s21 + $0x6a8] sm:$0xff]   ;;  %10951 = vmatmul.mubr.msk.bf16.gmra.mrb[168].mxu0 %vm1964_vm0, %v11481_v5 }
 0x166   : > { %8455 = vst.msk [vmem:[%s11846_s24 + $0xe0] sm:$0xf] %vm8398_vm1, %v10061_v63  ;;  %v10064_v6 = vpack.c.bf16 %v5897_v3, %v5897_v3  ;;  %v6153_v7 = vsel %vm5129_vm7, %v11097_v50, %v5641_v1  ;;  %vm5127_vm9 = vcmp.ge.f32.partialorder %v4018_v56, 0.0  ;;  %v5639_v8 = vmul.f32 0.2, %v4018_v56  ;;  %v3007_v15 = vpop.f32.mrb[61].mxu0 }
 0x167   : > { %8711 = vst.msk [vmem:[%s11846_s24 + $0x4e0] sm:$0xf] %vm8398_vm1, %v10317_v2  ;;  %v10320_v12 = vpack.c.bf16 %v6153_v7, %v6153_v7  ;;  %v5895_v13 = vsel %vm4871_vm8, %v2994_v55, %v5383_v4  ;;  %vm4876_vm10 = vcmp.ge.f32.partialorder %v10844_v9, 0.0  ;;  %v5388_v14 = vmul.f32 0.2, %v10844_v9  ;;  %v4031_v16 = vpop.f32.mrb[61].mxu1  ;;  %11207 = vmatmul.mubr.msk.bf16.gmra.mrb[168].mxu1 %vm1964_vm0, %v11482_v11 }
 0x168   : > { %v11483_v17 = vld [vmem:[%s11615_s21 + $0x2b0] sm:$0xff]   ;;  %8458 = vst.msk [vmem:[%s11846_s24 + $0xec] sm:$0xf] %vm8398_vm1, %v10064_v6  ;;  %v10062_v18 = vpack.c.bf16 %v5895_v13, %v5895_v13  ;;  %v6151_v19 = vsel %vm5127_vm9, %v4018_v56, %v5639_v8  ;;  %vm5132_vm11 = vcmp.ge.f32.partialorder %v11100_v10, 0.0  ;;  %v5644_v20 = vmul.f32 0.2, %v11100_v10 }
 0x169   : > { %v10845_v21 = vpop.f32.mrb[62].mxu0  ;;  %v11101_v22 = vpop.f32.mrb[62].mxu1  ;;  %v11484_v23 = vld [vmem:[%s11615_s21 + $0x6b0] sm:$0xff]   ;;  %8714 = vst.msk [vmem:[%s11846_s24 + $0x4ec] sm:$0xf] %vm8398_vm1, %v10320_v12  ;;  %v10318_v24 = vpack.c.bf16 %v6151_v19, %v6151_v19  ;;  %v5900_v25 = vsel %vm4876_vm10, %v10844_v9, %v5388_v14  ;;  %vm4874_vm12 = vcmp.ge.f32.partialorder %v3007_v15, 0.0  ;;  %10954 = vmatprep.mubr.msk.bf16.mxu0 %vm1964_vm0, %v11483_v17 }
 0x16a   : > { %v5386_v26 = vmul.f32 0.2, %v3007_v15  ;;  %v3010_v27 = vpop.f32.mrb[63].mxu0  ;;  %v4034_v28 = vpop.f32.mrb[63].mxu1  ;;  %8456 = vst.msk [vmem:[%s11846_s24 + $0xe4] sm:$0xf] %vm8398_vm1, %v10062_v18  ;;  %v10067_v29 = vpack.c.bf16 %v5900_v25, %v5900_v25  ;;  %v6156_v30 = vsel %vm5132_vm11, %v11100_v10, %v5644_v20  ;;  %11210 = vmatprep.mubr.msk.bf16.mxu1 %vm1964_vm0, %v11484_v23 }
 0x16b   : > { %vm5130_vm13 = vcmp.ge.f32.partialorder %v4031_v16, 0.0  ;;  %v5642_v31 = vmul.f32 0.2, %v4031_v16  ;;  %8712 = vst.msk [vmem:[%s11846_s24 + $0x4e4] sm:$0xf] %vm8398_vm1, %v10318_v24  ;;  %v10323_v32 = vpack.c.bf16 %v6156_v30, %v6156_v30  ;;  %vm4877_vm14 = vcmp.ge.f32.partialorder %v10845_v21, 0.0 }
 0x16c   : > { %v5898_v33 = vsel %vm4874_vm12, %v3007_v15, %v5386_v26  ;;  %v5389_v34 = vmul.f32 0.2, %v10845_v21  ;;  %8461 = vst.msk [vmem:[%s11846_s24 + $0xf8] sm:$0xf] %vm8398_vm1, %v10067_v29  ;;  %vm5133_vm15 = vcmp.ge.f32.partialorder %v11101_v22, 0.0  ;;  %vm4875_vm2 = vcmp.ge.f32.partialorder %v3010_v27, 0.0 }
 0x16d   : > { %v10065_v35 = vpack.c.bf16 %v5898_v33, %v5898_v33  ;;  %v6154_v36 = vsel %vm5130_vm13, %v4031_v16, %v5642_v31  ;;  %v5645_v37 = vmul.f32 0.2, %v11101_v22  ;;  %8717 = vst.msk [vmem:[%s11846_s24 + $0x4f8] sm:$0xf] %vm8398_vm1, %v10323_v32  ;;  %v5387_v40 = vmul.f32 0.2, %v3010_v27 }
 0x16e   : > { %v10321_v38 = vpack.c.bf16 %v6154_v36, %v6154_v36  ;;  %v5901_v39 = vsel %vm4877_vm14, %v10845_v21, %v5389_v34  ;;  %v11485_v41 = vld [vmem:[%s11615_s21 + $0x2b8] sm:$0xff]   ;;  %vm5131_vm3 = vcmp.ge.f32.partialorder %v4034_v28, 0.0  ;;  %v5643_v44 = vmul.f32 0.2, %v4034_v28  ;;  %v10848_v45 = vpop.f32.mrb[64].mxu0  ;;  %v11104_v46 = vpop.f32.mrb[64].mxu1 }
 0x16f   : > { %8459 = vst.msk [vmem:[%s11846_s24 + $0xf0] sm:$0xf] %vm8398_vm1, %v10065_v35  ;;  %v10068_v42 = vpack.c.bf16 %v5901_v39, %v5901_v39  ;;  %v6157_v43 = vsel %vm5133_vm15, %v11101_v22, %v5645_v37  ;;  %v11486_v47 = vld [vmem:[%s11615_s21 + $0x6b8] sm:$0xff]   ;;  %v5899_v49 = vsel %vm4875_vm2, %v3010_v27, %v5387_v40  ;;  %vm4880_vm4 = vcmp.ge.f32.partialorder %v10848_v45, 0.0  ;;  %v3023_v51 = vpop.f32.mrb[65].mxu0  ;;  %v4047_v52 = vpop.f32.mrb[65].mxu1  ;;  %10955 = vmatmul.mubr.msk.bf16.gmra.mrb[172].mxu0 %vm1964_vm0, %v11485_v41 }
 0x170   : > { %8715 = vst.msk [vmem:[%s11846_s24 + $0x4f0] sm:$0xf] %vm8398_vm1, %v10321_v38  ;;  %v10324_v48 = vpack.c.bf16 %v6157_v43, %v6157_v43  ;;  %v5392_v50 = vmul.f32 0.2, %v10848_v45  ;;  %v11487_v53 = vld [vmem:[%s11615_s21 + $0x2c0] sm:$0xff]   ;;  %v10066_v54 = vpack.c.bf16 %v5899_v49, %v5899_v49  ;;  %v6155_v55 = vsel %vm5131_vm3, %v4034_v28, %v5643_v44  ;;  %v10849_v57 = vpop.f32.mrb[66].mxu0  ;;  %11211 = vmatmul.mubr.msk.bf16.gmra.mrb[172].mxu1 %vm1964_vm0, %v11486_v47 }
 0x171   : > { %8462 = vst.msk [vmem:[%s11846_s24 + $0xfc] sm:$0xf] %vm8398_vm1, %v10068_v42  ;;  %vm5136_vm5 = vcmp.ge.f32.partialorder %v11104_v46, 0.0  ;;  %v5648_v56 = vmul.f32 0.2, %v11104_v46  ;;  %v11105_v58 = vpop.f32.mrb[66].mxu1  ;;  %v10322_v60 = vpack.c.bf16 %v6155_v55, %v6155_v55  ;;  %10958 = vmatprep.mubr.msk.bf16.mxu0 %vm1964_vm0, %v11487_v53 }
 0x172   : > { %v11488_v59 = vld [vmem:[%s11615_s21 + $0x6c0] sm:$0xff]   ;;  %8718 = vst.msk [vmem:[%s11846_s24 + $0x4fc] sm:$0xf] %vm8398_vm1, %v10324_v48  ;;  %v5904_v61 = vsel %vm4880_vm4, %v10848_v45, %v5392_v50  ;;  %vm4878_vm6 = vcmp.ge.f32.partialorder %v3023_v51, 0.0  ;;  %v5390_v62 = vmul.f32 0.2, %v3023_v51 }
 0x173   : > { %v3026_v63 = vpop.f32.mrb[67].mxu0  ;;  %v4050_v0 = vpop.f32.mrb[67].mxu1  ;;  %8460 = vst.msk [vmem:[%s11846_s24 + $0xf4] sm:$0xf] %vm8398_vm1, %v10066_v54  ;;  %v10071_v1 = vpack.c.bf16 %v5904_v61, %v5904_v61  ;;  %v6160_v2 = vsel %vm5136_vm5, %v11104_v46, %v5648_v56  ;;  %vm5134_vm7 = vcmp.ge.f32.partialorder %v4047_v52, 0.0  ;;  %vm4881_vm8 = vcmp.ge.f32.partialorder %v10849_v57, 0.0  ;;  %11214 = vmatprep.mubr.msk.bf16.mxu1 %vm1964_vm0, %v11488_v59 }
 0x174   : > { %v5646_v3 = vmul.f32 0.2, %v4047_v52  ;;  %8716 = vst.msk [vmem:[%s11846_s24 + $0x4f4] sm:$0xf] %vm8398_vm1, %v10322_v60  ;;  %v10327_v4 = vpack.c.bf16 %v6160_v2, %v6160_v2  ;;  %v5902_v5 = vsel %vm4878_vm6, %v3023_v51, %v5390_v62  ;;  %v5393_v6 = vmul.f32 0.2, %v10849_v57 }
 0x175   : > { %8465 = vst.msk [vmem:[%s11846_s24 + $0x108] sm:$0xf] %vm8398_vm1, %v10071_v1  ;;  %v10069_v7 = vpack.c.bf16 %v5902_v5, %v5902_v5  ;;  %vm5137_vm9 = vcmp.ge.f32.partialorder %v11105_v58, 0.0  ;;  %v5649_v9 = vmul.f32 0.2, %v11105_v58  ;;  %vm4879_vm10 = vcmp.ge.f32.partialorder %v3026_v63, 0.0 }
 0x176   : > { %v6158_v8 = vsel %vm5134_vm7, %v4047_v52, %v5646_v3  ;;  %8721 = vst.msk [vmem:[%s11846_s24 + $0x508] sm:$0xf] %vm8398_vm1, %v10327_v4  ;;  %v5905_v11 = vsel %vm4881_vm8, %v10849_v57, %v5393_v6  ;;  %v5391_v12 = vmul.f32 0.2, %v3026_v63  ;;  %v11489_v13 = vld [vmem:[%s11615_s21 + $0x2c8] sm:$0xff]   ;;  %vm5135_vm11 = vcmp.ge.f32.partialorder %v4050_v0, 0.0 }
 0x177   : > { %v10325_v10 = vpack.c.bf16 %v6158_v8, %v6158_v8  ;;  %8463 = vst.msk [vmem:[%s11846_s24 + $0x100] sm:$0xf] %vm8398_vm1, %v10069_v7  ;;  %v10072_v14 = vpack.c.bf16 %v5905_v11, %v5905_v11  ;;  %v6161_v15 = vsel %vm5137_vm9, %v11105_v58, %v5649_v9  ;;  %v5647_v16 = vmul.f32 0.2, %v4050_v0  ;;  %v10852_v17 = vpop.f32.mrb[68].mxu0  ;;  %v11108_v18 = vpop.f32.mrb[68].mxu1  ;;  %10959 = vmatmul.mubr.msk.bf16.gmra.mrb[176].mxu0 %vm1964_vm0, %v11489_v13 }
 0x178   : > { %v11490_v19 = vld [vmem:[%s11615_s21 + $0x6c8] sm:$0xff]   ;;  %v10328_v20 = vpack.c.bf16 %v6161_v15, %v6161_v15  ;;  %v5903_v21 = vsel %vm4879_vm10, %v3026_v63, %v5391_v12  ;;  %vm4884_vm12 = vcmp.ge.f32.partialorder %v10852_v17, 0.0  ;;  %v5396_v22 = vmul.f32 0.2, %v10852_v17  ;;  %v3039_v23 = vpop.f32.mrb[69].mxu0  ;;  %v4063_v24 = vpop.f32.mrb[69].mxu1 }
 0x179   : > { %8719 = vst.msk [vmem:[%s11846_s24 + $0x500] sm:$0xf] %vm8398_vm1, %v10325_v10  ;;  %v11491_v25 = vld [vmem:[%s11615_s21 + $0x2d0] sm:$0xff]   ;;  %8466 = vst.msk [vmem:[%s11846_s24 + $0x10c] sm:$0xf] %vm8398_vm1, %v10072_v14  ;;  %v10070_v26 = vpack.c.bf16 %v5903_v21, %v5903_v21  ;;  %v6159_v27 = vsel %vm5135_vm11, %v4050_v0, %v5647_v16  ;;  %vm5140_vm13 = vcmp.ge.f32.partialorder %v11108_v18, 0.0  ;;  %11215 = vmatmul.mubr.msk.bf16.gmra.mrb[176].mxu1 %vm1964_vm0, %v11490_v19 }
 0x17a   : > { %v5652_v28 = vmul.f32 0.2, %v11108_v18  ;;  %v10853_v29 = vpop.f32.mrb[70].mxu0  ;;  %v11109_v30 = vpop.f32.mrb[70].mxu1  ;;  %v11492_v31 = vld [vmem:[%s11615_s21 + $0x6d0] sm:$0xff]   ;;  %v10326_v32 = vpack.c.bf16 %v6159_v27, %v6159_v27  ;;  %v5908_v33 = vsel %vm4884_vm12, %v10852_v17, %v5396_v22  ;;  %vm4882_vm14 = vcmp.ge.f32.partialorder %v3039_v23, 0.0  ;;  %10962 = vmatprep.mubr.msk.bf16.mxu0 %vm1964_vm0, %v11491_v25 }
 0x17b   : > { %8722 = vst.msk [vmem:[%s11846_s24 + $0x50c] sm:$0xf] %vm8398_vm1, %v10328_v20  ;;  %v5394_v34 = vmul.f32 0.2, %v3039_v23  ;;  %v3042_v35 = vpop.f32.mrb[71].mxu0  ;;  %v4066_v36 = vpop.f32.mrb[71].mxu1  ;;  %v10075_v37 = vpack.c.bf16 %v5908_v33, %v5908_v33  ;;  %11218 = vmatprep.mubr.msk.bf16.mxu1 %vm1964_vm0, %v11492_v31 }
 0x17c   : > { %8464 = vst.msk [vmem:[%s11846_s24 + $0x104] sm:$0xf] %vm8398_vm1, %v10070_v26  ;;  %v6164_v38 = vsel %vm5140_vm13, %v11108_v18, %v5652_v28  ;;  %vm5138_vm15 = vcmp.ge.f32.partialorder %v4063_v24, 0.0  ;;  %v5650_v39 = vmul.f32 0.2, %v4063_v24  ;;  %vm4885_vm2 = vcmp.ge.f32.partialorder %v10853_v29, 0.0 }
 0x17d   : > { %8720 = vst.msk [vmem:[%s11846_s24 + $0x504] sm:$0xf] %vm8398_vm1, %v10326_v32  ;;  %v10331_v40 = vpack.c.bf16 %v6164_v38, %v6164_v38  ;;  %v5906_v41 = vsel %vm4882_vm14, %v3039_v23, %v5394_v34  ;;  %v5397_v42 = vmul.f32 0.2, %v10853_v29  ;;  %8469 = vst.msk [vmem:[%s11846_s24 + $0x118] sm:$0xf] %vm8398_vm1, %v10075_v37 }
 0x17e   : > { %v10073_v43 = vpack.c.bf16 %v5906_v41, %v5906_v41  ;;  %v6162_v44 = vsel %vm5138_vm15, %v4063_v24, %v5650_v39  ;;  %vm5141_vm3 = vcmp.ge.f32.partialorder %v11109_v30, 0.0  ;;  %v5653_v45 = vmul.f32 0.2, %v11109_v30  ;;  %v11493_v49 = vld [vmem:[%s11615_s21 + $0x2d8] sm:$0xff]   ;;  %v10856_v53 = vpop.f32.mrb[72].mxu0  ;;  %v11112_v54 = vpop.f32.mrb[72].mxu1 }
 0x17f   : > { %8725 = vst.msk [vmem:[%s11846_s24 + $0x518] sm:$0xf] %vm8398_vm1, %v10331_v40  ;;  %v10329_v46 = vpack.c.bf16 %v6162_v44, %v6162_v44  ;;  %v5909_v47 = vsel %vm4885_vm2, %v10853_v29, %v5397_v42  ;;  %vm4883_vm4 = vcmp.ge.f32.partialorder %v3042_v35, 0.0  ;;  %v5395_v48 = vmul.f32 0.2, %v3042_v35  ;;  %v11494_v55 = vld [vmem:[%s11615_s21 + $0x6d8] sm:$0xff]   ;;  %10963 = vmatmul.mubr.msk.bf16.gmra.mrb[180].mxu0 %vm1964_vm0, %v11493_v49 }
 0x180   : > { %8467 = vst.msk [vmem:[%s11846_s24 + $0x110] sm:$0xf] %vm8398_vm1, %v10073_v43  ;;  %v10076_v50 = vpack.c.bf16 %v5909_v47, %v5909_v47  ;;  %v6165_v51 = vsel %vm5141_vm3, %v11109_v30, %v5653_v45  ;;  %vm5139_vm5 = vcmp.ge.f32.partialorder %v4066_v36, 0.0  ;;  %v5651_v52 = vmul.f32 0.2, %v4066_v36  ;;  %v3055_v59 = vpop.f32.mrb[73].mxu0 }
 0x181   : > { %8723 = vst.msk [vmem:[%s11846_s24 + $0x510] sm:$0xf] %vm8398_vm1, %v10329_v46  ;;  %v10332_v56 = vpack.c.bf16 %v6165_v51, %v6165_v51  ;;  %v5907_v57 = vsel %vm4883_vm4, %v3042_v35, %v5395_v48  ;;  %vm4888_vm6 = vcmp.ge.f32.partialorder %v10856_v53, 0.0  ;;  %v5400_v58 = vmul.f32 0.2, %v10856_v53  ;;  %v4079_v60 = vpop.f32.mrb[73].mxu1  ;;  %11219 = vmatmul.mubr.msk.bf16.gmra.mrb[180].mxu1 %vm1964_vm0, %v11494_v55 }
 0x182   : > { %v11495_v61 = vld [vmem:[%s11615_s21 + $0x2e0] sm:$0xff]   ;;  %8470 = vst.msk [vmem:[%s11846_s24 + $0x11c] sm:$0xf] %vm8398_vm1, %v10076_v50  ;;  %v10074_v62 = vpack.c.bf16 %v5907_v57, %v5907_v57  ;;  %v6163_v63 = vsel %vm5139_vm5, %v4066_v36, %v5651_v52  ;;  %vm5144_vm7 = vcmp.ge.f32.partialorder %v11112_v54, 0.0  ;;  %v5656_v0 = vmul.f32 0.2, %v11112_v54 }
 0x183   : > { %v10857_v1 = vpop.f32.mrb[74].mxu0  ;;  %v11113_v2 = vpop.f32.mrb[74].mxu1  ;;  %v11496_v3 = vld [vmem:[%s11615_s21 + $0x6e0] sm:$0xff]   ;;  %8726 = vst.msk [vmem:[%s11846_s24 + $0x51c] sm:$0xf] %vm8398_vm1, %v10332_v56  ;;  %v10330_v4 = vpack.c.bf16 %v6163_v63, %v6163_v63  ;;  %v5912_v5 = vsel %vm4888_vm6, %v10856_v53, %v5400_v58  ;;  %vm4886_vm8 = vcmp.ge.f32.partialorder %v3055_v59, 0.0  ;;  %10966 = vmatprep.mubr.msk.bf16.mxu0 %vm1964_vm0, %v11495_v61 }
 0x184   : > { %v5398_v6 = vmul.f32 0.2, %v3055_v59  ;;  %v3058_v7 = vpop.f32.mrb[75].mxu0  ;;  %v4082_v8 = vpop.f32.mrb[75].mxu1  ;;  %8468 = vst.msk [vmem:[%s11846_s24 + $0x114] sm:$0xf] %vm8398_vm1, %v10074_v62  ;;  %v10079_v9 = vpack.c.bf16 %v5912_v5, %v5912_v5  ;;  %v6168_v10 = vsel %vm5144_vm7, %v11112_v54, %v5656_v0  ;;  %11222 = vmatprep.mubr.msk.bf16.mxu1 %vm1964_vm0, %v11496_v3 }
 0x185   : > { %vm5142_vm9 = vcmp.ge.f32.partialorder %v4079_v60, 0.0  ;;  %v5654_v11 = vmul.f32 0.2, %v4079_v60  ;;  %8724 = vst.msk [vmem:[%s11846_s24 + $0x514] sm:$0xf] %vm8398_vm1, %v10330_v4  ;;  %v10335_v12 = vpack.c.bf16 %v6168_v10, %v6168_v10  ;;  %vm4889_vm10 = vcmp.ge.f32.partialorder %v10857_v1, 0.0 }
 0x186   : > { %v5910_v13 = vsel %vm4886_vm8, %v3055_v59, %v5398_v6  ;;  %v5401_v14 = vmul.f32 0.2, %v10857_v1  ;;  %8473 = vst.msk [vmem:[%s11846_s24 + $0x128] sm:$0xf] %vm8398_vm1, %v10079_v9  ;;  %vm5145_vm11 = vcmp.ge.f32.partialorder %v11113_v2, 0.0  ;;  %vm4887_vm12 = vcmp.ge.f32.partialorder %v3058_v7, 0.0 }
 0x187   : > { %v10077_v15 = vpack.c.bf16 %v5910_v13, %v5910_v13  ;;  %v6166_v16 = vsel %vm5142_vm9, %v4079_v60, %v5654_v11  ;;  %v5657_v17 = vmul.f32 0.2, %v11113_v2  ;;  %8729 = vst.msk [vmem:[%s11846_s24 + $0x528] sm:$0xf] %vm8398_vm1, %v10335_v12  ;;  %v5399_v20 = vmul.f32 0.2, %v3058_v7 }
 0x188   : > { %v10333_v18 = vpack.c.bf16 %v6166_v16, %v6166_v16  ;;  %v5913_v19 = vsel %vm4889_vm10, %v10857_v1, %v5401_v14  ;;  %v11497_v21 = vld [vmem:[%s11615_s21 + $0x2e8] sm:$0xff]   ;;  %vm5143_vm13 = vcmp.ge.f32.partialorder %v4082_v8, 0.0  ;;  %v5655_v24 = vmul.f32 0.2, %v4082_v8  ;;  %v10860_v25 = vpop.f32.mrb[76].mxu0  ;;  %v11116_v26 = vpop.f32.mrb[76].mxu1 }
 0x189   : > { %8471 = vst.msk [vmem:[%s11846_s24 + $0x120] sm:$0xf] %vm8398_vm1, %v10077_v15  ;;  %v10080_v22 = vpack.c.bf16 %v5913_v19, %v5913_v19  ;;  %v6169_v23 = vsel %vm5145_vm11, %v11113_v2, %v5657_v17  ;;  %v11498_v27 = vld [vmem:[%s11615_s21 + $0x6e8] sm:$0xff]   ;;  %v5911_v29 = vsel %vm4887_vm12, %v3058_v7, %v5399_v20  ;;  %vm4892_vm14 = vcmp.ge.f32.partialorder %v10860_v25, 0.0  ;;  %v3071_v31 = vpop.f32.mrb[77].mxu0  ;;  %v4095_v32 = vpop.f32.mrb[77].mxu1  ;;  %10967 = vmatmul.mubr.msk.bf16.gmra.mrb[184].mxu0 %vm1964_vm0, %v11497_v21 }
 0x18a   : > { %8727 = vst.msk [vmem:[%s11846_s24 + $0x520] sm:$0xf] %vm8398_vm1, %v10333_v18  ;;  %v10336_v28 = vpack.c.bf16 %v6169_v23, %v6169_v23  ;;  %v5404_v30 = vmul.f32 0.2, %v10860_v25  ;;  %v11499_v33 = vld [vmem:[%s11615_s21 + $0x2f0] sm:$0xff]   ;;  %v10078_v34 = vpack.c.bf16 %v5911_v29, %v5911_v29  ;;  %v6167_v35 = vsel %vm5143_vm13, %v4082_v8, %v5655_v24  ;;  %v10861_v37 = vpop.f32.mrb[78].mxu0  ;;  %11223 = vmatmul.mubr.msk.bf16.gmra.mrb[184].mxu1 %vm1964_vm0, %v11498_v27 }
 0x18b   : > { %8474 = vst.msk [vmem:[%s11846_s24 + $0x12c] sm:$0xf] %vm8398_vm1, %v10080_v22  ;;  %vm5148_vm15 = vcmp.ge.f32.partialorder %v11116_v26, 0.0  ;;  %v5660_v36 = vmul.f32 0.2, %v11116_v26  ;;  %v11117_v38 = vpop.f32.mrb[78].mxu1  ;;  %v10334_v40 = vpack.c.bf16 %v6167_v35, %v6167_v35  ;;  %10970 = vmatprep.mubr.msk.bf16.mxu0 %vm1964_vm0, %v11499_v33 }
 0x18c   : > { %v11500_v39 = vld [vmem:[%s11615_s21 + $0x6f0] sm:$0xff]   ;;  %8730 = vst.msk [vmem:[%s11846_s24 + $0x52c] sm:$0xf] %vm8398_vm1, %v10336_v28  ;;  %v5916_v41 = vsel %vm4892_vm14, %v10860_v25, %v5404_v30  ;;  %vm4890_vm2 = vcmp.ge.f32.partialorder %v3071_v31, 0.0  ;;  %v5402_v42 = vmul.f32 0.2, %v3071_v31 }
 0x18d   : > { %v3074_v43 = vpop.f32.mrb[79].mxu0  ;;  %v4098_v44 = vpop.f32.mrb[79].mxu1  ;;  %8472 = vst.msk [vmem:[%s11846_s24 + $0x124] sm:$0xf] %vm8398_vm1, %v10078_v34  ;;  %v10083_v45 = vpack.c.bf16 %v5916_v41, %v5916_v41  ;;  %v6172_v46 = vsel %vm5148_vm15, %v11116_v26, %v5660_v36  ;;  %vm5146_vm3 = vcmp.ge.f32.partialorder %v4095_v32, 0.0  ;;  %vm4893_vm4 = vcmp.ge.f32.partialorder %v10861_v37, 0.0  ;;  %11226 = vmatprep.mubr.msk.bf16.mxu1 %vm1964_vm0, %v11500_v39 }
 0x18e   : > { %v5658_v47 = vmul.f32 0.2, %v4095_v32  ;;  %8728 = vst.msk [vmem:[%s11846_s24 + $0x524] sm:$0xf] %vm8398_vm1, %v10334_v40  ;;  %v10339_v48 = vpack.c.bf16 %v6172_v46, %v6172_v46  ;;  %v5914_v49 = vsel %vm4890_vm2, %v3071_v31, %v5402_v42  ;;  %v5405_v50 = vmul.f32 0.2, %v10861_v37 }
 0x18f   : > { %8477 = vst.msk [vmem:[%s11846_s24 + $0x138] sm:$0xf] %vm8398_vm1, %v10083_v45  ;;  %v10081_v51 = vpack.c.bf16 %v5914_v49, %v5914_v49  ;;  %vm5149_vm5 = vcmp.ge.f32.partialorder %v11117_v38, 0.0  ;;  %v5661_v53 = vmul.f32 0.2, %v11117_v38  ;;  %vm4891_vm6 = vcmp.ge.f32.partialorder %v3074_v43, 0.0 }
 0x190   : > { %v6170_v52 = vsel %vm5146_vm3, %v4095_v32, %v5658_v47  ;;  %8733 = vst.msk [vmem:[%s11846_s24 + $0x538] sm:$0xf] %vm8398_vm1, %v10339_v48  ;;  %v5917_v55 = vsel %vm4893_vm4, %v10861_v37, %v5405_v50  ;;  %v5403_v56 = vmul.f32 0.2, %v3074_v43  ;;  %v11501_v57 = vld [vmem:[%s11615_s21 + $0x2f8] sm:$0xff]   ;;  %vm5147_vm7 = vcmp.ge.f32.partialorder %v4098_v44, 0.0 }
 0x191   : > { %v10337_v54 = vpack.c.bf16 %v6170_v52, %v6170_v52  ;;  %8475 = vst.msk [vmem:[%s11846_s24 + $0x130] sm:$0xf] %vm8398_vm1, %v10081_v51  ;;  %v10084_v58 = vpack.c.bf16 %v5917_v55, %v5917_v55  ;;  %v6173_v59 = vsel %vm5149_vm5, %v11117_v38, %v5661_v53  ;;  %v5659_v60 = vmul.f32 0.2, %v4098_v44  ;;  %v10864_v61 = vpop.f32.mrb[80].mxu0  ;;  %v11120_v62 = vpop.f32.mrb[80].mxu1  ;;  %10971 = vmatmul.mubr.msk.bf16.gmra.mrb[188].mxu0 %vm1964_vm0, %v11501_v57 }
 0x192   : > { %v11502_v63 = vld [vmem:[%s11615_s21 + $0x6f8] sm:$0xff]   ;;  %v10340_v0 = vpack.c.bf16 %v6173_v59, %v6173_v59  ;;  %v5915_v1 = vsel %vm4891_vm6, %v3074_v43, %v5403_v56  ;;  %vm4896_vm8 = vcmp.ge.f32.partialorder %v10864_v61, 0.0  ;;  %v5408_v2 = vmul.f32 0.2, %v10864_v61  ;;  %v3087_v3 = vpop.f32.mrb[81].mxu0  ;;  %v4111_v4 = vpop.f32.mrb[81].mxu1 }
 0x193   : > { %8731 = vst.msk [vmem:[%s11846_s24 + $0x530] sm:$0xf] %vm8398_vm1, %v10337_v54  ;;  %v11503_v5 = vld [vmem:[%s11615_s21 + $0x300] sm:$0xff]   ;;  %8478 = vst.msk [vmem:[%s11846_s24 + $0x13c] sm:$0xf] %vm8398_vm1, %v10084_v58  ;;  %v10082_v6 = vpack.c.bf16 %v5915_v1, %v5915_v1  ;;  %v6171_v7 = vsel %vm5147_vm7, %v4098_v44, %v5659_v60  ;;  %vm5152_vm9 = vcmp.ge.f32.partialorder %v11120_v62, 0.0  ;;  %11227 = vmatmul.mubr.msk.bf16.gmra.mrb[188].mxu1 %vm1964_vm0, %v11502_v63 }
 0x194   : > { %v5664_v8 = vmul.f32 0.2, %v11120_v62  ;;  %v10865_v9 = vpop.f32.mrb[82].mxu0  ;;  %v11121_v10 = vpop.f32.mrb[82].mxu1  ;;  %v11504_v11 = vld [vmem:[%s11615_s21 + $0x700] sm:$0xff]   ;;  %v10338_v12 = vpack.c.bf16 %v6171_v7, %v6171_v7  ;;  %v5920_v13 = vsel %vm4896_vm8, %v10864_v61, %v5408_v2  ;;  %vm4894_vm10 = vcmp.ge.f32.partialorder %v3087_v3, 0.0  ;;  %10974 = vmatprep.mubr.msk.bf16.mxu0 %vm1964_vm0, %v11503_v5 }
 0x195   : > { %8734 = vst.msk [vmem:[%s11846_s24 + $0x53c] sm:$0xf] %vm8398_vm1, %v10340_v0  ;;  %v5406_v14 = vmul.f32 0.2, %v3087_v3  ;;  %v3090_v15 = vpop.f32.mrb[83].mxu0  ;;  %v4114_v16 = vpop.f32.mrb[83].mxu1  ;;  %v10087_v17 = vpack.c.bf16 %v5920_v13, %v5920_v13  ;;  %11230 = vmatprep.mubr.msk.bf16.mxu1 %vm1964_vm0, %v11504_v11 }
 0x196   : > { %8476 = vst.msk [vmem:[%s11846_s24 + $0x134] sm:$0xf] %vm8398_vm1, %v10082_v6  ;;  %v6176_v18 = vsel %vm5152_vm9, %v11120_v62, %v5664_v8  ;;  %vm5150_vm11 = vcmp.ge.f32.partialorder %v4111_v4, 0.0  ;;  %v5662_v19 = vmul.f32 0.2, %v4111_v4  ;;  %vm4897_vm12 = vcmp.ge.f32.partialorder %v10865_v9, 0.0 }
 0x197   : > { %8732 = vst.msk [vmem:[%s11846_s24 + $0x534] sm:$0xf] %vm8398_vm1, %v10338_v12  ;;  %v10343_v20 = vpack.c.bf16 %v6176_v18, %v6176_v18  ;;  %v5918_v21 = vsel %vm4894_vm10, %v3087_v3, %v5406_v14  ;;  %v5409_v22 = vmul.f32 0.2, %v10865_v9  ;;  %8481 = vst.msk [vmem:[%s11846_s24 + $0x148] sm:$0xf] %vm8398_vm1, %v10087_v17 }
 0x198   : > { %v10085_v23 = vpack.c.bf16 %v5918_v21, %v5918_v21  ;;  %v6174_v24 = vsel %vm5150_vm11, %v4111_v4, %v5662_v19  ;;  %vm5153_vm13 = vcmp.ge.f32.partialorder %v11121_v10, 0.0  ;;  %v5665_v25 = vmul.f32 0.2, %v11121_v10  ;;  %v11505_v29 = vld [vmem:[%s11615_s21 + $0x308] sm:$0xff]   ;;  %v10868_v33 = vpop.f32.mrb[84].mxu0  ;;  %v11124_v34 = vpop.f32.mrb[84].mxu1 }
 0x199   : > { %8737 = vst.msk [vmem:[%s11846_s24 + $0x548] sm:$0xf] %vm8398_vm1, %v10343_v20  ;;  %v10341_v26 = vpack.c.bf16 %v6174_v24, %v6174_v24  ;;  %v5921_v27 = vsel %vm4897_vm12, %v10865_v9, %v5409_v22  ;;  %vm4895_vm14 = vcmp.ge.f32.partialorder %v3090_v15, 0.0  ;;  %v5407_v28 = vmul.f32 0.2, %v3090_v15  ;;  %v11506_v35 = vld [vmem:[%s11615_s21 + $0x708] sm:$0xff]   ;;  %10975 = vmatmul.mubr.msk.bf16.gmra.mrb[192].mxu0 %vm1964_vm0, %v11505_v29 }
 0x19a   : > { %8479 = vst.msk [vmem:[%s11846_s24 + $0x140] sm:$0xf] %vm8398_vm1, %v10085_v23  ;;  %v10088_v30 = vpack.c.bf16 %v5921_v27, %v5921_v27  ;;  %v6177_v31 = vsel %vm5153_vm13, %v11121_v10, %v5665_v25  ;;  %vm5151_vm15 = vcmp.ge.f32.partialorder %v4114_v16, 0.0  ;;  %v5663_v32 = vmul.f32 0.2, %v4114_v16  ;;  %v3103_v39 = vpop.f32.mrb[85].mxu0 }
 0x19b   : > { %8735 = vst.msk [vmem:[%s11846_s24 + $0x540] sm:$0xf] %vm8398_vm1, %v10341_v26  ;;  %v10344_v36 = vpack.c.bf16 %v6177_v31, %v6177_v31  ;;  %v5919_v37 = vsel %vm4895_vm14, %v3090_v15, %v5407_v28  ;;  %vm4900_vm2 = vcmp.ge.f32.partialorder %v10868_v33, 0.0  ;;  %v5412_v38 = vmul.f32 0.2, %v10868_v33  ;;  %v4127_v40 = vpop.f32.mrb[85].mxu1  ;;  %11231 = vmatmul.mubr.msk.bf16.gmra.mrb[192].mxu1 %vm1964_vm0, %v11506_v35 }
 0x19c   : > { %v11507_v41 = vld [vmem:[%s11615_s21 + $0x310] sm:$0xff]   ;;  %8482 = vst.msk [vmem:[%s11846_s24 + $0x14c] sm:$0xf] %vm8398_vm1, %v10088_v30  ;;  %v10086_v42 = vpack.c.bf16 %v5919_v37, %v5919_v37  ;;  %v6175_v43 = vsel %vm5151_vm15, %v4114_v16, %v5663_v32  ;;  %vm5156_vm3 = vcmp.ge.f32.partialorder %v11124_v34, 0.0  ;;  %v5668_v44 = vmul.f32 0.2, %v11124_v34 }
 0x19d   : > { %v10869_v45 = vpop.f32.mrb[86].mxu0  ;;  %v11125_v46 = vpop.f32.mrb[86].mxu1  ;;  %v11508_v47 = vld [vmem:[%s11615_s21 + $0x710] sm:$0xff]   ;;  %8738 = vst.msk [vmem:[%s11846_s24 + $0x54c] sm:$0xf] %vm8398_vm1, %v10344_v36  ;;  %v10342_v48 = vpack.c.bf16 %v6175_v43, %v6175_v43  ;;  %v5924_v49 = vsel %vm4900_vm2, %v10868_v33, %v5412_v38  ;;  %vm4898_vm4 = vcmp.ge.f32.partialorder %v3103_v39, 0.0  ;;  %10978 = vmatprep.mubr.msk.bf16.mxu0 %vm1964_vm0, %v11507_v41 }
 0x19e   : > { %v5410_v50 = vmul.f32 0.2, %v3103_v39  ;;  %v3106_v51 = vpop.f32.mrb[87].mxu0  ;;  %v4130_v52 = vpop.f32.mrb[87].mxu1  ;;  %8480 = vst.msk [vmem:[%s11846_s24 + $0x144] sm:$0xf] %vm8398_vm1, %v10086_v42  ;;  %v10091_v53 = vpack.c.bf16 %v5924_v49, %v5924_v49  ;;  %v6180_v54 = vsel %vm5156_vm3, %v11124_v34, %v5668_v44  ;;  %11234 = vmatprep.mubr.msk.bf16.mxu1 %vm1964_vm0, %v11508_v47 }
 0x19f   : > { %vm5154_vm5 = vcmp.ge.f32.partialorder %v4127_v40, 0.0  ;;  %v5666_v55 = vmul.f32 0.2, %v4127_v40  ;;  %8736 = vst.msk [vmem:[%s11846_s24 + $0x544] sm:$0xf] %vm8398_vm1, %v10342_v48  ;;  %v10347_v56 = vpack.c.bf16 %v6180_v54, %v6180_v54  ;;  %vm4901_vm6 = vcmp.ge.f32.partialorder %v10869_v45, 0.0 }
 0x1a0   : > { %v5922_v57 = vsel %vm4898_vm4, %v3103_v39, %v5410_v50  ;;  %v5413_v58 = vmul.f32 0.2, %v10869_v45  ;;  %8485 = vst.msk [vmem:[%s11846_s24 + $0x158] sm:$0xf] %vm8398_vm1, %v10091_v53  ;;  %vm5157_vm7 = vcmp.ge.f32.partialorder %v11125_v46, 0.0  ;;  %vm4899_vm8 = vcmp.ge.f32.partialorder %v3106_v51, 0.0 }
 0x1a1   : > { %v10089_v59 = vpack.c.bf16 %v5922_v57, %v5922_v57  ;;  %v6178_v60 = vsel %vm5154_vm5, %v4127_v40, %v5666_v55  ;;  %v5669_v61 = vmul.f32 0.2, %v11125_v46  ;;  %8741 = vst.msk [vmem:[%s11846_s24 + $0x558] sm:$0xf] %vm8398_vm1, %v10347_v56  ;;  %v5411_v0 = vmul.f32 0.2, %v3106_v51 }
 0x1a2   : > { %v10345_v62 = vpack.c.bf16 %v6178_v60, %v6178_v60  ;;  %v5925_v63 = vsel %vm4901_vm6, %v10869_v45, %v5413_v58  ;;  %v11509_v1 = vld [vmem:[%s11615_s21 + $0x318] sm:$0xff]   ;;  %vm5155_vm9 = vcmp.ge.f32.partialorder %v4130_v52, 0.0  ;;  %v5667_v4 = vmul.f32 0.2, %v4130_v52  ;;  %v10872_v5 = vpop.f32.mrb[88].mxu0  ;;  %v11128_v6 = vpop.f32.mrb[88].mxu1 }
 0x1a3   : > { %8483 = vst.msk [vmem:[%s11846_s24 + $0x150] sm:$0xf] %vm8398_vm1, %v10089_v59  ;;  %v10092_v2 = vpack.c.bf16 %v5925_v63, %v5925_v63  ;;  %v6181_v3 = vsel %vm5157_vm7, %v11125_v46, %v5669_v61  ;;  %v11510_v7 = vld [vmem:[%s11615_s21 + $0x718] sm:$0xff]   ;;  %v5923_v9 = vsel %vm4899_vm8, %v3106_v51, %v5411_v0  ;;  %vm4904_vm10 = vcmp.ge.f32.partialorder %v10872_v5, 0.0  ;;  %v3119_v11 = vpop.f32.mrb[89].mxu0  ;;  %v4143_v12 = vpop.f32.mrb[89].mxu1  ;;  %10979 = vmatmul.mubr.msk.bf16.gmra.mrb[196].mxu0 %vm1964_vm0, %v11509_v1 }
 0x1a4   : > { %8739 = vst.msk [vmem:[%s11846_s24 + $0x550] sm:$0xf] %vm8398_vm1, %v10345_v62  ;;  %v10348_v8 = vpack.c.bf16 %v6181_v3, %v6181_v3  ;;  %v5416_v10 = vmul.f32 0.2, %v10872_v5  ;;  %v11511_v13 = vld [vmem:[%s11615_s21 + $0x320] sm:$0xff]   ;;  %v10090_v14 = vpack.c.bf16 %v5923_v9, %v5923_v9  ;;  %v6179_v15 = vsel %vm5155_vm9, %v4130_v52, %v5667_v4  ;;  %v10873_v17 = vpop.f32.mrb[90].mxu0  ;;  %11235 = vmatmul.mubr.msk.bf16.gmra.mrb[196].mxu1 %vm1964_vm0, %v11510_v7 }
 0x1a5   : > { %8486 = vst.msk [vmem:[%s11846_s24 + $0x15c] sm:$0xf] %vm8398_vm1, %v10092_v2  ;;  %vm5160_vm11 = vcmp.ge.f32.partialorder %v11128_v6, 0.0  ;;  %v5672_v16 = vmul.f32 0.2, %v11128_v6  ;;  %v11129_v18 = vpop.f32.mrb[90].mxu1  ;;  %v10346_v20 = vpack.c.bf16 %v6179_v15, %v6179_v15  ;;  %10982 = vmatprep.mubr.msk.bf16.mxu0 %vm1964_vm0, %v11511_v13 }
 0x1a6   : > { %v11512_v19 = vld [vmem:[%s11615_s21 + $0x720] sm:$0xff]   ;;  %8742 = vst.msk [vmem:[%s11846_s24 + $0x55c] sm:$0xf] %vm8398_vm1, %v10348_v8  ;;  %v5928_v21 = vsel %vm4904_vm10, %v10872_v5, %v5416_v10  ;;  %vm4902_vm12 = vcmp.ge.f32.partialorder %v3119_v11, 0.0  ;;  %v5414_v22 = vmul.f32 0.2, %v3119_v11 }
 0x1a7   : > { %v3122_v23 = vpop.f32.mrb[91].mxu0  ;;  %v4146_v24 = vpop.f32.mrb[91].mxu1  ;;  %8484 = vst.msk [vmem:[%s11846_s24 + $0x154] sm:$0xf] %vm8398_vm1, %v10090_v14  ;;  %v10095_v25 = vpack.c.bf16 %v5928_v21, %v5928_v21  ;;  %v6184_v26 = vsel %vm5160_vm11, %v11128_v6, %v5672_v16  ;;  %vm5158_vm13 = vcmp.ge.f32.partialorder %v4143_v12, 0.0  ;;  %vm4905_vm14 = vcmp.ge.f32.partialorder %v10873_v17, 0.0  ;;  %11238 = vmatprep.mubr.msk.bf16.mxu1 %vm1964_vm0, %v11512_v19 }
 0x1a8   : > { %v5670_v27 = vmul.f32 0.2, %v4143_v12  ;;  %8740 = vst.msk [vmem:[%s11846_s24 + $0x554] sm:$0xf] %vm8398_vm1, %v10346_v20  ;;  %v10351_v28 = vpack.c.bf16 %v6184_v26, %v6184_v26  ;;  %v5926_v29 = vsel %vm4902_vm12, %v3119_v11, %v5414_v22  ;;  %v5417_v30 = vmul.f32 0.2, %v10873_v17 }
 0x1a9   : > { %8489 = vst.msk [vmem:[%s11846_s24 + $0x168] sm:$0xf] %vm8398_vm1, %v10095_v25  ;;  %v10093_v31 = vpack.c.bf16 %v5926_v29, %v5926_v29  ;;  %vm5161_vm15 = vcmp.ge.f32.partialorder %v11129_v18, 0.0  ;;  %v5673_v33 = vmul.f32 0.2, %v11129_v18  ;;  %vm4903_vm2 = vcmp.ge.f32.partialorder %v3122_v23, 0.0 }
 0x1aa   : > { %v6182_v32 = vsel %vm5158_vm13, %v4143_v12, %v5670_v27  ;;  %8745 = vst.msk [vmem:[%s11846_s24 + $0x568] sm:$0xf] %vm8398_vm1, %v10351_v28  ;;  %v5929_v35 = vsel %vm4905_vm14, %v10873_v17, %v5417_v30  ;;  %v5415_v36 = vmul.f32 0.2, %v3122_v23  ;;  %v11513_v37 = vld [vmem:[%s11615_s21 + $0x328] sm:$0xff]   ;;  %vm5159_vm3 = vcmp.ge.f32.partialorder %v4146_v24, 0.0 }
 0x1ab   : > { %v10349_v34 = vpack.c.bf16 %v6182_v32, %v6182_v32  ;;  %8487 = vst.msk [vmem:[%s11846_s24 + $0x160] sm:$0xf] %vm8398_vm1, %v10093_v31  ;;  %v10096_v38 = vpack.c.bf16 %v5929_v35, %v5929_v35  ;;  %v6185_v39 = vsel %vm5161_vm15, %v11129_v18, %v5673_v33  ;;  %v5671_v40 = vmul.f32 0.2, %v4146_v24  ;;  %v10876_v41 = vpop.f32.mrb[92].mxu0  ;;  %v11132_v42 = vpop.f32.mrb[92].mxu1  ;;  %10983 = vmatmul.mubr.msk.bf16.gmra.mrb[200].mxu0 %vm1964_vm0, %v11513_v37 }
 0x1ac   : > { %v11514_v43 = vld [vmem:[%s11615_s21 + $0x728] sm:$0xff]   ;;  %v10352_v44 = vpack.c.bf16 %v6185_v39, %v6185_v39  ;;  %v5927_v45 = vsel %vm4903_vm2, %v3122_v23, %v5415_v36  ;;  %vm4908_vm4 = vcmp.ge.f32.partialorder %v10876_v41, 0.0  ;;  %v5420_v46 = vmul.f32 0.2, %v10876_v41  ;;  %v3135_v47 = vpop.f32.mrb[93].mxu0  ;;  %v4159_v48 = vpop.f32.mrb[93].mxu1 }
 0x1ad   : > { %8743 = vst.msk [vmem:[%s11846_s24 + $0x560] sm:$0xf] %vm8398_vm1, %v10349_v34  ;;  %v11515_v49 = vld [vmem:[%s11615_s21 + $0x330] sm:$0xff]   ;;  %8490 = vst.msk [vmem:[%s11846_s24 + $0x16c] sm:$0xf] %vm8398_vm1, %v10096_v38  ;;  %v10094_v50 = vpack.c.bf16 %v5927_v45, %v5927_v45  ;;  %v6183_v51 = vsel %vm5159_vm3, %v4146_v24, %v5671_v40  ;;  %vm5164_vm5 = vcmp.ge.f32.partialorder %v11132_v42, 0.0  ;;  %11239 = vmatmul.mubr.msk.bf16.gmra.mrb[200].mxu1 %vm1964_vm0, %v11514_v43 }
 0x1ae   : > { %v5676_v52 = vmul.f32 0.2, %v11132_v42  ;;  %v10877_v53 = vpop.f32.mrb[94].mxu0  ;;  %v11133_v54 = vpop.f32.mrb[94].mxu1  ;;  %v11516_v55 = vld [vmem:[%s11615_s21 + $0x730] sm:$0xff]   ;;  %v10350_v56 = vpack.c.bf16 %v6183_v51, %v6183_v51  ;;  %v5932_v57 = vsel %vm4908_vm4, %v10876_v41, %v5420_v46  ;;  %vm4906_vm6 = vcmp.ge.f32.partialorder %v3135_v47, 0.0  ;;  %10986 = vmatprep.mubr.msk.bf16.mxu0 %vm1964_vm0, %v11515_v49 }
 0x1af   : > { %8746 = vst.msk [vmem:[%s11846_s24 + $0x56c] sm:$0xf] %vm8398_vm1, %v10352_v44  ;;  %v5418_v58 = vmul.f32 0.2, %v3135_v47  ;;  %v3138_v59 = vpop.f32.mrb[95].mxu0  ;;  %v4162_v60 = vpop.f32.mrb[95].mxu1  ;;  %v10099_v61 = vpack.c.bf16 %v5932_v57, %v5932_v57  ;;  %11242 = vmatprep.mubr.msk.bf16.mxu1 %vm1964_vm0, %v11516_v55 }
 0x1b0   : > { %8488 = vst.msk [vmem:[%s11846_s24 + $0x164] sm:$0xf] %vm8398_vm1, %v10094_v50  ;;  %v6188_v62 = vsel %vm5164_vm5, %v11132_v42, %v5676_v52  ;;  %vm5162_vm7 = vcmp.ge.f32.partialorder %v4159_v48, 0.0  ;;  %v5674_v63 = vmul.f32 0.2, %v4159_v48  ;;  %vm4909_vm8 = vcmp.ge.f32.partialorder %v10877_v53, 0.0 }
 0x1b1   : > { %8744 = vst.msk [vmem:[%s11846_s24 + $0x564] sm:$0xf] %vm8398_vm1, %v10350_v56  ;;  %v10355_v0 = vpack.c.bf16 %v6188_v62, %v6188_v62  ;;  %v5930_v1 = vsel %vm4906_vm6, %v3135_v47, %v5418_v58  ;;  %v5421_v2 = vmul.f32 0.2, %v10877_v53  ;;  %8493 = vst.msk [vmem:[%s11846_s24 + $0x178] sm:$0xf] %vm8398_vm1, %v10099_v61 }
 0x1b2   : > { %v10097_v3 = vpack.c.bf16 %v5930_v1, %v5930_v1  ;;  %v6186_v4 = vsel %vm5162_vm7, %v4159_v48, %v5674_v63  ;;  %vm5165_vm9 = vcmp.ge.f32.partialorder %v11133_v54, 0.0  ;;  %v5677_v5 = vmul.f32 0.2, %v11133_v54  ;;  %v11517_v9 = vld [vmem:[%s11615_s21 + $0x338] sm:$0xff]   ;;  %v10880_v13 = vpop.f32.mrb[96].mxu0  ;;  %v11136_v14 = vpop.f32.mrb[96].mxu1 }
 0x1b3   : > { %8749 = vst.msk [vmem:[%s11846_s24 + $0x578] sm:$0xf] %vm8398_vm1, %v10355_v0  ;;  %v10353_v6 = vpack.c.bf16 %v6186_v4, %v6186_v4  ;;  %v5933_v7 = vsel %vm4909_vm8, %v10877_v53, %v5421_v2  ;;  %vm4907_vm10 = vcmp.ge.f32.partialorder %v3138_v59, 0.0  ;;  %v5419_v8 = vmul.f32 0.2, %v3138_v59  ;;  %v11518_v15 = vld [vmem:[%s11615_s21 + $0x738] sm:$0xff]   ;;  %10987 = vmatmul.mubr.msk.bf16.gmra.mrb[204].mxu0 %vm1964_vm0, %v11517_v9 }
 0x1b4   : > { %8491 = vst.msk [vmem:[%s11846_s24 + $0x170] sm:$0xf] %vm8398_vm1, %v10097_v3  ;;  %v10100_v10 = vpack.c.bf16 %v5933_v7, %v5933_v7  ;;  %v6189_v11 = vsel %vm5165_vm9, %v11133_v54, %v5677_v5  ;;  %vm5163_vm11 = vcmp.ge.f32.partialorder %v4162_v60, 0.0  ;;  %v5675_v12 = vmul.f32 0.2, %v4162_v60  ;;  %v3151_v19 = vpop.f32.mrb[97].mxu0 }
 0x1b5   : > { %8747 = vst.msk [vmem:[%s11846_s24 + $0x570] sm:$0xf] %vm8398_vm1, %v10353_v6  ;;  %v10356_v16 = vpack.c.bf16 %v6189_v11, %v6189_v11  ;;  %v5931_v17 = vsel %vm4907_vm10, %v3138_v59, %v5419_v8  ;;  %vm4912_vm12 = vcmp.ge.f32.partialorder %v10880_v13, 0.0  ;;  %v5424_v18 = vmul.f32 0.2, %v10880_v13  ;;  %v4175_v20 = vpop.f32.mrb[97].mxu1  ;;  %11243 = vmatmul.mubr.msk.bf16.gmra.mrb[204].mxu1 %vm1964_vm0, %v11518_v15 }
 0x1b6   : > { %v11519_v21 = vld [vmem:[%s11615_s21 + $0x340] sm:$0xff]   ;;  %8494 = vst.msk [vmem:[%s11846_s24 + $0x17c] sm:$0xf] %vm8398_vm1, %v10100_v10  ;;  %v10098_v22 = vpack.c.bf16 %v5931_v17, %v5931_v17  ;;  %v6187_v23 = vsel %vm5163_vm11, %v4162_v60, %v5675_v12  ;;  %vm5168_vm13 = vcmp.ge.f32.partialorder %v11136_v14, 0.0  ;;  %v5680_v24 = vmul.f32 0.2, %v11136_v14 }
 0x1b7   : > { %v10881_v25 = vpop.f32.mrb[98].mxu0  ;;  %v11137_v26 = vpop.f32.mrb[98].mxu1  ;;  %v11520_v27 = vld [vmem:[%s11615_s21 + $0x740] sm:$0xff]   ;;  %8750 = vst.msk [vmem:[%s11846_s24 + $0x57c] sm:$0xf] %vm8398_vm1, %v10356_v16  ;;  %v10354_v28 = vpack.c.bf16 %v6187_v23, %v6187_v23  ;;  %v5936_v29 = vsel %vm4912_vm12, %v10880_v13, %v5424_v18  ;;  %vm4910_vm14 = vcmp.ge.f32.partialorder %v3151_v19, 0.0  ;;  %10990 = vmatprep.mubr.msk.bf16.mxu0 %vm1964_vm0, %v11519_v21 }
 0x1b8   : > { %v5422_v30 = vmul.f32 0.2, %v3151_v19  ;;  %v3154_v31 = vpop.f32.mrb[99].mxu0  ;;  %v4178_v32 = vpop.f32.mrb[99].mxu1  ;;  %8492 = vst.msk [vmem:[%s11846_s24 + $0x174] sm:$0xf] %vm8398_vm1, %v10098_v22  ;;  %v10103_v33 = vpack.c.bf16 %v5936_v29, %v5936_v29  ;;  %v6192_v34 = vsel %vm5168_vm13, %v11136_v14, %v5680_v24  ;;  %11246 = vmatprep.mubr.msk.bf16.mxu1 %vm1964_vm0, %v11520_v27 }
 0x1b9   : > { %vm5166_vm15 = vcmp.ge.f32.partialorder %v4175_v20, 0.0  ;;  %v5678_v35 = vmul.f32 0.2, %v4175_v20  ;;  %8748 = vst.msk [vmem:[%s11846_s24 + $0x574] sm:$0xf] %vm8398_vm1, %v10354_v28  ;;  %v10359_v36 = vpack.c.bf16 %v6192_v34, %v6192_v34  ;;  %vm4913_vm2 = vcmp.ge.f32.partialorder %v10881_v25, 0.0 }
 0x1ba   : > { %v5934_v37 = vsel %vm4910_vm14, %v3151_v19, %v5422_v30  ;;  %v5425_v38 = vmul.f32 0.2, %v10881_v25  ;;  %8497 = vst.msk [vmem:[%s11846_s24 + $0x188] sm:$0xf] %vm8398_vm1, %v10103_v33  ;;  %vm5169_vm3 = vcmp.ge.f32.partialorder %v11137_v26, 0.0  ;;  %vm4911_vm4 = vcmp.ge.f32.partialorder %v3154_v31, 0.0 }
 0x1bb   : > { %v10101_v39 = vpack.c.bf16 %v5934_v37, %v5934_v37  ;;  %v6190_v40 = vsel %vm5166_vm15, %v4175_v20, %v5678_v35  ;;  %v5681_v41 = vmul.f32 0.2, %v11137_v26  ;;  %8753 = vst.msk [vmem:[%s11846_s24 + $0x588] sm:$0xf] %vm8398_vm1, %v10359_v36  ;;  %v5423_v44 = vmul.f32 0.2, %v3154_v31 }
 0x1bc   : > { %v10357_v42 = vpack.c.bf16 %v6190_v40, %v6190_v40  ;;  %v5937_v43 = vsel %vm4913_vm2, %v10881_v25, %v5425_v38  ;;  %v11521_v45 = vld [vmem:[%s11615_s21 + $0x348] sm:$0xff]   ;;  %vm5167_vm5 = vcmp.ge.f32.partialorder %v4178_v32, 0.0  ;;  %v5679_v48 = vmul.f32 0.2, %v4178_v32  ;;  %v10884_v49 = vpop.f32.mrb[100].mxu0  ;;  %v11140_v50 = vpop.f32.mrb[100].mxu1 }
 0x1bd   : > { %8495 = vst.msk [vmem:[%s11846_s24 + $0x180] sm:$0xf] %vm8398_vm1, %v10101_v39  ;;  %v10104_v46 = vpack.c.bf16 %v5937_v43, %v5937_v43  ;;  %v6193_v47 = vsel %vm5169_vm3, %v11137_v26, %v5681_v41  ;;  %v11522_v51 = vld [vmem:[%s11615_s21 + $0x748] sm:$0xff]   ;;  %v5935_v53 = vsel %vm4911_vm4, %v3154_v31, %v5423_v44  ;;  %vm4916_vm6 = vcmp.ge.f32.partialorder %v10884_v49, 0.0  ;;  %v3167_v55 = vpop.f32.mrb[101].mxu0  ;;  %v4191_v56 = vpop.f32.mrb[101].mxu1  ;;  %10991 = vmatmul.mubr.msk.bf16.gmra.mrb[208].mxu0 %vm1964_vm0, %v11521_v45 }
 0x1be   : > { %8751 = vst.msk [vmem:[%s11846_s24 + $0x580] sm:$0xf] %vm8398_vm1, %v10357_v42  ;;  %v10360_v52 = vpack.c.bf16 %v6193_v47, %v6193_v47  ;;  %v5428_v54 = vmul.f32 0.2, %v10884_v49  ;;  %v11523_v57 = vld [vmem:[%s11615_s21 + $0x350] sm:$0xff]   ;;  %v10102_v58 = vpack.c.bf16 %v5935_v53, %v5935_v53  ;;  %v6191_v59 = vsel %vm5167_vm5, %v4178_v32, %v5679_v48  ;;  %v10885_v61 = vpop.f32.mrb[102].mxu0  ;;  %11247 = vmatmul.mubr.msk.bf16.gmra.mrb[208].mxu1 %vm1964_vm0, %v11522_v51 }
 0x1bf   : > { %8498 = vst.msk [vmem:[%s11846_s24 + $0x18c] sm:$0xf] %vm8398_vm1, %v10104_v46  ;;  %vm5172_vm7 = vcmp.ge.f32.partialorder %v11140_v50, 0.0  ;;  %v5684_v60 = vmul.f32 0.2, %v11140_v50  ;;  %v11141_v62 = vpop.f32.mrb[102].mxu1  ;;  %v10358_v0 = vpack.c.bf16 %v6191_v59, %v6191_v59  ;;  %10994 = vmatprep.mubr.msk.bf16.mxu0 %vm1964_vm0, %v11523_v57 }
 0x1c0   : > { %v11524_v63 = vld [vmem:[%s11615_s21 + $0x750] sm:$0xff]   ;;  %8754 = vst.msk [vmem:[%s11846_s24 + $0x58c] sm:$0xf] %vm8398_vm1, %v10360_v52  ;;  %v5940_v1 = vsel %vm4916_vm6, %v10884_v49, %v5428_v54  ;;  %vm4914_vm8 = vcmp.ge.f32.partialorder %v3167_v55, 0.0  ;;  %v5426_v2 = vmul.f32 0.2, %v3167_v55 }
 0x1c1   : > { %v3170_v3 = vpop.f32.mrb[103].mxu0  ;;  %v4194_v4 = vpop.f32.mrb[103].mxu1  ;;  %8496 = vst.msk [vmem:[%s11846_s24 + $0x184] sm:$0xf] %vm8398_vm1, %v10102_v58  ;;  %v10107_v5 = vpack.c.bf16 %v5940_v1, %v5940_v1  ;;  %v6196_v6 = vsel %vm5172_vm7, %v11140_v50, %v5684_v60  ;;  %vm5170_vm9 = vcmp.ge.f32.partialorder %v4191_v56, 0.0  ;;  %vm4917_vm10 = vcmp.ge.f32.partialorder %v10885_v61, 0.0  ;;  %11250 = vmatprep.mubr.msk.bf16.mxu1 %vm1964_vm0, %v11524_v63 }
 0x1c2   : > { %v5682_v7 = vmul.f32 0.2, %v4191_v56  ;;  %8752 = vst.msk [vmem:[%s11846_s24 + $0x584] sm:$0xf] %vm8398_vm1, %v10358_v0  ;;  %v10363_v8 = vpack.c.bf16 %v6196_v6, %v6196_v6  ;;  %v5938_v9 = vsel %vm4914_vm8, %v3167_v55, %v5426_v2  ;;  %v5429_v10 = vmul.f32 0.2, %v10885_v61 }
 0x1c3   : > { %8501 = vst.msk [vmem:[%s11846_s24 + $0x198] sm:$0xf] %vm8398_vm1, %v10107_v5  ;;  %v10105_v11 = vpack.c.bf16 %v5938_v9, %v5938_v9  ;;  %vm5173_vm11 = vcmp.ge.f32.partialorder %v11141_v62, 0.0  ;;  %v5685_v13 = vmul.f32 0.2, %v11141_v62  ;;  %vm4915_vm12 = vcmp.ge.f32.partialorder %v3170_v3, 0.0 }
 0x1c4   : > { %v6194_v12 = vsel %vm5170_vm9, %v4191_v56, %v5682_v7  ;;  %8757 = vst.msk [vmem:[%s11846_s24 + $0x598] sm:$0xf] %vm8398_vm1, %v10363_v8  ;;  %v5941_v15 = vsel %vm4917_vm10, %v10885_v61, %v5429_v10  ;;  %v5427_v16 = vmul.f32 0.2, %v3170_v3  ;;  %v11525_v17 = vld [vmem:[%s11615_s21 + $0x358] sm:$0xff]   ;;  %vm5171_vm13 = vcmp.ge.f32.partialorder %v4194_v4, 0.0 }
 0x1c5   : > { %v10361_v14 = vpack.c.bf16 %v6194_v12, %v6194_v12  ;;  %8499 = vst.msk [vmem:[%s11846_s24 + $0x190] sm:$0xf] %vm8398_vm1, %v10105_v11  ;;  %v10108_v18 = vpack.c.bf16 %v5941_v15, %v5941_v15  ;;  %v6197_v19 = vsel %vm5173_vm11, %v11141_v62, %v5685_v13  ;;  %v5683_v20 = vmul.f32 0.2, %v4194_v4  ;;  %v10888_v21 = vpop.f32.mrb[104].mxu0  ;;  %v11144_v22 = vpop.f32.mrb[104].mxu1  ;;  %10995 = vmatmul.mubr.msk.bf16.gmra.mrb[212].mxu0 %vm1964_vm0, %v11525_v17 }
 0x1c6   : > { %v11526_v23 = vld [vmem:[%s11615_s21 + $0x758] sm:$0xff]   ;;  %v10364_v24 = vpack.c.bf16 %v6197_v19, %v6197_v19  ;;  %v5939_v25 = vsel %vm4915_vm12, %v3170_v3, %v5427_v16  ;;  %vm4920_vm14 = vcmp.ge.f32.partialorder %v10888_v21, 0.0  ;;  %v5432_v26 = vmul.f32 0.2, %v10888_v21  ;;  %v3183_v27 = vpop.f32.mrb[105].mxu0  ;;  %v4207_v28 = vpop.f32.mrb[105].mxu1 }
 0x1c7   : > { %8755 = vst.msk [vmem:[%s11846_s24 + $0x590] sm:$0xf] %vm8398_vm1, %v10361_v14  ;;  %v11527_v29 = vld [vmem:[%s11615_s21 + $0x360] sm:$0xff]   ;;  %8502 = vst.msk [vmem:[%s11846_s24 + $0x19c] sm:$0xf] %vm8398_vm1, %v10108_v18  ;;  %v10106_v30 = vpack.c.bf16 %v5939_v25, %v5939_v25  ;;  %v6195_v31 = vsel %vm5171_vm13, %v4194_v4, %v5683_v20  ;;  %vm5176_vm15 = vcmp.ge.f32.partialorder %v11144_v22, 0.0  ;;  %11251 = vmatmul.mubr.msk.bf16.gmra.mrb[212].mxu1 %vm1964_vm0, %v11526_v23 }
 0x1c8   : > { %v5688_v32 = vmul.f32 0.2, %v11144_v22  ;;  %v10889_v33 = vpop.f32.mrb[106].mxu0  ;;  %v11145_v34 = vpop.f32.mrb[106].mxu1  ;;  %v11528_v35 = vld [vmem:[%s11615_s21 + $0x760] sm:$0xff]   ;;  %v10362_v36 = vpack.c.bf16 %v6195_v31, %v6195_v31  ;;  %v5944_v37 = vsel %vm4920_vm14, %v10888_v21, %v5432_v26  ;;  %vm4918_vm2 = vcmp.ge.f32.partialorder %v3183_v27, 0.0  ;;  %10998 = vmatprep.mubr.msk.bf16.mxu0 %vm1964_vm0, %v11527_v29 }
 0x1c9   : > { %8758 = vst.msk [vmem:[%s11846_s24 + $0x59c] sm:$0xf] %vm8398_vm1, %v10364_v24  ;;  %v5430_v38 = vmul.f32 0.2, %v3183_v27  ;;  %v3186_v39 = vpop.f32.mrb[107].mxu0  ;;  %v4210_v40 = vpop.f32.mrb[107].mxu1  ;;  %v10111_v41 = vpack.c.bf16 %v5944_v37, %v5944_v37  ;;  %11254 = vmatprep.mubr.msk.bf16.mxu1 %vm1964_vm0, %v11528_v35 }
 0x1ca   : > { %8500 = vst.msk [vmem:[%s11846_s24 + $0x194] sm:$0xf] %vm8398_vm1, %v10106_v30  ;;  %v6200_v42 = vsel %vm5176_vm15, %v11144_v22, %v5688_v32  ;;  %vm5174_vm3 = vcmp.ge.f32.partialorder %v4207_v28, 0.0  ;;  %v5686_v43 = vmul.f32 0.2, %v4207_v28  ;;  %vm4921_vm4 = vcmp.ge.f32.partialorder %v10889_v33, 0.0 }
 0x1cb   : > { %8756 = vst.msk [vmem:[%s11846_s24 + $0x594] sm:$0xf] %vm8398_vm1, %v10362_v36  ;;  %v10367_v44 = vpack.c.bf16 %v6200_v42, %v6200_v42  ;;  %v5942_v45 = vsel %vm4918_vm2, %v3183_v27, %v5430_v38  ;;  %v5433_v46 = vmul.f32 0.2, %v10889_v33  ;;  %8505 = vst.msk [vmem:[%s11846_s24 + $0x1a8] sm:$0xf] %vm8398_vm1, %v10111_v41 }
 0x1cc   : > { %v10109_v47 = vpack.c.bf16 %v5942_v45, %v5942_v45  ;;  %v6198_v48 = vsel %vm5174_vm3, %v4207_v28, %v5686_v43  ;;  %vm5177_vm5 = vcmp.ge.f32.partialorder %v11145_v34, 0.0  ;;  %v5689_v49 = vmul.f32 0.2, %v11145_v34  ;;  %v11529_v53 = vld [vmem:[%s11615_s21 + $0x368] sm:$0xff]   ;;  %v10892_v57 = vpop.f32.mrb[108].mxu0  ;;  %v11148_v58 = vpop.f32.mrb[108].mxu1 }
 0x1cd   : > { %8761 = vst.msk [vmem:[%s11846_s24 + $0x5a8] sm:$0xf] %vm8398_vm1, %v10367_v44  ;;  %v10365_v50 = vpack.c.bf16 %v6198_v48, %v6198_v48  ;;  %v5945_v51 = vsel %vm4921_vm4, %v10889_v33, %v5433_v46  ;;  %vm4919_vm6 = vcmp.ge.f32.partialorder %v3186_v39, 0.0  ;;  %v5431_v52 = vmul.f32 0.2, %v3186_v39  ;;  %v11530_v59 = vld [vmem:[%s11615_s21 + $0x768] sm:$0xff]   ;;  %10999 = vmatmul.mubr.msk.bf16.gmra.mrb[216].mxu0 %vm1964_vm0, %v11529_v53 }
 0x1ce   : > { %8503 = vst.msk [vmem:[%s11846_s24 + $0x1a0] sm:$0xf] %vm8398_vm1, %v10109_v47  ;;  %v10112_v54 = vpack.c.bf16 %v5945_v51, %v5945_v51  ;;  %v6201_v55 = vsel %vm5177_vm5, %v11145_v34, %v5689_v49  ;;  %vm5175_vm7 = vcmp.ge.f32.partialorder %v4210_v40, 0.0  ;;  %v5687_v56 = vmul.f32 0.2, %v4210_v40  ;;  %v3199_v63 = vpop.f32.mrb[109].mxu0 }
 0x1cf   : > { %8759 = vst.msk [vmem:[%s11846_s24 + $0x5a0] sm:$0xf] %vm8398_vm1, %v10365_v50  ;;  %v10368_v60 = vpack.c.bf16 %v6201_v55, %v6201_v55  ;;  %v5943_v61 = vsel %vm4919_vm6, %v3186_v39, %v5431_v52  ;;  %vm4924_vm8 = vcmp.ge.f32.partialorder %v10892_v57, 0.0  ;;  %v5436_v62 = vmul.f32 0.2, %v10892_v57  ;;  %v4223_v0 = vpop.f32.mrb[109].mxu1  ;;  %11255 = vmatmul.mubr.msk.bf16.gmra.mrb[216].mxu1 %vm1964_vm0, %v11530_v59 }
 0x1d0   : > { %v11531_v1 = vld [vmem:[%s11615_s21 + $0x370] sm:$0xff]   ;;  %8506 = vst.msk [vmem:[%s11846_s24 + $0x1ac] sm:$0xf] %vm8398_vm1, %v10112_v54  ;;  %v10110_v2 = vpack.c.bf16 %v5943_v61, %v5943_v61  ;;  %v6199_v3 = vsel %vm5175_vm7, %v4210_v40, %v5687_v56  ;;  %vm5180_vm9 = vcmp.ge.f32.partialorder %v11148_v58, 0.0  ;;  %v5692_v4 = vmul.f32 0.2, %v11148_v58 }
 0x1d1   : > { %v10893_v5 = vpop.f32.mrb[110].mxu0  ;;  %v11149_v6 = vpop.f32.mrb[110].mxu1  ;;  %v11532_v7 = vld [vmem:[%s11615_s21 + $0x770] sm:$0xff]   ;;  %8762 = vst.msk [vmem:[%s11846_s24 + $0x5ac] sm:$0xf] %vm8398_vm1, %v10368_v60  ;;  %v10366_v8 = vpack.c.bf16 %v6199_v3, %v6199_v3  ;;  %v5948_v9 = vsel %vm4924_vm8, %v10892_v57, %v5436_v62  ;;  %vm4922_vm10 = vcmp.ge.f32.partialorder %v3199_v63, 0.0  ;;  %11002 = vmatprep.mubr.msk.bf16.mxu0 %vm1964_vm0, %v11531_v1 }
 0x1d2   : > { %v5434_v10 = vmul.f32 0.2, %v3199_v63  ;;  %v3202_v11 = vpop.f32.mrb[111].mxu0  ;;  %v4226_v12 = vpop.f32.mrb[111].mxu1  ;;  %8504 = vst.msk [vmem:[%s11846_s24 + $0x1a4] sm:$0xf] %vm8398_vm1, %v10110_v2  ;;  %v10115_v13 = vpack.c.bf16 %v5948_v9, %v5948_v9  ;;  %v6204_v14 = vsel %vm5180_vm9, %v11148_v58, %v5692_v4  ;;  %11258 = vmatprep.mubr.msk.bf16.mxu1 %vm1964_vm0, %v11532_v7 }
 0x1d3   : > { %vm5178_vm11 = vcmp.ge.f32.partialorder %v4223_v0, 0.0  ;;  %v5690_v15 = vmul.f32 0.2, %v4223_v0  ;;  %8760 = vst.msk [vmem:[%s11846_s24 + $0x5a4] sm:$0xf] %vm8398_vm1, %v10366_v8  ;;  %v10371_v16 = vpack.c.bf16 %v6204_v14, %v6204_v14  ;;  %vm4925_vm12 = vcmp.ge.f32.partialorder %v10893_v5, 0.0 }
 0x1d4   : > { %v5946_v17 = vsel %vm4922_vm10, %v3199_v63, %v5434_v10  ;;  %v5437_v18 = vmul.f32 0.2, %v10893_v5  ;;  %8509 = vst.msk [vmem:[%s11846_s24 + $0x1b8] sm:$0xf] %vm8398_vm1, %v10115_v13  ;;  %vm5181_vm13 = vcmp.ge.f32.partialorder %v11149_v6, 0.0  ;;  %vm4923_vm14 = vcmp.ge.f32.partialorder %v3202_v11, 0.0 }
 0x1d5   : > { %v10113_v19 = vpack.c.bf16 %v5946_v17, %v5946_v17  ;;  %v6202_v20 = vsel %vm5178_vm11, %v4223_v0, %v5690_v15  ;;  %v5693_v21 = vmul.f32 0.2, %v11149_v6  ;;  %8765 = vst.msk [vmem:[%s11846_s24 + $0x5b8] sm:$0xf] %vm8398_vm1, %v10371_v16  ;;  %v5435_v24 = vmul.f32 0.2, %v3202_v11 }
 0x1d6   : > { %v10369_v22 = vpack.c.bf16 %v6202_v20, %v6202_v20  ;;  %v5949_v23 = vsel %vm4925_vm12, %v10893_v5, %v5437_v18  ;;  %v11533_v25 = vld [vmem:[%s11615_s21 + $0x378] sm:$0xff]   ;;  %vm5179_vm15 = vcmp.ge.f32.partialorder %v4226_v12, 0.0  ;;  %v5691_v28 = vmul.f32 0.2, %v4226_v12  ;;  %v10896_v29 = vpop.f32.mrb[112].mxu0  ;;  %v11152_v30 = vpop.f32.mrb[112].mxu1 }
 0x1d7   : > { %8507 = vst.msk [vmem:[%s11846_s24 + $0x1b0] sm:$0xf] %vm8398_vm1, %v10113_v19  ;;  %v10116_v26 = vpack.c.bf16 %v5949_v23, %v5949_v23  ;;  %v6205_v27 = vsel %vm5181_vm13, %v11149_v6, %v5693_v21  ;;  %v11534_v31 = vld [vmem:[%s11615_s21 + $0x778] sm:$0xff]   ;;  %v5947_v33 = vsel %vm4923_vm14, %v3202_v11, %v5435_v24  ;;  %vm4928_vm2 = vcmp.ge.f32.partialorder %v10896_v29, 0.0  ;;  %v3215_v35 = vpop.f32.mrb[113].mxu0  ;;  %v4239_v36 = vpop.f32.mrb[113].mxu1  ;;  %11003 = vmatmul.mubr.msk.bf16.gmra.mrb[220].mxu0 %vm1964_vm0, %v11533_v25 }
 0x1d8   : > { %8763 = vst.msk [vmem:[%s11846_s24 + $0x5b0] sm:$0xf] %vm8398_vm1, %v10369_v22  ;;  %v10372_v32 = vpack.c.bf16 %v6205_v27, %v6205_v27  ;;  %v5440_v34 = vmul.f32 0.2, %v10896_v29  ;;  %v11535_v37 = vld [vmem:[%s11615_s21 + $0x380] sm:$0xff]   ;;  %v10114_v38 = vpack.c.bf16 %v5947_v33, %v5947_v33  ;;  %v6203_v39 = vsel %vm5179_vm15, %v4226_v12, %v5691_v28  ;;  %v10897_v41 = vpop.f32.mrb[114].mxu0  ;;  %11259 = vmatmul.mubr.msk.bf16.gmra.mrb[220].mxu1 %vm1964_vm0, %v11534_v31 }
 0x1d9   : > { %8510 = vst.msk [vmem:[%s11846_s24 + $0x1bc] sm:$0xf] %vm8398_vm1, %v10116_v26  ;;  %vm5184_vm3 = vcmp.ge.f32.partialorder %v11152_v30, 0.0  ;;  %v5696_v40 = vmul.f32 0.2, %v11152_v30  ;;  %v11153_v42 = vpop.f32.mrb[114].mxu1  ;;  %v10370_v44 = vpack.c.bf16 %v6203_v39, %v6203_v39  ;;  %11006 = vmatprep.mubr.msk.bf16.mxu0 %vm1964_vm0, %v11535_v37 }
 0x1da   : > { %v11536_v43 = vld [vmem:[%s11615_s21 + $0x780] sm:$0xff]   ;;  %8766 = vst.msk [vmem:[%s11846_s24 + $0x5bc] sm:$0xf] %vm8398_vm1, %v10372_v32  ;;  %v5952_v45 = vsel %vm4928_vm2, %v10896_v29, %v5440_v34  ;;  %vm4926_vm4 = vcmp.ge.f32.partialorder %v3215_v35, 0.0  ;;  %v5438_v46 = vmul.f32 0.2, %v3215_v35 }
 0x1db   : > { %v3218_v47 = vpop.f32.mrb[115].mxu0  ;;  %v4242_v48 = vpop.f32.mrb[115].mxu1  ;;  %8508 = vst.msk [vmem:[%s11846_s24 + $0x1b4] sm:$0xf] %vm8398_vm1, %v10114_v38  ;;  %v10119_v49 = vpack.c.bf16 %v5952_v45, %v5952_v45  ;;  %v6208_v50 = vsel %vm5184_vm3, %v11152_v30, %v5696_v40  ;;  %vm5182_vm5 = vcmp.ge.f32.partialorder %v4239_v36, 0.0  ;;  %vm4929_vm6 = vcmp.ge.f32.partialorder %v10897_v41, 0.0  ;;  %11262 = vmatprep.mubr.msk.bf16.mxu1 %vm1964_vm0, %v11536_v43 }
 0x1dc   : > { %v5694_v51 = vmul.f32 0.2, %v4239_v36  ;;  %8764 = vst.msk [vmem:[%s11846_s24 + $0x5b4] sm:$0xf] %vm8398_vm1, %v10370_v44  ;;  %v10375_v52 = vpack.c.bf16 %v6208_v50, %v6208_v50  ;;  %v5950_v53 = vsel %vm4926_vm4, %v3215_v35, %v5438_v46  ;;  %v5441_v54 = vmul.f32 0.2, %v10897_v41 }
 0x1dd   : > { %8513 = vst.msk [vmem:[%s11846_s24 + $0x1c8] sm:$0xf] %vm8398_vm1, %v10119_v49  ;;  %v10117_v55 = vpack.c.bf16 %v5950_v53, %v5950_v53  ;;  %vm5185_vm7 = vcmp.ge.f32.partialorder %v11153_v42, 0.0  ;;  %v5697_v57 = vmul.f32 0.2, %v11153_v42  ;;  %vm4927_vm8 = vcmp.ge.f32.partialorder %v3218_v47, 0.0 }
 0x1de   : > { %v6206_v56 = vsel %vm5182_vm5, %v4239_v36, %v5694_v51  ;;  %8769 = vst.msk [vmem:[%s11846_s24 + $0x5c8] sm:$0xf] %vm8398_vm1, %v10375_v52  ;;  %v5953_v59 = vsel %vm4929_vm6, %v10897_v41, %v5441_v54  ;;  %v5439_v60 = vmul.f32 0.2, %v3218_v47  ;;  %v11537_v61 = vld [vmem:[%s11615_s21 + $0x388] sm:$0xff]   ;;  %vm5183_vm9 = vcmp.ge.f32.partialorder %v4242_v48, 0.0 }
 0x1df   : > { %v10373_v58 = vpack.c.bf16 %v6206_v56, %v6206_v56  ;;  %8511 = vst.msk [vmem:[%s11846_s24 + $0x1c0] sm:$0xf] %vm8398_vm1, %v10117_v55  ;;  %v10120_v62 = vpack.c.bf16 %v5953_v59, %v5953_v59  ;;  %v6209_v63 = vsel %vm5185_vm7, %v11153_v42, %v5697_v57  ;;  %v5695_v0 = vmul.f32 0.2, %v4242_v48  ;;  %v10900_v1 = vpop.f32.mrb[116].mxu0  ;;  %v11156_v2 = vpop.f32.mrb[116].mxu1  ;;  %11007 = vmatmul.mubr.msk.bf16.gmra.mrb[224].mxu0 %vm1964_vm0, %v11537_v61 }
 0x1e0   : > { %v11538_v3 = vld [vmem:[%s11615_s21 + $0x788] sm:$0xff]   ;;  %v10376_v4 = vpack.c.bf16 %v6209_v63, %v6209_v63  ;;  %v5951_v5 = vsel %vm4927_vm8, %v3218_v47, %v5439_v60  ;;  %vm4932_vm10 = vcmp.ge.f32.partialorder %v10900_v1, 0.0  ;;  %v5444_v6 = vmul.f32 0.2, %v10900_v1  ;;  %v3231_v7 = vpop.f32.mrb[117].mxu0  ;;  %v4255_v8 = vpop.f32.mrb[117].mxu1 }
 0x1e1   : > { %8767 = vst.msk [vmem:[%s11846_s24 + $0x5c0] sm:$0xf] %vm8398_vm1, %v10373_v58  ;;  %v11539_v9 = vld [vmem:[%s11615_s21 + $0x390] sm:$0xff]   ;;  %8514 = vst.msk [vmem:[%s11846_s24 + $0x1cc] sm:$0xf] %vm8398_vm1, %v10120_v62  ;;  %v10118_v10 = vpack.c.bf16 %v5951_v5, %v5951_v5  ;;  %v6207_v11 = vsel %vm5183_vm9, %v4242_v48, %v5695_v0  ;;  %vm5188_vm11 = vcmp.ge.f32.partialorder %v11156_v2, 0.0  ;;  %11263 = vmatmul.mubr.msk.bf16.gmra.mrb[224].mxu1 %vm1964_vm0, %v11538_v3 }
 0x1e2   : > { %v5700_v12 = vmul.f32 0.2, %v11156_v2  ;;  %v10901_v13 = vpop.f32.mrb[118].mxu0  ;;  %v11157_v14 = vpop.f32.mrb[118].mxu1  ;;  %v11540_v15 = vld [vmem:[%s11615_s21 + $0x790] sm:$0xff]   ;;  %v10374_v16 = vpack.c.bf16 %v6207_v11, %v6207_v11  ;;  %v5956_v17 = vsel %vm4932_vm10, %v10900_v1, %v5444_v6  ;;  %vm4930_vm12 = vcmp.ge.f32.partialorder %v3231_v7, 0.0  ;;  %11010 = vmatprep.mubr.msk.bf16.mxu0 %vm1964_vm0, %v11539_v9 }
 0x1e3   : > { %8770 = vst.msk [vmem:[%s11846_s24 + $0x5cc] sm:$0xf] %vm8398_vm1, %v10376_v4  ;;  %v5442_v18 = vmul.f32 0.2, %v3231_v7  ;;  %v3234_v19 = vpop.f32.mrb[119].mxu0  ;;  %v4258_v20 = vpop.f32.mrb[119].mxu1  ;;  %v10123_v21 = vpack.c.bf16 %v5956_v17, %v5956_v17  ;;  %11266 = vmatprep.mubr.msk.bf16.mxu1 %vm1964_vm0, %v11540_v15 }
 0x1e4   : > { %8512 = vst.msk [vmem:[%s11846_s24 + $0x1c4] sm:$0xf] %vm8398_vm1, %v10118_v10  ;;  %v6212_v22 = vsel %vm5188_vm11, %v11156_v2, %v5700_v12  ;;  %vm5186_vm13 = vcmp.ge.f32.partialorder %v4255_v8, 0.0  ;;  %v5698_v23 = vmul.f32 0.2, %v4255_v8  ;;  %vm4933_vm14 = vcmp.ge.f32.partialorder %v10901_v13, 0.0 }
 0x1e5   : > { %8768 = vst.msk [vmem:[%s11846_s24 + $0x5c4] sm:$0xf] %vm8398_vm1, %v10374_v16  ;;  %v10379_v24 = vpack.c.bf16 %v6212_v22, %v6212_v22  ;;  %v5954_v25 = vsel %vm4930_vm12, %v3231_v7, %v5442_v18  ;;  %v5445_v26 = vmul.f32 0.2, %v10901_v13  ;;  %8517 = vst.msk [vmem:[%s11846_s24 + $0x1d8] sm:$0xf] %vm8398_vm1, %v10123_v21 }
 0x1e6   : > { %v10121_v27 = vpack.c.bf16 %v5954_v25, %v5954_v25  ;;  %v6210_v28 = vsel %vm5186_vm13, %v4255_v8, %v5698_v23  ;;  %vm5189_vm15 = vcmp.ge.f32.partialorder %v11157_v14, 0.0  ;;  %v5701_v29 = vmul.f32 0.2, %v11157_v14  ;;  %v11541_v33 = vld [vmem:[%s11615_s21 + $0x398] sm:$0xff]   ;;  %v10904_v37 = vpop.f32.mrb[120].mxu0  ;;  %v11160_v38 = vpop.f32.mrb[120].mxu1 }
 0x1e7   : > { %8773 = vst.msk [vmem:[%s11846_s24 + $0x5d8] sm:$0xf] %vm8398_vm1, %v10379_v24  ;;  %v10377_v30 = vpack.c.bf16 %v6210_v28, %v6210_v28  ;;  %v5957_v31 = vsel %vm4933_vm14, %v10901_v13, %v5445_v26  ;;  %vm4931_vm2 = vcmp.ge.f32.partialorder %v3234_v19, 0.0  ;;  %v5443_v32 = vmul.f32 0.2, %v3234_v19  ;;  %v11542_v39 = vld [vmem:[%s11615_s21 + $0x798] sm:$0xff]   ;;  %11011 = vmatmul.mubr.msk.bf16.gmra.mrb[228].mxu0 %vm1964_vm0, %v11541_v33 }
 0x1e8   : > { %8515 = vst.msk [vmem:[%s11846_s24 + $0x1d0] sm:$0xf] %vm8398_vm1, %v10121_v27  ;;  %v10124_v34 = vpack.c.bf16 %v5957_v31, %v5957_v31  ;;  %v6213_v35 = vsel %vm5189_vm15, %v11157_v14, %v5701_v29  ;;  %vm5187_vm3 = vcmp.ge.f32.partialorder %v4258_v20, 0.0  ;;  %v5699_v36 = vmul.f32 0.2, %v4258_v20  ;;  %v3247_v43 = vpop.f32.mrb[121].mxu0 }
 0x1e9   : > { %8771 = vst.msk [vmem:[%s11846_s24 + $0x5d0] sm:$0xf] %vm8398_vm1, %v10377_v30  ;;  %v10380_v40 = vpack.c.bf16 %v6213_v35, %v6213_v35  ;;  %v5955_v41 = vsel %vm4931_vm2, %v3234_v19, %v5443_v32  ;;  %vm4936_vm4 = vcmp.ge.f32.partialorder %v10904_v37, 0.0  ;;  %v5448_v42 = vmul.f32 0.2, %v10904_v37  ;;  %v4271_v44 = vpop.f32.mrb[121].mxu1  ;;  %11267 = vmatmul.mubr.msk.bf16.gmra.mrb[228].mxu1 %vm1964_vm0, %v11542_v39 }
 0x1ea   : > { %v11543_v45 = vld [vmem:[%s11615_s21 + $0x3a0] sm:$0xff]   ;;  %8518 = vst.msk [vmem:[%s11846_s24 + $0x1dc] sm:$0xf] %vm8398_vm1, %v10124_v34  ;;  %v10122_v46 = vpack.c.bf16 %v5955_v41, %v5955_v41  ;;  %v6211_v47 = vsel %vm5187_vm3, %v4258_v20, %v5699_v36  ;;  %vm5192_vm5 = vcmp.ge.f32.partialorder %v11160_v38, 0.0  ;;  %v5704_v48 = vmul.f32 0.2, %v11160_v38 }
 0x1eb   : > { %v10905_v49 = vpop.f32.mrb[122].mxu0  ;;  %v11161_v50 = vpop.f32.mrb[122].mxu1  ;;  %v11544_v51 = vld [vmem:[%s11615_s21 + $0x7a0] sm:$0xff]   ;;  %8774 = vst.msk [vmem:[%s11846_s24 + $0x5dc] sm:$0xf] %vm8398_vm1, %v10380_v40  ;;  %v10378_v52 = vpack.c.bf16 %v6211_v47, %v6211_v47  ;;  %v5960_v53 = vsel %vm4936_vm4, %v10904_v37, %v5448_v42  ;;  %vm4934_vm6 = vcmp.ge.f32.partialorder %v3247_v43, 0.0  ;;  %11014 = vmatprep.mubr.msk.bf16.mxu0 %vm1964_vm0, %v11543_v45 }
 0x1ec   : > { %v5446_v54 = vmul.f32 0.2, %v3247_v43  ;;  %v3250_v55 = vpop.f32.mrb[123].mxu0  ;;  %v4274_v56 = vpop.f32.mrb[123].mxu1  ;;  %8516 = vst.msk [vmem:[%s11846_s24 + $0x1d4] sm:$0xf] %vm8398_vm1, %v10122_v46  ;;  %v10127_v57 = vpack.c.bf16 %v5960_v53, %v5960_v53  ;;  %v6216_v58 = vsel %vm5192_vm5, %v11160_v38, %v5704_v48  ;;  %11270 = vmatprep.mubr.msk.bf16.mxu1 %vm1964_vm0, %v11544_v51 }
 0x1ed   : > { %vm5190_vm7 = vcmp.ge.f32.partialorder %v4271_v44, 0.0  ;;  %v5702_v59 = vmul.f32 0.2, %v4271_v44  ;;  %8772 = vst.msk [vmem:[%s11846_s24 + $0x5d4] sm:$0xf] %vm8398_vm1, %v10378_v52  ;;  %v10383_v60 = vpack.c.bf16 %v6216_v58, %v6216_v58  ;;  %vm4937_vm8 = vcmp.ge.f32.partialorder %v10905_v49, 0.0 }
 0x1ee   : > { %v5958_v61 = vsel %vm4934_vm6, %v3247_v43, %v5446_v54  ;;  %v5449_v62 = vmul.f32 0.2, %v10905_v49  ;;  %8521 = vst.msk [vmem:[%s11846_s24 + $0x1e8] sm:$0xf] %vm8398_vm1, %v10127_v57  ;;  %vm5193_vm9 = vcmp.ge.f32.partialorder %v11161_v50, 0.0  ;;  %vm4935_vm10 = vcmp.ge.f32.partialorder %v3250_v55, 0.0 }
 0x1ef   : > { %v10125_v63 = vpack.c.bf16 %v5958_v61, %v5958_v61  ;;  %v6214_v0 = vsel %vm5190_vm7, %v4271_v44, %v5702_v59  ;;  %v5705_v1 = vmul.f32 0.2, %v11161_v50  ;;  %8777 = vst.msk [vmem:[%s11846_s24 + $0x5e8] sm:$0xf] %vm8398_vm1, %v10383_v60  ;;  %v5447_v4 = vmul.f32 0.2, %v3250_v55 }
 0x1f0   : > { %v10381_v2 = vpack.c.bf16 %v6214_v0, %v6214_v0  ;;  %v5961_v3 = vsel %vm4937_vm8, %v10905_v49, %v5449_v62  ;;  %v11545_v5 = vld [vmem:[%s11615_s21 + $0x3a8] sm:$0xff]   ;;  %vm5191_vm11 = vcmp.ge.f32.partialorder %v4274_v56, 0.0  ;;  %v5703_v8 = vmul.f32 0.2, %v4274_v56  ;;  %v10908_v9 = vpop.f32.mrb[124].mxu0  ;;  %v11164_v10 = vpop.f32.mrb[124].mxu1 }
 0x1f1   : > { %8519 = vst.msk [vmem:[%s11846_s24 + $0x1e0] sm:$0xf] %vm8398_vm1, %v10125_v63  ;;  %v10128_v6 = vpack.c.bf16 %v5961_v3, %v5961_v3  ;;  %v6217_v7 = vsel %vm5193_vm9, %v11161_v50, %v5705_v1  ;;  %v11546_v11 = vld [vmem:[%s11615_s21 + $0x7a8] sm:$0xff]   ;;  %v5959_v13 = vsel %vm4935_vm10, %v3250_v55, %v5447_v4  ;;  %vm4940_vm12 = vcmp.ge.f32.partialorder %v10908_v9, 0.0  ;;  %v3263_v15 = vpop.f32.mrb[125].mxu0  ;;  %v4287_v16 = vpop.f32.mrb[125].mxu1  ;;  %11015 = vmatmul.mubr.msk.bf16.gmra.mrb[232].mxu0 %vm1964_vm0, %v11545_v5 }
 0x1f2   : > { %8775 = vst.msk [vmem:[%s11846_s24 + $0x5e0] sm:$0xf] %vm8398_vm1, %v10381_v2  ;;  %v10384_v12 = vpack.c.bf16 %v6217_v7, %v6217_v7  ;;  %v5452_v14 = vmul.f32 0.2, %v10908_v9  ;;  %v11547_v17 = vld [vmem:[%s11615_s21 + $0x3b0] sm:$0xff]   ;;  %v10126_v18 = vpack.c.bf16 %v5959_v13, %v5959_v13  ;;  %v6215_v19 = vsel %vm5191_vm11, %v4274_v56, %v5703_v8  ;;  %v10909_v21 = vpop.f32.mrb[126].mxu0  ;;  %11271 = vmatmul.mubr.msk.bf16.gmra.mrb[232].mxu1 %vm1964_vm0, %v11546_v11 }
 0x1f3   : > { %8522 = vst.msk [vmem:[%s11846_s24 + $0x1ec] sm:$0xf] %vm8398_vm1, %v10128_v6  ;;  %vm5196_vm13 = vcmp.ge.f32.partialorder %v11164_v10, 0.0  ;;  %v5708_v20 = vmul.f32 0.2, %v11164_v10  ;;  %v11165_v22 = vpop.f32.mrb[126].mxu1  ;;  %v10382_v24 = vpack.c.bf16 %v6215_v19, %v6215_v19  ;;  %11018 = vmatprep.mubr.msk.bf16.mxu0 %vm1964_vm0, %v11547_v17 }
 0x1f4   : > { %v11548_v23 = vld [vmem:[%s11615_s21 + $0x7b0] sm:$0xff]   ;;  %8778 = vst.msk [vmem:[%s11846_s24 + $0x5ec] sm:$0xf] %vm8398_vm1, %v10384_v12  ;;  %v5964_v25 = vsel %vm4940_vm12, %v10908_v9, %v5452_v14  ;;  %vm4938_vm14 = vcmp.ge.f32.partialorder %v3263_v15, 0.0  ;;  %v5450_v26 = vmul.f32 0.2, %v3263_v15 }
 0x1f5   : > { %v3266_v27 = vpop.f32.mrb[127].mxu0  ;;  %v4290_v28 = vpop.f32.mrb[127].mxu1  ;;  %8520 = vst.msk [vmem:[%s11846_s24 + $0x1e4] sm:$0xf] %vm8398_vm1, %v10126_v18  ;;  %v10131_v29 = vpack.c.bf16 %v5964_v25, %v5964_v25  ;;  %v6220_v30 = vsel %vm5196_vm13, %v11164_v10, %v5708_v20  ;;  %vm5194_vm15 = vcmp.ge.f32.partialorder %v4287_v16, 0.0  ;;  %vm4941_vm2 = vcmp.ge.f32.partialorder %v10909_v21, 0.0  ;;  %11274 = vmatprep.mubr.msk.bf16.mxu1 %vm1964_vm0, %v11548_v23 }
 0x1f6   : > { %v5706_v31 = vmul.f32 0.2, %v4287_v16  ;;  %8776 = vst.msk [vmem:[%s11846_s24 + $0x5e4] sm:$0xf] %vm8398_vm1, %v10382_v24  ;;  %v10387_v32 = vpack.c.bf16 %v6220_v30, %v6220_v30  ;;  %v5962_v33 = vsel %vm4938_vm14, %v3263_v15, %v5450_v26  ;;  %v5453_v34 = vmul.f32 0.2, %v10909_v21 }
 0x1f7   : > { %8525 = vst.msk [vmem:[%s11846_s24 + $0x1f8] sm:$0xf] %vm8398_vm1, %v10131_v29  ;;  %v10129_v35 = vpack.c.bf16 %v5962_v33, %v5962_v33  ;;  %vm5197_vm3 = vcmp.ge.f32.partialorder %v11165_v22, 0.0  ;;  %v5709_v37 = vmul.f32 0.2, %v11165_v22  ;;  %vm4939_vm4 = vcmp.ge.f32.partialorder %v3266_v27, 0.0 }
 0x1f8   : > { %v6218_v36 = vsel %vm5194_vm15, %v4287_v16, %v5706_v31  ;;  %8781 = vst.msk [vmem:[%s11846_s24 + $0x5f8] sm:$0xf] %vm8398_vm1, %v10387_v32  ;;  %v5965_v39 = vsel %vm4941_vm2, %v10909_v21, %v5453_v34  ;;  %v5451_v40 = vmul.f32 0.2, %v3266_v27  ;;  %v11549_v41 = vld [vmem:[%s11615_s21 + $0x3b8] sm:$0xff]   ;;  %vm5195_vm5 = vcmp.ge.f32.partialorder %v4290_v28, 0.0 }
 0x1f9   : > { %v10385_v38 = vpack.c.bf16 %v6218_v36, %v6218_v36  ;;  %8523 = vst.msk [vmem:[%s11846_s24 + $0x1f0] sm:$0xf] %vm8398_vm1, %v10129_v35  ;;  %v10132_v42 = vpack.c.bf16 %v5965_v39, %v5965_v39  ;;  %v6221_v43 = vsel %vm5197_vm3, %v11165_v22, %v5709_v37  ;;  %v5707_v44 = vmul.f32 0.2, %v4290_v28  ;;  %v10912_v45 = vpop.f32.mrb[128].mxu0  ;;  %v11168_v46 = vpop.f32.mrb[128].mxu1  ;;  %11019 = vmatmul.mubr.msk.bf16.gmra.mrb[236].mxu0 %vm1964_vm0, %v11549_v41 }
 0x1fa   : > { %v11550_v47 = vld [vmem:[%s11615_s21 + $0x7b8] sm:$0xff]   ;;  %v10388_v48 = vpack.c.bf16 %v6221_v43, %v6221_v43  ;;  %v5963_v49 = vsel %vm4939_vm4, %v3266_v27, %v5451_v40  ;;  %vm4944_vm6 = vcmp.ge.f32.partialorder %v10912_v45, 0.0  ;;  %v5456_v50 = vmul.f32 0.2, %v10912_v45  ;;  %v3279_v51 = vpop.f32.mrb[129].mxu0  ;;  %v4303_v52 = vpop.f32.mrb[129].mxu1 }
 0x1fb   : > { %8779 = vst.msk [vmem:[%s11846_s24 + $0x5f0] sm:$0xf] %vm8398_vm1, %v10385_v38  ;;  %v11551_v53 = vld [vmem:[%s11615_s21 + $0x3c0] sm:$0xff]   ;;  %8526 = vst.msk [vmem:[%s11846_s24 + $0x1fc] sm:$0xf] %vm8398_vm1, %v10132_v42  ;;  %v10130_v54 = vpack.c.bf16 %v5963_v49, %v5963_v49  ;;  %v6219_v55 = vsel %vm5195_vm5, %v4290_v28, %v5707_v44  ;;  %vm5200_vm7 = vcmp.ge.f32.partialorder %v11168_v46, 0.0  ;;  %11275 = vmatmul.mubr.msk.bf16.gmra.mrb[236].mxu1 %vm1964_vm0, %v11550_v47 }
 0x1fc   : > { %v5712_v56 = vmul.f32 0.2, %v11168_v46  ;;  %v10913_v57 = vpop.f32.mrb[130].mxu0  ;;  %v11169_v58 = vpop.f32.mrb[130].mxu1  ;;  %v11552_v59 = vld [vmem:[%s11615_s21 + $0x7c0] sm:$0xff]   ;;  %v10386_v60 = vpack.c.bf16 %v6219_v55, %v6219_v55  ;;  %v5968_v61 = vsel %vm4944_vm6, %v10912_v45, %v5456_v50  ;;  %vm4942_vm8 = vcmp.ge.f32.partialorder %v3279_v51, 0.0  ;;  %11022 = vmatprep.mubr.msk.bf16.mxu0 %vm1964_vm0, %v11551_v53 }
 0x1fd   : > { %8782 = vst.msk [vmem:[%s11846_s24 + $0x5fc] sm:$0xf] %vm8398_vm1, %v10388_v48  ;;  %v5454_v62 = vmul.f32 0.2, %v3279_v51  ;;  %v3282_v63 = vpop.f32.mrb[131].mxu0  ;;  %v4306_v0 = vpop.f32.mrb[131].mxu1  ;;  %v10135_v1 = vpack.c.bf16 %v5968_v61, %v5968_v61  ;;  %11278 = vmatprep.mubr.msk.bf16.mxu1 %vm1964_vm0, %v11552_v59 }
 0x1fe   : > { %8524 = vst.msk [vmem:[%s11846_s24 + $0x1f4] sm:$0xf] %vm8398_vm1, %v10130_v54  ;;  %v6224_v2 = vsel %vm5200_vm7, %v11168_v46, %v5712_v56  ;;  %vm5198_vm9 = vcmp.ge.f32.partialorder %v4303_v52, 0.0  ;;  %v5710_v3 = vmul.f32 0.2, %v4303_v52  ;;  %vm4945_vm10 = vcmp.ge.f32.partialorder %v10913_v57, 0.0 }
 0x1ff   : > { %8780 = vst.msk [vmem:[%s11846_s24 + $0x5f4] sm:$0xf] %vm8398_vm1, %v10386_v60  ;;  %v10391_v4 = vpack.c.bf16 %v6224_v2, %v6224_v2  ;;  %v5966_v5 = vsel %vm4942_vm8, %v3279_v51, %v5454_v62  ;;  %v5457_v6 = vmul.f32 0.2, %v10913_v57  ;;  %8529 = vst.msk [vmem:[%s11846_s24 + $0x208] sm:$0xf] %vm8398_vm1, %v10135_v1 }
 0x200   : > { %v10133_v7 = vpack.c.bf16 %v5966_v5, %v5966_v5  ;;  %v6222_v8 = vsel %vm5198_vm9, %v4303_v52, %v5710_v3  ;;  %vm5201_vm11 = vcmp.ge.f32.partialorder %v11169_v58, 0.0  ;;  %v5713_v9 = vmul.f32 0.2, %v11169_v58  ;;  %v11553_v13 = vld [vmem:[%s11615_s21 + $0x3c8] sm:$0xff]   ;;  %v10916_v17 = vpop.f32.mrb[132].mxu0  ;;  %v11172_v18 = vpop.f32.mrb[132].mxu1 }
 0x201   : > { %8785 = vst.msk [vmem:[%s11846_s24 + $0x608] sm:$0xf] %vm8398_vm1, %v10391_v4  ;;  %v10389_v10 = vpack.c.bf16 %v6222_v8, %v6222_v8  ;;  %v5969_v11 = vsel %vm4945_vm10, %v10913_v57, %v5457_v6  ;;  %vm4943_vm12 = vcmp.ge.f32.partialorder %v3282_v63, 0.0  ;;  %v5455_v12 = vmul.f32 0.2, %v3282_v63  ;;  %v11554_v19 = vld [vmem:[%s11615_s21 + $0x7c8] sm:$0xff]   ;;  %11023 = vmatmul.mubr.msk.bf16.gmra.mrb[240].mxu0 %vm1964_vm0, %v11553_v13 }
 0x202   : > { %8527 = vst.msk [vmem:[%s11846_s24 + $0x200] sm:$0xf] %vm8398_vm1, %v10133_v7  ;;  %v10136_v14 = vpack.c.bf16 %v5969_v11, %v5969_v11  ;;  %v6225_v15 = vsel %vm5201_vm11, %v11169_v58, %v5713_v9  ;;  %vm5199_vm13 = vcmp.ge.f32.partialorder %v4306_v0, 0.0  ;;  %v5711_v16 = vmul.f32 0.2, %v4306_v0  ;;  %v3295_v23 = vpop.f32.mrb[133].mxu0 }
 0x203   : > { %8783 = vst.msk [vmem:[%s11846_s24 + $0x600] sm:$0xf] %vm8398_vm1, %v10389_v10  ;;  %v10392_v20 = vpack.c.bf16 %v6225_v15, %v6225_v15  ;;  %v5967_v21 = vsel %vm4943_vm12, %v3282_v63, %v5455_v12  ;;  %vm4948_vm14 = vcmp.ge.f32.partialorder %v10916_v17, 0.0  ;;  %v5460_v22 = vmul.f32 0.2, %v10916_v17  ;;  %v4319_v24 = vpop.f32.mrb[133].mxu1  ;;  %11279 = vmatmul.mubr.msk.bf16.gmra.mrb[240].mxu1 %vm1964_vm0, %v11554_v19 }
 0x204   : > { %v11555_v25 = vld [vmem:[%s11615_s21 + $0x3d0] sm:$0xff]   ;;  %8530 = vst.msk [vmem:[%s11846_s24 + $0x20c] sm:$0xf] %vm8398_vm1, %v10136_v14  ;;  %v10134_v26 = vpack.c.bf16 %v5967_v21, %v5967_v21  ;;  %v6223_v27 = vsel %vm5199_vm13, %v4306_v0, %v5711_v16  ;;  %vm5204_vm15 = vcmp.ge.f32.partialorder %v11172_v18, 0.0  ;;  %v5716_v28 = vmul.f32 0.2, %v11172_v18 }
 0x205   : > { %v10917_v29 = vpop.f32.mrb[134].mxu0  ;;  %v11173_v30 = vpop.f32.mrb[134].mxu1  ;;  %v11556_v31 = vld [vmem:[%s11615_s21 + $0x7d0] sm:$0xff]   ;;  %8786 = vst.msk [vmem:[%s11846_s24 + $0x60c] sm:$0xf] %vm8398_vm1, %v10392_v20  ;;  %v10390_v32 = vpack.c.bf16 %v6223_v27, %v6223_v27  ;;  %v5972_v33 = vsel %vm4948_vm14, %v10916_v17, %v5460_v22  ;;  %vm4946_vm2 = vcmp.ge.f32.partialorder %v3295_v23, 0.0  ;;  %11026 = vmatprep.mubr.msk.bf16.mxu0 %vm1964_vm0, %v11555_v25 }
 0x206   : > { %v5458_v34 = vmul.f32 0.2, %v3295_v23  ;;  %v3298_v35 = vpop.f32.mrb[135].mxu0  ;;  %v4322_v36 = vpop.f32.mrb[135].mxu1  ;;  %8528 = vst.msk [vmem:[%s11846_s24 + $0x204] sm:$0xf] %vm8398_vm1, %v10134_v26  ;;  %v10139_v37 = vpack.c.bf16 %v5972_v33, %v5972_v33  ;;  %v6228_v38 = vsel %vm5204_vm15, %v11172_v18, %v5716_v28  ;;  %11282 = vmatprep.mubr.msk.bf16.mxu1 %vm1964_vm0, %v11556_v31 }
 0x207   : > { %vm5202_vm3 = vcmp.ge.f32.partialorder %v4319_v24, 0.0  ;;  %v5714_v39 = vmul.f32 0.2, %v4319_v24  ;;  %8784 = vst.msk [vmem:[%s11846_s24 + $0x604] sm:$0xf] %vm8398_vm1, %v10390_v32  ;;  %v10395_v40 = vpack.c.bf16 %v6228_v38, %v6228_v38  ;;  %vm4949_vm4 = vcmp.ge.f32.partialorder %v10917_v29, 0.0 }
 0x208   : > { %v5970_v41 = vsel %vm4946_vm2, %v3295_v23, %v5458_v34  ;;  %v5461_v42 = vmul.f32 0.2, %v10917_v29  ;;  %8533 = vst.msk [vmem:[%s11846_s24 + $0x218] sm:$0xf] %vm8398_vm1, %v10139_v37  ;;  %vm5205_vm5 = vcmp.ge.f32.partialorder %v11173_v30, 0.0  ;;  %vm4947_vm6 = vcmp.ge.f32.partialorder %v3298_v35, 0.0 }
 0x209   : > { %v10137_v43 = vpack.c.bf16 %v5970_v41, %v5970_v41  ;;  %v6226_v44 = vsel %vm5202_vm3, %v4319_v24, %v5714_v39  ;;  %v5717_v45 = vmul.f32 0.2, %v11173_v30  ;;  %8789 = vst.msk [vmem:[%s11846_s24 + $0x618] sm:$0xf] %vm8398_vm1, %v10395_v40  ;;  %v5459_v48 = vmul.f32 0.2, %v3298_v35 }
 0x20a   : > { %v10393_v46 = vpack.c.bf16 %v6226_v44, %v6226_v44  ;;  %v5973_v47 = vsel %vm4949_vm4, %v10917_v29, %v5461_v42  ;;  %v11557_v49 = vld [vmem:[%s11615_s21 + $0x3d8] sm:$0xff]   ;;  %vm5203_vm7 = vcmp.ge.f32.partialorder %v4322_v36, 0.0  ;;  %v5715_v52 = vmul.f32 0.2, %v4322_v36  ;;  %v10920_v53 = vpop.f32.mrb[136].mxu0  ;;  %v11176_v54 = vpop.f32.mrb[136].mxu1 }
 0x20b   : > { %8531 = vst.msk [vmem:[%s11846_s24 + $0x210] sm:$0xf] %vm8398_vm1, %v10137_v43  ;;  %v10140_v50 = vpack.c.bf16 %v5973_v47, %v5973_v47  ;;  %v6229_v51 = vsel %vm5205_vm5, %v11173_v30, %v5717_v45  ;;  %v11558_v55 = vld [vmem:[%s11615_s21 + $0x7d8] sm:$0xff]   ;;  %v5971_v57 = vsel %vm4947_vm6, %v3298_v35, %v5459_v48  ;;  %vm4952_vm8 = vcmp.ge.f32.partialorder %v10920_v53, 0.0  ;;  %v3311_v59 = vpop.f32.mrb[137].mxu0  ;;  %v4335_v60 = vpop.f32.mrb[137].mxu1  ;;  %11027 = vmatmul.mubr.msk.bf16.gmra.mrb[244].mxu0 %vm1964_vm0, %v11557_v49 }
 0x20c   : > { %8787 = vst.msk [vmem:[%s11846_s24 + $0x610] sm:$0xf] %vm8398_vm1, %v10393_v46  ;;  %v10396_v56 = vpack.c.bf16 %v6229_v51, %v6229_v51  ;;  %v5464_v58 = vmul.f32 0.2, %v10920_v53  ;;  %v11559_v61 = vld [vmem:[%s11615_s21 + $0x3e0] sm:$0xff]   ;;  %v10138_v62 = vpack.c.bf16 %v5971_v57, %v5971_v57  ;;  %v6227_v63 = vsel %vm5203_vm7, %v4322_v36, %v5715_v52  ;;  %v10921_v1 = vpop.f32.mrb[138].mxu0  ;;  %11283 = vmatmul.mubr.msk.bf16.gmra.mrb[244].mxu1 %vm1964_vm0, %v11558_v55 }
 0x20d   : > { %8534 = vst.msk [vmem:[%s11846_s24 + $0x21c] sm:$0xf] %vm8398_vm1, %v10140_v50  ;;  %vm5208_vm9 = vcmp.ge.f32.partialorder %v11176_v54, 0.0  ;;  %v5720_v0 = vmul.f32 0.2, %v11176_v54  ;;  %v11177_v2 = vpop.f32.mrb[138].mxu1  ;;  %v10394_v4 = vpack.c.bf16 %v6227_v63, %v6227_v63  ;;  %11030 = vmatprep.mubr.msk.bf16.mxu0 %vm1964_vm0, %v11559_v61 }
 0x20e   : > { %v11560_v3 = vld [vmem:[%s11615_s21 + $0x7e0] sm:$0xff]   ;;  %8790 = vst.msk [vmem:[%s11846_s24 + $0x61c] sm:$0xf] %vm8398_vm1, %v10396_v56  ;;  %v5976_v5 = vsel %vm4952_vm8, %v10920_v53, %v5464_v58  ;;  %vm4950_vm10 = vcmp.ge.f32.partialorder %v3311_v59, 0.0  ;;  %v5462_v6 = vmul.f32 0.2, %v3311_v59 }
 0x20f   : > { %v3314_v7 = vpop.f32.mrb[139].mxu0  ;;  %v4338_v8 = vpop.f32.mrb[139].mxu1  ;;  %8532 = vst.msk [vmem:[%s11846_s24 + $0x214] sm:$0xf] %vm8398_vm1, %v10138_v62  ;;  %v10143_v9 = vpack.c.bf16 %v5976_v5, %v5976_v5  ;;  %v6232_v10 = vsel %vm5208_vm9, %v11176_v54, %v5720_v0  ;;  %vm5206_vm11 = vcmp.ge.f32.partialorder %v4335_v60, 0.0  ;;  %vm4953_vm12 = vcmp.ge.f32.partialorder %v10921_v1, 0.0  ;;  %11286 = vmatprep.mubr.msk.bf16.mxu1 %vm1964_vm0, %v11560_v3 }
 0x210   : > { %v5718_v11 = vmul.f32 0.2, %v4335_v60  ;;  %8788 = vst.msk [vmem:[%s11846_s24 + $0x614] sm:$0xf] %vm8398_vm1, %v10394_v4  ;;  %v10399_v12 = vpack.c.bf16 %v6232_v10, %v6232_v10  ;;  %v5974_v13 = vsel %vm4950_vm10, %v3311_v59, %v5462_v6  ;;  %v5465_v14 = vmul.f32 0.2, %v10921_v1 }
 0x211   : > { %8537 = vst.msk [vmem:[%s11846_s24 + $0x228] sm:$0xf] %vm8398_vm1, %v10143_v9  ;;  %v10141_v15 = vpack.c.bf16 %v5974_v13, %v5974_v13  ;;  %vm5209_vm13 = vcmp.ge.f32.partialorder %v11177_v2, 0.0  ;;  %v5721_v17 = vmul.f32 0.2, %v11177_v2  ;;  %vm4951_vm14 = vcmp.ge.f32.partialorder %v3314_v7, 0.0 }
 0x212   : > { %v6230_v16 = vsel %vm5206_vm11, %v4335_v60, %v5718_v11  ;;  %8793 = vst.msk [vmem:[%s11846_s24 + $0x628] sm:$0xf] %vm8398_vm1, %v10399_v12  ;;  %v5977_v19 = vsel %vm4953_vm12, %v10921_v1, %v5465_v14  ;;  %v5463_v20 = vmul.f32 0.2, %v3314_v7  ;;  %v11561_v21 = vld [vmem:[%s11615_s21 + $0x3e8] sm:$0xff]   ;;  %vm5207_vm15 = vcmp.ge.f32.partialorder %v4338_v8, 0.0 }
 0x213   : > { %v10397_v18 = vpack.c.bf16 %v6230_v16, %v6230_v16  ;;  %8535 = vst.msk [vmem:[%s11846_s24 + $0x220] sm:$0xf] %vm8398_vm1, %v10141_v15  ;;  %v10144_v22 = vpack.c.bf16 %v5977_v19, %v5977_v19  ;;  %v6233_v23 = vsel %vm5209_vm13, %v11177_v2, %v5721_v17  ;;  %v5719_v24 = vmul.f32 0.2, %v4338_v8  ;;  %v10924_v25 = vpop.f32.mrb[140].mxu0  ;;  %v11180_v26 = vpop.f32.mrb[140].mxu1  ;;  %11031 = vmatmul.mubr.msk.bf16.gmra.mrb[248].mxu0 %vm1964_vm0, %v11561_v21 }
 0x214   : > { %v11562_v27 = vld [vmem:[%s11615_s21 + $0x7e8] sm:$0xff]   ;;  %v10400_v28 = vpack.c.bf16 %v6233_v23, %v6233_v23  ;;  %v5975_v29 = vsel %vm4951_vm14, %v3314_v7, %v5463_v20  ;;  %vm4956_vm2 = vcmp.ge.f32.partialorder %v10924_v25, 0.0  ;;  %v5468_v30 = vmul.f32 0.2, %v10924_v25  ;;  %v3327_v31 = vpop.f32.mrb[141].mxu0  ;;  %v4351_v32 = vpop.f32.mrb[141].mxu1 }
 0x215   : > { %8791 = vst.msk [vmem:[%s11846_s24 + $0x620] sm:$0xf] %vm8398_vm1, %v10397_v18  ;;  %v11563_v33 = vld [vmem:[%s11615_s21 + $0x3f0] sm:$0xff]   ;;  %8538 = vst.msk [vmem:[%s11846_s24 + $0x22c] sm:$0xf] %vm8398_vm1, %v10144_v22  ;;  %v10142_v34 = vpack.c.bf16 %v5975_v29, %v5975_v29  ;;  %v6231_v35 = vsel %vm5207_vm15, %v4338_v8, %v5719_v24  ;;  %vm5212_vm3 = vcmp.ge.f32.partialorder %v11180_v26, 0.0  ;;  %11287 = vmatmul.mubr.msk.bf16.gmra.mrb[248].mxu1 %vm1964_vm0, %v11562_v27 }
 0x216   : > { %v5724_v36 = vmul.f32 0.2, %v11180_v26  ;;  %v10925_v37 = vpop.f32.mrb[142].mxu0  ;;  %v11181_v38 = vpop.f32.mrb[142].mxu1  ;;  %v11564_v39 = vld [vmem:[%s11615_s21 + $0x7f0] sm:$0xff]   ;;  %v10398_v40 = vpack.c.bf16 %v6231_v35, %v6231_v35  ;;  %v5980_v41 = vsel %vm4956_vm2, %v10924_v25, %v5468_v30  ;;  %vm4954_vm4 = vcmp.ge.f32.partialorder %v3327_v31, 0.0  ;;  %11034 = vmatprep.mubr.msk.bf16.mxu0 %vm1964_vm0, %v11563_v33 }
 0x217   : > { %8794 = vst.msk [vmem:[%s11846_s24 + $0x62c] sm:$0xf] %vm8398_vm1, %v10400_v28  ;;  %v5466_v42 = vmul.f32 0.2, %v3327_v31  ;;  %v3330_v43 = vpop.f32.mrb[143].mxu0  ;;  %v4354_v44 = vpop.f32.mrb[143].mxu1  ;;  %v10147_v45 = vpack.c.bf16 %v5980_v41, %v5980_v41  ;;  %11290 = vmatprep.mubr.msk.bf16.mxu1 %vm1964_vm0, %v11564_v39 }
 0x218   : > { %8536 = vst.msk [vmem:[%s11846_s24 + $0x224] sm:$0xf] %vm8398_vm1, %v10142_v34  ;;  %v6236_v46 = vsel %vm5212_vm3, %v11180_v26, %v5724_v36  ;;  %vm5210_vm5 = vcmp.ge.f32.partialorder %v4351_v32, 0.0  ;;  %v5722_v47 = vmul.f32 0.2, %v4351_v32  ;;  %vm4957_vm6 = vcmp.ge.f32.partialorder %v10925_v37, 0.0 }
 0x219   : > { %8792 = vst.msk [vmem:[%s11846_s24 + $0x624] sm:$0xf] %vm8398_vm1, %v10398_v40  ;;  %v10403_v48 = vpack.c.bf16 %v6236_v46, %v6236_v46  ;;  %v5978_v49 = vsel %vm4954_vm4, %v3327_v31, %v5466_v42  ;;  %v5469_v50 = vmul.f32 0.2, %v10925_v37  ;;  %8541 = vst.msk [vmem:[%s11846_s24 + $0x238] sm:$0xf] %vm8398_vm1, %v10147_v45 }
 0x21a   : > { %v10145_v51 = vpack.c.bf16 %v5978_v49, %v5978_v49  ;;  %v6234_v52 = vsel %vm5210_vm5, %v4351_v32, %v5722_v47  ;;  %vm5213_vm7 = vcmp.ge.f32.partialorder %v11181_v38, 0.0  ;;  %v5725_v53 = vmul.f32 0.2, %v11181_v38  ;;  %v10928_v60 = vpop.f32.mrb[144].mxu0  ;;  %v11184_v61 = vpop.f32.mrb[144].mxu1  ;;  %v11565_v62 = vld [vmem:[%s11615_s21 + $0x3f8] sm:$0xff]  }
 0x21b   : > { %8797 = vst.msk [vmem:[%s11846_s24 + $0x638] sm:$0xf] %vm8398_vm1, %v10403_v48  ;;  %v10401_v54 = vpack.c.bf16 %v6234_v52, %v6234_v52  ;;  %v5981_v55 = vsel %vm4957_vm6, %v10925_v37, %v5469_v50  ;;  %vm4955_vm8 = vcmp.ge.f32.partialorder %v3330_v43, 0.0  ;;  %v5467_v56 = vmul.f32 0.2, %v3330_v43  ;;  %v3343_v2 = vpop.f32.mrb[145].mxu0  ;;  %11035 = vmatmul.mubr.msk.bf16.gmra.mrb[252].mxu0 %vm1964_vm0, %v11565_v62 }
 0x21c   : > { %8539 = vst.msk [vmem:[%s11846_s24 + $0x230] sm:$0xf] %vm8398_vm1, %v10145_v51  ;;  %v10148_v57 = vpack.c.bf16 %v5981_v55, %v5981_v55  ;;  %v6237_v58 = vsel %vm5213_vm7, %v11181_v38, %v5725_v53  ;;  %vm5211_vm9 = vcmp.ge.f32.partialorder %v4354_v44, 0.0  ;;  %v5723_v59 = vmul.f32 0.2, %v4354_v44  ;;  %v4367_v3 = vpop.f32.mrb[145].mxu1 }
 0x21d   : > { %8795 = vst.msk [vmem:[%s11846_s24 + $0x630] sm:$0xf] %vm8398_vm1, %v10401_v54  ;;  %v10404_v63 = vpack.c.bf16 %v6237_v58, %v6237_v58  ;;  %v5979_v0 = vsel %vm4955_vm8, %v3330_v43, %v5467_v56  ;;  %vm4960_vm10 = vcmp.ge.f32.partialorder %v10928_v60, 0.0  ;;  %v5472_v1 = vmul.f32 0.2, %v10928_v60  ;;  %v11566_v4 = vld [vmem:[%s11615_s21 + $0x7f8] sm:$0xff]  }
 0x21e   : > { %8542 = vst.msk [vmem:[%s11846_s24 + $0x23c] sm:$0xf] %vm8398_vm1, %v10148_v57  ;;  %v10146_v5 = vpack.c.bf16 %v5979_v0, %v5979_v0  ;;  %v6235_v6 = vsel %vm5211_vm9, %v4354_v44, %v5723_v59  ;;  %vm5216_vm11 = vcmp.ge.f32.partialorder %v11184_v61, 0.0  ;;  %v5728_v7 = vmul.f32 0.2, %v11184_v61  ;;  %v10929_v8 = vpop.f32.mrb[146].mxu0  ;;  %11291 = vmatmul.mubr.msk.bf16.gmra.mrb[252].mxu1 %vm1964_vm0, %v11566_v4 }
 0x21f   : > { %v11185_v9 = vpop.f32.mrb[146].mxu1  ;;  %8798 = vst.msk [vmem:[%s11846_s24 + $0x63c] sm:$0xf] %vm8398_vm1, %v10404_v63  ;;  %v10402_v10 = vpack.c.bf16 %v6235_v6, %v6235_v6  ;;  %v5984_v11 = vsel %vm4960_vm10, %v10928_v60, %v5472_v1  ;;  %vm4958_vm12 = vcmp.ge.f32.partialorder %v3343_v2, 0.0  ;;  %v5470_v12 = vmul.f32 0.2, %v3343_v2 }
 0x220   : > { %v3346_v13 = vpop.f32.mrb[147].mxu0  ;;  %v4370_v14 = vpop.f32.mrb[147].mxu1  ;;  %8540 = vst.msk [vmem:[%s11846_s24 + $0x234] sm:$0xf] %vm8398_vm1, %v10146_v5  ;;  %v10151_v15 = vpack.c.bf16 %v5984_v11, %v5984_v11  ;;  %v6240_v16 = vsel %vm5216_vm11, %v11184_v61, %v5728_v7  ;;  %vm5214_vm13 = vcmp.ge.f32.partialorder %v4367_v3, 0.0  ;;  %vm4961_vm14 = vcmp.ge.f32.partialorder %v10929_v8, 0.0 }
 0x221   : > { %v5726_v17 = vmul.f32 0.2, %v4367_v3  ;;  %8796 = vst.msk [vmem:[%s11846_s24 + $0x634] sm:$0xf] %vm8398_vm1, %v10402_v10  ;;  %v10407_v18 = vpack.c.bf16 %v6240_v16, %v6240_v16  ;;  %v5982_v19 = vsel %vm4958_vm12, %v3343_v2, %v5470_v12  ;;  %v5473_v20 = vmul.f32 0.2, %v10929_v8 }
 0x222   : > { %8545 = vst.msk [vmem:[%s11846_s24 + $0x248] sm:$0xf] %vm8398_vm1, %v10151_v15  ;;  %v10149_v21 = vpack.c.bf16 %v5982_v19, %v5982_v19  ;;  %vm5217_vm15 = vcmp.ge.f32.partialorder %v11185_v9, 0.0  ;;  %v5729_v23 = vmul.f32 0.2, %v11185_v9  ;;  %vm4959_vm2 = vcmp.ge.f32.partialorder %v3346_v13, 0.0 }
 0x223   : > { %v6238_v22 = vsel %vm5214_vm13, %v4367_v3, %v5726_v17  ;;  %8801 = vst.msk [vmem:[%s11846_s24 + $0x648] sm:$0xf] %vm8398_vm1, %v10407_v18  ;;  %v5985_v25 = vsel %vm4961_vm14, %v10929_v8, %v5473_v20  ;;  %v5471_v26 = vmul.f32 0.2, %v3346_v13  ;;  %vm5215_vm3 = vcmp.ge.f32.partialorder %v4370_v14, 0.0  ;;  %v10932_v30 = vpop.f32.mrb[148].mxu0 }
 0x224   : > { %v10405_v24 = vpack.c.bf16 %v6238_v22, %v6238_v22  ;;  %8543 = vst.msk [vmem:[%s11846_s24 + $0x240] sm:$0xf] %vm8398_vm1, %v10149_v21  ;;  %v10152_v27 = vpack.c.bf16 %v5985_v25, %v5985_v25  ;;  %v6241_v28 = vsel %vm5217_vm15, %v11185_v9, %v5729_v23  ;;  %v5727_v29 = vmul.f32 0.2, %v4370_v14  ;;  %v11188_v31 = vpop.f32.mrb[148].mxu1  ;;  %v3359_v35 = vpop.f32.mrb[149].mxu0 }
 0x225   : > { %v10408_v32 = vpack.c.bf16 %v6241_v28, %v6241_v28  ;;  %v5983_v33 = vsel %vm4959_vm2, %v3346_v13, %v5471_v26  ;;  %vm4964_vm0 = vcmp.ge.f32.partialorder %v10932_v30, 0.0  ;;  %v5476_v34 = vmul.f32 0.2, %v10932_v30  ;;  %v4383_v36 = vpop.f32.mrb[149].mxu1  ;;  %v10933_v40 = vpop.f32.mrb[150].mxu0 }
 0x226   : > { %8799 = vst.msk [vmem:[%s11846_s24 + $0x640] sm:$0xf] %vm8398_vm1, %v10405_v24  ;;  %8546 = vst.msk [vmem:[%s11846_s24 + $0x24c] sm:$0xf] %vm8398_vm1, %v10152_v27  ;;  %v10150_v37 = vpack.c.bf16 %v5983_v33, %v5983_v33  ;;  %v6239_v38 = vsel %vm5215_vm3, %v4370_v14, %v5727_v29  ;;  %vm5220_vm4 = vcmp.ge.f32.partialorder %v11188_v31, 0.0  ;;  %v11189_v41 = vpop.f32.mrb[150].mxu1 }
 0x227   : > { %v5732_v39 = vmul.f32 0.2, %v11188_v31  ;;  %8802 = vst.msk [vmem:[%s11846_s24 + $0x64c] sm:$0xf] %vm8398_vm1, %v10408_v32  ;;  %v10406_v42 = vpack.c.bf16 %v6239_v38, %v6239_v38  ;;  %v5988_v43 = vsel %vm4964_vm0, %v10932_v30, %v5476_v34  ;;  %vm4962_vm5 = vcmp.ge.f32.partialorder %v3359_v35, 0.0  ;;  %v3362_v45 = vpop.f32.mrb[151].mxu0 }
 0x228   : > { %v5474_v44 = vmul.f32 0.2, %v3359_v35  ;;  %v4386_v46 = vpop.f32.mrb[151].mxu1  ;;  %8544 = vst.msk [vmem:[%s11846_s24 + $0x244] sm:$0xf] %vm8398_vm1, %v10150_v37  ;;  %v10155_v47 = vpack.c.bf16 %v5988_v43, %v5988_v43  ;;  %vm5218_vm6 = vcmp.ge.f32.partialorder %v4383_v36, 0.0 }
 0x229   : > { %v6244_v48 = vsel %vm5220_vm4, %v11188_v31, %v5732_v39  ;;  %v5730_v49 = vmul.f32 0.2, %v4383_v36  ;;  %8800 = vst.msk [vmem:[%s11846_s24 + $0x644] sm:$0xf] %vm8398_vm1, %v10406_v42  ;;  %vm4965_vm7 = vcmp.ge.f32.partialorder %v10933_v40, 0.0  ;;  %vm5221_vm8 = vcmp.ge.f32.partialorder %v11189_v41, 0.0 }
 0x22a   : > { %v10411_v50 = vpack.c.bf16 %v6244_v48, %v6244_v48  ;;  %v5986_v51 = vsel %vm4962_vm5, %v3359_v35, %v5474_v44  ;;  %v5477_v52 = vmul.f32 0.2, %v10933_v40  ;;  %8549 = vst.msk [vmem:[%s11846_s24 + $0x258] sm:$0xf] %vm8398_vm1, %v10155_v47  ;;  %v5733_v55 = vmul.f32 0.2, %v11189_v41 }
 0x22b   : > { %v10153_v53 = vpack.c.bf16 %v5986_v51, %v5986_v51  ;;  %v6242_v54 = vsel %vm5218_vm6, %v4383_v36, %v5730_v49  ;;  %vm4963_vm9 = vcmp.ge.f32.partialorder %v3362_v45, 0.0  ;;  %v5475_v58 = vmul.f32 0.2, %v3362_v45  ;;  %v10936_v62 = vpop.f32.mrb[152].mxu0  ;;  %v11192_v63 = vpop.f32.mrb[152].mxu1 }
 0x22c   : > { %8805 = vst.msk [vmem:[%s11846_s24 + $0x658] sm:$0xf] %vm8398_vm1, %v10411_v50  ;;  %v10409_v56 = vpack.c.bf16 %v6242_v54, %v6242_v54  ;;  %v5989_v57 = vsel %vm4965_vm7, %v10933_v40, %v5477_v52  ;;  %v6245_v60 = vsel %vm5221_vm8, %v11189_v41, %v5733_v55  ;;  %vm5219_vm10 = vcmp.ge.f32.partialorder %v4386_v46, 0.0  ;;  %v3375_v3 = vpop.f32.mrb[153].mxu0  ;;  %v4399_v4 = vpop.f32.mrb[153].mxu1 }
 0x22d   : > { %8547 = vst.msk [vmem:[%s11846_s24 + $0x250] sm:$0xf] %vm8398_vm1, %v10153_v53  ;;  %v10156_v59 = vpack.c.bf16 %v5989_v57, %v5989_v57  ;;  %v5731_v61 = vmul.f32 0.2, %v4386_v46  ;;  %v10412_v0 = vpack.c.bf16 %v6245_v60, %v6245_v60  ;;  %v5987_v1 = vsel %vm4963_vm9, %v3362_v45, %v5475_v58  ;;  %v10937_v8 = vpop.f32.mrb[154].mxu0  ;;  %v11193_v9 = vpop.f32.mrb[154].mxu1 }
 0x22e   : > { %8803 = vst.msk [vmem:[%s11846_s24 + $0x650] sm:$0xf] %vm8398_vm1, %v10409_v56  ;;  %vm4968_vm11 = vcmp.ge.f32.partialorder %v10936_v62, 0.0  ;;  %v5480_v2 = vmul.f32 0.2, %v10936_v62  ;;  %v10154_v5 = vpack.c.bf16 %v5987_v1, %v5987_v1  ;;  %vm5224_vm12 = vcmp.ge.f32.partialorder %v11192_v63, 0.0 }
 0x22f   : > { %8550 = vst.msk [vmem:[%s11846_s24 + $0x25c] sm:$0xf] %vm8398_vm1, %v10156_v59  ;;  %v6243_v6 = vsel %vm5219_vm10, %v4386_v46, %v5731_v61  ;;  %v5736_v7 = vmul.f32 0.2, %v11192_v63  ;;  %8806 = vst.msk [vmem:[%s11846_s24 + $0x65c] sm:$0xf] %vm8398_vm1, %v10412_v0 }
 0x230   : > { %v10410_v10 = vpack.c.bf16 %v6243_v6, %v6243_v6  ;;  %v5992_v11 = vsel %vm4968_vm11, %v10936_v62, %v5480_v2  ;;  %vm4966_vm13 = vcmp.ge.f32.partialorder %v3375_v3, 0.0  ;;  %v5478_v12 = vmul.f32 0.2, %v3375_v3  ;;  %v3378_v13 = vpop.f32.mrb[155].mxu0  ;;  %v4402_v14 = vpop.f32.mrb[155].mxu1 }
 0x231   : > { %8548 = vst.msk [vmem:[%s11846_s24 + $0x254] sm:$0xf] %vm8398_vm1, %v10154_v5  ;;  %v10159_v15 = vpack.c.bf16 %v5992_v11, %v5992_v11  ;;  %v6248_v16 = vsel %vm5224_vm12, %v11192_v63, %v5736_v7  ;;  %vm5222_vm14 = vcmp.ge.f32.partialorder %v4399_v4, 0.0  ;;  %v5734_v17 = vmul.f32 0.2, %v4399_v4  ;;  %v10940_v30 = vpop.f32.mrb[156].mxu0 }
 0x232   : > { %8804 = vst.msk [vmem:[%s11846_s24 + $0x654] sm:$0xf] %vm8398_vm1, %v10410_v10  ;;  %v10415_v18 = vpack.c.bf16 %v6248_v16, %v6248_v16  ;;  %v5990_v19 = vsel %vm4966_vm13, %v3375_v3, %v5478_v12  ;;  %vm4969_vm15 = vcmp.ge.f32.partialorder %v10937_v8, 0.0  ;;  %v5481_v20 = vmul.f32 0.2, %v10937_v8  ;;  %v11196_v31 = vpop.f32.mrb[156].mxu1 }
 0x233   : > { %8553 = vst.msk [vmem:[%s11846_s24 + $0x268] sm:$0xf] %vm8398_vm1, %v10159_v15  ;;  %v10157_v21 = vpack.c.bf16 %v5990_v19, %v5990_v19  ;;  %v6246_v22 = vsel %vm5222_vm14, %v4399_v4, %v5734_v17  ;;  %vm5225_vm2 = vcmp.ge.f32.partialorder %v11193_v9, 0.0  ;;  %v5737_v23 = vmul.f32 0.2, %v11193_v9  ;;  %v3391_v35 = vpop.f32.mrb[157].mxu0 }
 0x234   : > { %8809 = vst.msk [vmem:[%s11846_s24 + $0x668] sm:$0xf] %vm8398_vm1, %v10415_v18  ;;  %v10413_v24 = vpack.c.bf16 %v6246_v22, %v6246_v22  ;;  %v5993_v25 = vsel %vm4969_vm15, %v10937_v8, %v5481_v20  ;;  %vm4967_vm3 = vcmp.ge.f32.partialorder %v3378_v13, 0.0  ;;  %v5479_v26 = vmul.f32 0.2, %v3378_v13  ;;  %v4415_v36 = vpop.f32.mrb[157].mxu1 }
 0x235   : > { %8551 = vst.msk [vmem:[%s11846_s24 + $0x260] sm:$0xf] %vm8398_vm1, %v10157_v21  ;;  %v10160_v27 = vpack.c.bf16 %v5993_v25, %v5993_v25  ;;  %v6249_v28 = vsel %vm5225_vm2, %v11193_v9, %v5737_v23  ;;  %vm5223_vm0 = vcmp.ge.f32.partialorder %v4402_v14, 0.0  ;;  %v5735_v29 = vmul.f32 0.2, %v4402_v14  ;;  %v10941_v40 = vpop.f32.mrb[158].mxu0 }
 0x236   : > { %8807 = vst.msk [vmem:[%s11846_s24 + $0x660] sm:$0xf] %vm8398_vm1, %v10413_v24  ;;  %v10416_v32 = vpack.c.bf16 %v6249_v28, %v6249_v28  ;;  %v5991_v33 = vsel %vm4967_vm3, %v3378_v13, %v5479_v26  ;;  %vm4972_vm4 = vcmp.ge.f32.partialorder %v10940_v30, 0.0  ;;  %v5484_v34 = vmul.f32 0.2, %v10940_v30  ;;  %v11197_v41 = vpop.f32.mrb[158].mxu1 }
 0x237   : > { %8554 = vst.msk [vmem:[%s11846_s24 + $0x26c] sm:$0xf] %vm8398_vm1, %v10160_v27  ;;  %v10158_v37 = vpack.c.bf16 %v5991_v33, %v5991_v33  ;;  %v6247_v38 = vsel %vm5223_vm0, %v4402_v14, %v5735_v29  ;;  %vm5228_vm5 = vcmp.ge.f32.partialorder %v11196_v31, 0.0  ;;  %v5740_v39 = vmul.f32 0.2, %v11196_v31  ;;  %v3394_v45 = vpop.f32.mrb[159].mxu0 }
 0x238   : > { %8810 = vst.msk [vmem:[%s11846_s24 + $0x66c] sm:$0xf] %vm8398_vm1, %v10416_v32  ;;  %v10414_v42 = vpack.c.bf16 %v6247_v38, %v6247_v38  ;;  %v5996_v43 = vsel %vm4972_vm4, %v10940_v30, %v5484_v34  ;;  %vm4970_vm6 = vcmp.ge.f32.partialorder %v3391_v35, 0.0  ;;  %v5482_v44 = vmul.f32 0.2, %v3391_v35  ;;  %v4418_v46 = vpop.f32.mrb[159].mxu1 }
 0x239   : > { %8552 = vst.msk [vmem:[%s11846_s24 + $0x264] sm:$0xf] %vm8398_vm1, %v10158_v37  ;;  %v10163_v47 = vpack.c.bf16 %v5996_v43, %v5996_v43  ;;  %v6252_v48 = vsel %vm5228_vm5, %v11196_v31, %v5740_v39  ;;  %vm5226_vm7 = vcmp.ge.f32.partialorder %v4415_v36, 0.0  ;;  %v5738_v49 = vmul.f32 0.2, %v4415_v36  ;;  %v10944_v62 = vpop.f32.mrb[160].mxu0 }
 0x23a   : > { %8808 = vst.msk [vmem:[%s11846_s24 + $0x664] sm:$0xf] %vm8398_vm1, %v10414_v42  ;;  %v10419_v50 = vpack.c.bf16 %v6252_v48, %v6252_v48  ;;  %v5994_v51 = vsel %vm4970_vm6, %v3391_v35, %v5482_v44  ;;  %vm4973_vm8 = vcmp.ge.f32.partialorder %v10941_v40, 0.0  ;;  %v5485_v52 = vmul.f32 0.2, %v10941_v40  ;;  %v11200_v63 = vpop.f32.mrb[160].mxu1 }
 0x23b   : > { %8557 = vst.msk [vmem:[%s11846_s24 + $0x278] sm:$0xf] %vm8398_vm1, %v10163_v47  ;;  %v10161_v53 = vpack.c.bf16 %v5994_v51, %v5994_v51  ;;  %v6250_v54 = vsel %vm5226_vm7, %v4415_v36, %v5738_v49  ;;  %vm5229_vm9 = vcmp.ge.f32.partialorder %v11197_v41, 0.0  ;;  %v5741_v55 = vmul.f32 0.2, %v11197_v41  ;;  %v3407_v3 = vpop.f32.mrb[161].mxu0 }
 0x23c   : > { %8813 = vst.msk [vmem:[%s11846_s24 + $0x678] sm:$0xf] %vm8398_vm1, %v10419_v50  ;;  %v10417_v56 = vpack.c.bf16 %v6250_v54, %v6250_v54  ;;  %v5997_v57 = vsel %vm4973_vm8, %v10941_v40, %v5485_v52  ;;  %vm4971_vm10 = vcmp.ge.f32.partialorder %v3394_v45, 0.0  ;;  %v5483_v58 = vmul.f32 0.2, %v3394_v45  ;;  %v4431_v4 = vpop.f32.mrb[161].mxu1 }
 0x23d   : > { %8555 = vst.msk [vmem:[%s11846_s24 + $0x270] sm:$0xf] %vm8398_vm1, %v10161_v53  ;;  %v10164_v59 = vpack.c.bf16 %v5997_v57, %v5997_v57  ;;  %v6253_v60 = vsel %vm5229_vm9, %v11197_v41, %v5741_v55  ;;  %vm5227_vm11 = vcmp.ge.f32.partialorder %v4418_v46, 0.0  ;;  %v5739_v61 = vmul.f32 0.2, %v4418_v46  ;;  %v10945_v8 = vpop.f32.mrb[162].mxu0 }
 0x23e   : > { %8811 = vst.msk [vmem:[%s11846_s24 + $0x670] sm:$0xf] %vm8398_vm1, %v10417_v56  ;;  %v10420_v0 = vpack.c.bf16 %v6253_v60, %v6253_v60  ;;  %v5995_v1 = vsel %vm4971_vm10, %v3394_v45, %v5483_v58  ;;  %vm4976_vm12 = vcmp.ge.f32.partialorder %v10944_v62, 0.0  ;;  %v5488_v2 = vmul.f32 0.2, %v10944_v62  ;;  %v11201_v9 = vpop.f32.mrb[162].mxu1 }
 0x23f   : > { %8558 = vst.msk [vmem:[%s11846_s24 + $0x27c] sm:$0xf] %vm8398_vm1, %v10164_v59  ;;  %v10162_v5 = vpack.c.bf16 %v5995_v1, %v5995_v1  ;;  %v6251_v6 = vsel %vm5227_vm11, %v4418_v46, %v5739_v61  ;;  %vm5232_vm13 = vcmp.ge.f32.partialorder %v11200_v63, 0.0  ;;  %v5744_v7 = vmul.f32 0.2, %v11200_v63  ;;  %v3410_v13 = vpop.f32.mrb[163].mxu0 }
 0x240   : > { %8814 = vst.msk [vmem:[%s11846_s24 + $0x67c] sm:$0xf] %vm8398_vm1, %v10420_v0  ;;  %v10418_v10 = vpack.c.bf16 %v6251_v6, %v6251_v6  ;;  %v6000_v11 = vsel %vm4976_vm12, %v10944_v62, %v5488_v2  ;;  %vm4974_vm14 = vcmp.ge.f32.partialorder %v3407_v3, 0.0  ;;  %v5486_v12 = vmul.f32 0.2, %v3407_v3  ;;  %v4434_v14 = vpop.f32.mrb[163].mxu1 }
 0x241   : > { %8556 = vst.msk [vmem:[%s11846_s24 + $0x274] sm:$0xf] %vm8398_vm1, %v10162_v5  ;;  %v10167_v15 = vpack.c.bf16 %v6000_v11, %v6000_v11  ;;  %v6256_v16 = vsel %vm5232_vm13, %v11200_v63, %v5744_v7  ;;  %vm5230_vm15 = vcmp.ge.f32.partialorder %v4431_v4, 0.0  ;;  %v5742_v17 = vmul.f32 0.2, %v4431_v4  ;;  %v10948_v30 = vpop.f32.mrb[164].mxu0 }
 0x242   : > { %8812 = vst.msk [vmem:[%s11846_s24 + $0x674] sm:$0xf] %vm8398_vm1, %v10418_v10  ;;  %v10423_v18 = vpack.c.bf16 %v6256_v16, %v6256_v16  ;;  %v5998_v19 = vsel %vm4974_vm14, %v3407_v3, %v5486_v12  ;;  %vm4977_vm2 = vcmp.ge.f32.partialorder %v10945_v8, 0.0  ;;  %v5489_v20 = vmul.f32 0.2, %v10945_v8  ;;  %v11204_v31 = vpop.f32.mrb[164].mxu1 }
 0x243   : > { %8561 = vst.msk [vmem:[%s11846_s24 + $0x288] sm:$0xf] %vm8398_vm1, %v10167_v15  ;;  %v10165_v21 = vpack.c.bf16 %v5998_v19, %v5998_v19  ;;  %v6254_v22 = vsel %vm5230_vm15, %v4431_v4, %v5742_v17  ;;  %vm5233_vm3 = vcmp.ge.f32.partialorder %v11201_v9, 0.0  ;;  %v5745_v23 = vmul.f32 0.2, %v11201_v9  ;;  %v3423_v35 = vpop.f32.mrb[165].mxu0 }
 0x244   : > { %8817 = vst.msk [vmem:[%s11846_s24 + $0x688] sm:$0xf] %vm8398_vm1, %v10423_v18  ;;  %v10421_v24 = vpack.c.bf16 %v6254_v22, %v6254_v22  ;;  %v6001_v25 = vsel %vm4977_vm2, %v10945_v8, %v5489_v20  ;;  %vm4975_vm0 = vcmp.ge.f32.partialorder %v3410_v13, 0.0  ;;  %v5487_v26 = vmul.f32 0.2, %v3410_v13  ;;  %v4447_v36 = vpop.f32.mrb[165].mxu1 }
 0x245   : > { %8559 = vst.msk [vmem:[%s11846_s24 + $0x280] sm:$0xf] %vm8398_vm1, %v10165_v21  ;;  %v10168_v27 = vpack.c.bf16 %v6001_v25, %v6001_v25  ;;  %v6257_v28 = vsel %vm5233_vm3, %v11201_v9, %v5745_v23  ;;  %vm5231_vm4 = vcmp.ge.f32.partialorder %v4434_v14, 0.0  ;;  %v5743_v29 = vmul.f32 0.2, %v4434_v14  ;;  %v10949_v40 = vpop.f32.mrb[166].mxu0 }
 0x246   : > { %8815 = vst.msk [vmem:[%s11846_s24 + $0x680] sm:$0xf] %vm8398_vm1, %v10421_v24  ;;  %v10424_v32 = vpack.c.bf16 %v6257_v28, %v6257_v28  ;;  %v5999_v33 = vsel %vm4975_vm0, %v3410_v13, %v5487_v26  ;;  %vm4980_vm5 = vcmp.ge.f32.partialorder %v10948_v30, 0.0  ;;  %v5492_v34 = vmul.f32 0.2, %v10948_v30  ;;  %v11205_v41 = vpop.f32.mrb[166].mxu1 }
 0x247   : > { %8562 = vst.msk [vmem:[%s11846_s24 + $0x28c] sm:$0xf] %vm8398_vm1, %v10168_v27  ;;  %v10166_v37 = vpack.c.bf16 %v5999_v33, %v5999_v33  ;;  %v6255_v38 = vsel %vm5231_vm4, %v4434_v14, %v5743_v29  ;;  %vm5236_vm6 = vcmp.ge.f32.partialorder %v11204_v31, 0.0  ;;  %v5748_v39 = vmul.f32 0.2, %v11204_v31  ;;  %v3426_v45 = vpop.f32.mrb[167].mxu0 }
 0x248   : > { %8818 = vst.msk [vmem:[%s11846_s24 + $0x68c] sm:$0xf] %vm8398_vm1, %v10424_v32  ;;  %v10422_v42 = vpack.c.bf16 %v6255_v38, %v6255_v38  ;;  %v6004_v43 = vsel %vm4980_vm5, %v10948_v30, %v5492_v34  ;;  %vm4978_vm7 = vcmp.ge.f32.partialorder %v3423_v35, 0.0  ;;  %v5490_v44 = vmul.f32 0.2, %v3423_v35  ;;  %v4450_v46 = vpop.f32.mrb[167].mxu1 }
 0x249   : > { %8560 = vst.msk [vmem:[%s11846_s24 + $0x284] sm:$0xf] %vm8398_vm1, %v10166_v37  ;;  %v10171_v47 = vpack.c.bf16 %v6004_v43, %v6004_v43  ;;  %v6260_v48 = vsel %vm5236_vm6, %v11204_v31, %v5748_v39  ;;  %vm5234_vm8 = vcmp.ge.f32.partialorder %v4447_v36, 0.0  ;;  %v5746_v49 = vmul.f32 0.2, %v4447_v36  ;;  %v10952_v62 = vpop.f32.mrb[168].mxu0 }
 0x24a   : > { %8816 = vst.msk [vmem:[%s11846_s24 + $0x684] sm:$0xf] %vm8398_vm1, %v10422_v42  ;;  %v10427_v50 = vpack.c.bf16 %v6260_v48, %v6260_v48  ;;  %v6002_v51 = vsel %vm4978_vm7, %v3423_v35, %v5490_v44  ;;  %vm4981_vm9 = vcmp.ge.f32.partialorder %v10949_v40, 0.0  ;;  %v5493_v52 = vmul.f32 0.2, %v10949_v40  ;;  %v11208_v63 = vpop.f32.mrb[168].mxu1 }
 0x24b   : > { %8565 = vst.msk [vmem:[%s11846_s24 + $0x298] sm:$0xf] %vm8398_vm1, %v10171_v47  ;;  %v10169_v53 = vpack.c.bf16 %v6002_v51, %v6002_v51  ;;  %v6258_v54 = vsel %vm5234_vm8, %v4447_v36, %v5746_v49  ;;  %vm5237_vm10 = vcmp.ge.f32.partialorder %v11205_v41, 0.0  ;;  %v5749_v55 = vmul.f32 0.2, %v11205_v41  ;;  %v3439_v3 = vpop.f32.mrb[169].mxu0 }
 0x24c   : > { %8821 = vst.msk [vmem:[%s11846_s24 + $0x698] sm:$0xf] %vm8398_vm1, %v10427_v50  ;;  %v10425_v56 = vpack.c.bf16 %v6258_v54, %v6258_v54  ;;  %v6005_v57 = vsel %vm4981_vm9, %v10949_v40, %v5493_v52  ;;  %vm4979_vm11 = vcmp.ge.f32.partialorder %v3426_v45, 0.0  ;;  %v5491_v58 = vmul.f32 0.2, %v3426_v45  ;;  %v4463_v4 = vpop.f32.mrb[169].mxu1 }
 0x24d   : > { %8563 = vst.msk [vmem:[%s11846_s24 + $0x290] sm:$0xf] %vm8398_vm1, %v10169_v53  ;;  %v10172_v59 = vpack.c.bf16 %v6005_v57, %v6005_v57  ;;  %v6261_v60 = vsel %vm5237_vm10, %v11205_v41, %v5749_v55  ;;  %vm5235_vm12 = vcmp.ge.f32.partialorder %v4450_v46, 0.0  ;;  %v5747_v61 = vmul.f32 0.2, %v4450_v46  ;;  %v10953_v8 = vpop.f32.mrb[170].mxu0 }
 0x24e   : > { %8819 = vst.msk [vmem:[%s11846_s24 + $0x690] sm:$0xf] %vm8398_vm1, %v10425_v56  ;;  %v10428_v0 = vpack.c.bf16 %v6261_v60, %v6261_v60  ;;  %v6003_v1 = vsel %vm4979_vm11, %v3426_v45, %v5491_v58  ;;  %vm4984_vm13 = vcmp.ge.f32.partialorder %v10952_v62, 0.0  ;;  %v5496_v2 = vmul.f32 0.2, %v10952_v62  ;;  %v11209_v9 = vpop.f32.mrb[170].mxu1 }
 0x24f   : > { %8566 = vst.msk [vmem:[%s11846_s24 + $0x29c] sm:$0xf] %vm8398_vm1, %v10172_v59  ;;  %v10170_v5 = vpack.c.bf16 %v6003_v1, %v6003_v1  ;;  %v6259_v6 = vsel %vm5235_vm12, %v4450_v46, %v5747_v61  ;;  %vm5240_vm14 = vcmp.ge.f32.partialorder %v11208_v63, 0.0  ;;  %v5752_v7 = vmul.f32 0.2, %v11208_v63  ;;  %v3442_v13 = vpop.f32.mrb[171].mxu0 }
 0x250   : > { %8822 = vst.msk [vmem:[%s11846_s24 + $0x69c] sm:$0xf] %vm8398_vm1, %v10428_v0  ;;  %v10426_v10 = vpack.c.bf16 %v6259_v6, %v6259_v6  ;;  %v6008_v11 = vsel %vm4984_vm13, %v10952_v62, %v5496_v2  ;;  %vm4982_vm15 = vcmp.ge.f32.partialorder %v3439_v3, 0.0  ;;  %v5494_v12 = vmul.f32 0.2, %v3439_v3  ;;  %v4466_v14 = vpop.f32.mrb[171].mxu1 }
 0x251   : > { %8564 = vst.msk [vmem:[%s11846_s24 + $0x294] sm:$0xf] %vm8398_vm1, %v10170_v5  ;;  %v10175_v15 = vpack.c.bf16 %v6008_v11, %v6008_v11  ;;  %v6264_v16 = vsel %vm5240_vm14, %v11208_v63, %v5752_v7  ;;  %vm5238_vm2 = vcmp.ge.f32.partialorder %v4463_v4, 0.0  ;;  %v5750_v17 = vmul.f32 0.2, %v4463_v4  ;;  %v10956_v30 = vpop.f32.mrb[172].mxu0 }
 0x252   : > { %8820 = vst.msk [vmem:[%s11846_s24 + $0x694] sm:$0xf] %vm8398_vm1, %v10426_v10  ;;  %v10431_v18 = vpack.c.bf16 %v6264_v16, %v6264_v16  ;;  %v6006_v19 = vsel %vm4982_vm15, %v3439_v3, %v5494_v12  ;;  %vm4985_vm3 = vcmp.ge.f32.partialorder %v10953_v8, 0.0  ;;  %v5497_v20 = vmul.f32 0.2, %v10953_v8  ;;  %v11212_v31 = vpop.f32.mrb[172].mxu1 }
 0x253   : > { %8569 = vst.msk [vmem:[%s11846_s24 + $0x2a8] sm:$0xf] %vm8398_vm1, %v10175_v15  ;;  %v10173_v21 = vpack.c.bf16 %v6006_v19, %v6006_v19  ;;  %v6262_v22 = vsel %vm5238_vm2, %v4463_v4, %v5750_v17  ;;  %vm5241_vm0 = vcmp.ge.f32.partialorder %v11209_v9, 0.0  ;;  %v5753_v23 = vmul.f32 0.2, %v11209_v9  ;;  %v3455_v35 = vpop.f32.mrb[173].mxu0 }
 0x254   : > { %8825 = vst.msk [vmem:[%s11846_s24 + $0x6a8] sm:$0xf] %vm8398_vm1, %v10431_v18  ;;  %v10429_v24 = vpack.c.bf16 %v6262_v22, %v6262_v22  ;;  %v6009_v25 = vsel %vm4985_vm3, %v10953_v8, %v5497_v20  ;;  %vm4983_vm4 = vcmp.ge.f32.partialorder %v3442_v13, 0.0  ;;  %v5495_v26 = vmul.f32 0.2, %v3442_v13  ;;  %v4479_v36 = vpop.f32.mrb[173].mxu1 }
 0x255   : > { %8567 = vst.msk [vmem:[%s11846_s24 + $0x2a0] sm:$0xf] %vm8398_vm1, %v10173_v21  ;;  %v10176_v27 = vpack.c.bf16 %v6009_v25, %v6009_v25  ;;  %v6265_v28 = vsel %vm5241_vm0, %v11209_v9, %v5753_v23  ;;  %vm5239_vm5 = vcmp.ge.f32.partialorder %v4466_v14, 0.0  ;;  %v5751_v29 = vmul.f32 0.2, %v4466_v14  ;;  %v10957_v40 = vpop.f32.mrb[174].mxu0 }
 0x256   : > { %8823 = vst.msk [vmem:[%s11846_s24 + $0x6a0] sm:$0xf] %vm8398_vm1, %v10429_v24  ;;  %v10432_v32 = vpack.c.bf16 %v6265_v28, %v6265_v28  ;;  %v6007_v33 = vsel %vm4983_vm4, %v3442_v13, %v5495_v26  ;;  %vm4988_vm6 = vcmp.ge.f32.partialorder %v10956_v30, 0.0  ;;  %v5500_v34 = vmul.f32 0.2, %v10956_v30  ;;  %v11213_v41 = vpop.f32.mrb[174].mxu1 }
 0x257   : > { %8570 = vst.msk [vmem:[%s11846_s24 + $0x2ac] sm:$0xf] %vm8398_vm1, %v10176_v27  ;;  %v10174_v37 = vpack.c.bf16 %v6007_v33, %v6007_v33  ;;  %v6263_v38 = vsel %vm5239_vm5, %v4466_v14, %v5751_v29  ;;  %vm5244_vm7 = vcmp.ge.f32.partialorder %v11212_v31, 0.0  ;;  %v5756_v39 = vmul.f32 0.2, %v11212_v31  ;;  %v3458_v45 = vpop.f32.mrb[175].mxu0 }
 0x258   : > { %8826 = vst.msk [vmem:[%s11846_s24 + $0x6ac] sm:$0xf] %vm8398_vm1, %v10432_v32  ;;  %v10430_v42 = vpack.c.bf16 %v6263_v38, %v6263_v38  ;;  %v6012_v43 = vsel %vm4988_vm6, %v10956_v30, %v5500_v34  ;;  %vm4986_vm8 = vcmp.ge.f32.partialorder %v3455_v35, 0.0  ;;  %v5498_v44 = vmul.f32 0.2, %v3455_v35  ;;  %v4482_v46 = vpop.f32.mrb[175].mxu1 }
 0x259   : > { %8568 = vst.msk [vmem:[%s11846_s24 + $0x2a4] sm:$0xf] %vm8398_vm1, %v10174_v37  ;;  %v10179_v47 = vpack.c.bf16 %v6012_v43, %v6012_v43  ;;  %v6268_v48 = vsel %vm5244_vm7, %v11212_v31, %v5756_v39  ;;  %vm5242_vm9 = vcmp.ge.f32.partialorder %v4479_v36, 0.0  ;;  %v5754_v49 = vmul.f32 0.2, %v4479_v36  ;;  %v10960_v62 = vpop.f32.mrb[176].mxu0 }
 0x25a   : > { %8824 = vst.msk [vmem:[%s11846_s24 + $0x6a4] sm:$0xf] %vm8398_vm1, %v10430_v42  ;;  %v10435_v50 = vpack.c.bf16 %v6268_v48, %v6268_v48  ;;  %v6010_v51 = vsel %vm4986_vm8, %v3455_v35, %v5498_v44  ;;  %vm4989_vm10 = vcmp.ge.f32.partialorder %v10957_v40, 0.0  ;;  %v5501_v52 = vmul.f32 0.2, %v10957_v40  ;;  %v11216_v63 = vpop.f32.mrb[176].mxu1 }
 0x25b   : > { %8573 = vst.msk [vmem:[%s11846_s24 + $0x2b8] sm:$0xf] %vm8398_vm1, %v10179_v47  ;;  %v10177_v53 = vpack.c.bf16 %v6010_v51, %v6010_v51  ;;  %v6266_v54 = vsel %vm5242_vm9, %v4479_v36, %v5754_v49  ;;  %vm5245_vm11 = vcmp.ge.f32.partialorder %v11213_v41, 0.0  ;;  %v5757_v55 = vmul.f32 0.2, %v11213_v41  ;;  %v3471_v3 = vpop.f32.mrb[177].mxu0 }
 0x25c   : > { %8829 = vst.msk [vmem:[%s11846_s24 + $0x6b8] sm:$0xf] %vm8398_vm1, %v10435_v50  ;;  %v10433_v56 = vpack.c.bf16 %v6266_v54, %v6266_v54  ;;  %v6013_v57 = vsel %vm4989_vm10, %v10957_v40, %v5501_v52  ;;  %vm4987_vm12 = vcmp.ge.f32.partialorder %v3458_v45, 0.0  ;;  %v5499_v58 = vmul.f32 0.2, %v3458_v45  ;;  %v4495_v4 = vpop.f32.mrb[177].mxu1 }
 0x25d   : > { %8571 = vst.msk [vmem:[%s11846_s24 + $0x2b0] sm:$0xf] %vm8398_vm1, %v10177_v53  ;;  %v10180_v59 = vpack.c.bf16 %v6013_v57, %v6013_v57  ;;  %v6269_v60 = vsel %vm5245_vm11, %v11213_v41, %v5757_v55  ;;  %vm5243_vm13 = vcmp.ge.f32.partialorder %v4482_v46, 0.0  ;;  %v5755_v61 = vmul.f32 0.2, %v4482_v46  ;;  %v10961_v8 = vpop.f32.mrb[178].mxu0 }
 0x25e   : > { %8827 = vst.msk [vmem:[%s11846_s24 + $0x6b0] sm:$0xf] %vm8398_vm1, %v10433_v56  ;;  %v10436_v0 = vpack.c.bf16 %v6269_v60, %v6269_v60  ;;  %v6011_v1 = vsel %vm4987_vm12, %v3458_v45, %v5499_v58  ;;  %vm4992_vm14 = vcmp.ge.f32.partialorder %v10960_v62, 0.0  ;;  %v5504_v2 = vmul.f32 0.2, %v10960_v62  ;;  %v11217_v9 = vpop.f32.mrb[178].mxu1 }
 0x25f   : > { %8574 = vst.msk [vmem:[%s11846_s24 + $0x2bc] sm:$0xf] %vm8398_vm1, %v10180_v59  ;;  %v10178_v5 = vpack.c.bf16 %v6011_v1, %v6011_v1  ;;  %v6267_v6 = vsel %vm5243_vm13, %v4482_v46, %v5755_v61  ;;  %vm5248_vm15 = vcmp.ge.f32.partialorder %v11216_v63, 0.0  ;;  %v5760_v7 = vmul.f32 0.2, %v11216_v63  ;;  %v3474_v13 = vpop.f32.mrb[179].mxu0 }
 0x260   : > { %8830 = vst.msk [vmem:[%s11846_s24 + $0x6bc] sm:$0xf] %vm8398_vm1, %v10436_v0  ;;  %v10434_v10 = vpack.c.bf16 %v6267_v6, %v6267_v6  ;;  %v6016_v11 = vsel %vm4992_vm14, %v10960_v62, %v5504_v2  ;;  %vm4990_vm2 = vcmp.ge.f32.partialorder %v3471_v3, 0.0  ;;  %v5502_v12 = vmul.f32 0.2, %v3471_v3  ;;  %v4498_v14 = vpop.f32.mrb[179].mxu1 }
 0x261   : > { %8572 = vst.msk [vmem:[%s11846_s24 + $0x2b4] sm:$0xf] %vm8398_vm1, %v10178_v5  ;;  %v10183_v15 = vpack.c.bf16 %v6016_v11, %v6016_v11  ;;  %v6272_v16 = vsel %vm5248_vm15, %v11216_v63, %v5760_v7  ;;  %vm5246_vm3 = vcmp.ge.f32.partialorder %v4495_v4, 0.0  ;;  %v5758_v17 = vmul.f32 0.2, %v4495_v4  ;;  %v10964_v30 = vpop.f32.mrb[180].mxu0 }
 0x262   : > { %8828 = vst.msk [vmem:[%s11846_s24 + $0x6b4] sm:$0xf] %vm8398_vm1, %v10434_v10  ;;  %v10439_v18 = vpack.c.bf16 %v6272_v16, %v6272_v16  ;;  %v6014_v19 = vsel %vm4990_vm2, %v3471_v3, %v5502_v12  ;;  %vm4993_vm0 = vcmp.ge.f32.partialorder %v10961_v8, 0.0  ;;  %v5505_v20 = vmul.f32 0.2, %v10961_v8  ;;  %v11220_v31 = vpop.f32.mrb[180].mxu1 }
 0x263   : > { %8577 = vst.msk [vmem:[%s11846_s24 + $0x2c8] sm:$0xf] %vm8398_vm1, %v10183_v15  ;;  %v10181_v21 = vpack.c.bf16 %v6014_v19, %v6014_v19  ;;  %v6270_v22 = vsel %vm5246_vm3, %v4495_v4, %v5758_v17  ;;  %vm5249_vm4 = vcmp.ge.f32.partialorder %v11217_v9, 0.0  ;;  %v5761_v23 = vmul.f32 0.2, %v11217_v9  ;;  %v3487_v35 = vpop.f32.mrb[181].mxu0 }
 0x264   : > { %8833 = vst.msk [vmem:[%s11846_s24 + $0x6c8] sm:$0xf] %vm8398_vm1, %v10439_v18  ;;  %v10437_v24 = vpack.c.bf16 %v6270_v22, %v6270_v22  ;;  %v6017_v25 = vsel %vm4993_vm0, %v10961_v8, %v5505_v20  ;;  %vm4991_vm5 = vcmp.ge.f32.partialorder %v3474_v13, 0.0  ;;  %v5503_v26 = vmul.f32 0.2, %v3474_v13  ;;  %v4511_v36 = vpop.f32.mrb[181].mxu1 }
 0x265   : > { %8575 = vst.msk [vmem:[%s11846_s24 + $0x2c0] sm:$0xf] %vm8398_vm1, %v10181_v21  ;;  %v10184_v27 = vpack.c.bf16 %v6017_v25, %v6017_v25  ;;  %v6273_v28 = vsel %vm5249_vm4, %v11217_v9, %v5761_v23  ;;  %vm5247_vm6 = vcmp.ge.f32.partialorder %v4498_v14, 0.0  ;;  %v5759_v29 = vmul.f32 0.2, %v4498_v14  ;;  %v10965_v40 = vpop.f32.mrb[182].mxu0 }
 0x266   : > { %8831 = vst.msk [vmem:[%s11846_s24 + $0x6c0] sm:$0xf] %vm8398_vm1, %v10437_v24  ;;  %v10440_v32 = vpack.c.bf16 %v6273_v28, %v6273_v28  ;;  %v6015_v33 = vsel %vm4991_vm5, %v3474_v13, %v5503_v26  ;;  %vm4996_vm7 = vcmp.ge.f32.partialorder %v10964_v30, 0.0  ;;  %v5508_v34 = vmul.f32 0.2, %v10964_v30  ;;  %v11221_v41 = vpop.f32.mrb[182].mxu1 }
 0x267   : > { %8578 = vst.msk [vmem:[%s11846_s24 + $0x2cc] sm:$0xf] %vm8398_vm1, %v10184_v27  ;;  %v10182_v37 = vpack.c.bf16 %v6015_v33, %v6015_v33  ;;  %v6271_v38 = vsel %vm5247_vm6, %v4498_v14, %v5759_v29  ;;  %vm5252_vm8 = vcmp.ge.f32.partialorder %v11220_v31, 0.0  ;;  %v5764_v39 = vmul.f32 0.2, %v11220_v31  ;;  %v3490_v45 = vpop.f32.mrb[183].mxu0 }
 0x268   : > { %8834 = vst.msk [vmem:[%s11846_s24 + $0x6cc] sm:$0xf] %vm8398_vm1, %v10440_v32  ;;  %v10438_v42 = vpack.c.bf16 %v6271_v38, %v6271_v38  ;;  %v6020_v43 = vsel %vm4996_vm7, %v10964_v30, %v5508_v34  ;;  %vm4994_vm9 = vcmp.ge.f32.partialorder %v3487_v35, 0.0  ;;  %v5506_v44 = vmul.f32 0.2, %v3487_v35  ;;  %v4514_v46 = vpop.f32.mrb[183].mxu1 }
 0x269   : > { %8576 = vst.msk [vmem:[%s11846_s24 + $0x2c4] sm:$0xf] %vm8398_vm1, %v10182_v37  ;;  %v10187_v47 = vpack.c.bf16 %v6020_v43, %v6020_v43  ;;  %v6276_v48 = vsel %vm5252_vm8, %v11220_v31, %v5764_v39  ;;  %vm5250_vm10 = vcmp.ge.f32.partialorder %v4511_v36, 0.0  ;;  %v5762_v49 = vmul.f32 0.2, %v4511_v36  ;;  %v10968_v62 = vpop.f32.mrb[184].mxu0 }
 0x26a   : > { %8832 = vst.msk [vmem:[%s11846_s24 + $0x6c4] sm:$0xf] %vm8398_vm1, %v10438_v42  ;;  %v10443_v50 = vpack.c.bf16 %v6276_v48, %v6276_v48  ;;  %v6018_v51 = vsel %vm4994_vm9, %v3487_v35, %v5506_v44  ;;  %vm4997_vm11 = vcmp.ge.f32.partialorder %v10965_v40, 0.0  ;;  %v5509_v52 = vmul.f32 0.2, %v10965_v40  ;;  %v11224_v63 = vpop.f32.mrb[184].mxu1 }
 0x26b   : > { %8581 = vst.msk [vmem:[%s11846_s24 + $0x2d8] sm:$0xf] %vm8398_vm1, %v10187_v47  ;;  %v10185_v53 = vpack.c.bf16 %v6018_v51, %v6018_v51  ;;  %v6274_v54 = vsel %vm5250_vm10, %v4511_v36, %v5762_v49  ;;  %vm5253_vm12 = vcmp.ge.f32.partialorder %v11221_v41, 0.0  ;;  %v5765_v55 = vmul.f32 0.2, %v11221_v41  ;;  %v3503_v3 = vpop.f32.mrb[185].mxu0 }
 0x26c   : > { %8837 = vst.msk [vmem:[%s11846_s24 + $0x6d8] sm:$0xf] %vm8398_vm1, %v10443_v50  ;;  %v10441_v56 = vpack.c.bf16 %v6274_v54, %v6274_v54  ;;  %v6021_v57 = vsel %vm4997_vm11, %v10965_v40, %v5509_v52  ;;  %vm4995_vm13 = vcmp.ge.f32.partialorder %v3490_v45, 0.0  ;;  %v5507_v58 = vmul.f32 0.2, %v3490_v45  ;;  %v4527_v4 = vpop.f32.mrb[185].mxu1 }
 0x26d   : > { %8579 = vst.msk [vmem:[%s11846_s24 + $0x2d0] sm:$0xf] %vm8398_vm1, %v10185_v53  ;;  %v10188_v59 = vpack.c.bf16 %v6021_v57, %v6021_v57  ;;  %v6277_v60 = vsel %vm5253_vm12, %v11221_v41, %v5765_v55  ;;  %vm5251_vm14 = vcmp.ge.f32.partialorder %v4514_v46, 0.0  ;;  %v5763_v61 = vmul.f32 0.2, %v4514_v46  ;;  %v10969_v8 = vpop.f32.mrb[186].mxu0 }
 0x26e   : > { %8835 = vst.msk [vmem:[%s11846_s24 + $0x6d0] sm:$0xf] %vm8398_vm1, %v10441_v56  ;;  %v10444_v0 = vpack.c.bf16 %v6277_v60, %v6277_v60  ;;  %v6019_v1 = vsel %vm4995_vm13, %v3490_v45, %v5507_v58  ;;  %vm5000_vm15 = vcmp.ge.f32.partialorder %v10968_v62, 0.0  ;;  %v5512_v2 = vmul.f32 0.2, %v10968_v62  ;;  %v11225_v9 = vpop.f32.mrb[186].mxu1 }
 0x26f   : > { %8582 = vst.msk [vmem:[%s11846_s24 + $0x2dc] sm:$0xf] %vm8398_vm1, %v10188_v59  ;;  %v10186_v5 = vpack.c.bf16 %v6019_v1, %v6019_v1  ;;  %v6275_v6 = vsel %vm5251_vm14, %v4514_v46, %v5763_v61  ;;  %vm5256_vm2 = vcmp.ge.f32.partialorder %v11224_v63, 0.0  ;;  %v5768_v7 = vmul.f32 0.2, %v11224_v63  ;;  %v3506_v13 = vpop.f32.mrb[187].mxu0 }
 0x270   : > { %8838 = vst.msk [vmem:[%s11846_s24 + $0x6dc] sm:$0xf] %vm8398_vm1, %v10444_v0  ;;  %v10442_v10 = vpack.c.bf16 %v6275_v6, %v6275_v6  ;;  %v6024_v11 = vsel %vm5000_vm15, %v10968_v62, %v5512_v2  ;;  %vm4998_vm3 = vcmp.ge.f32.partialorder %v3503_v3, 0.0  ;;  %v5510_v12 = vmul.f32 0.2, %v3503_v3  ;;  %v4530_v14 = vpop.f32.mrb[187].mxu1 }
 0x271   : > { %8580 = vst.msk [vmem:[%s11846_s24 + $0x2d4] sm:$0xf] %vm8398_vm1, %v10186_v5  ;;  %v10191_v15 = vpack.c.bf16 %v6024_v11, %v6024_v11  ;;  %v6280_v16 = vsel %vm5256_vm2, %v11224_v63, %v5768_v7  ;;  %vm5254_vm0 = vcmp.ge.f32.partialorder %v4527_v4, 0.0  ;;  %v5766_v17 = vmul.f32 0.2, %v4527_v4  ;;  %v10972_v30 = vpop.f32.mrb[188].mxu0 }
 0x272   : > { %8836 = vst.msk [vmem:[%s11846_s24 + $0x6d4] sm:$0xf] %vm8398_vm1, %v10442_v10  ;;  %v10447_v18 = vpack.c.bf16 %v6280_v16, %v6280_v16  ;;  %v6022_v19 = vsel %vm4998_vm3, %v3503_v3, %v5510_v12  ;;  %vm5001_vm4 = vcmp.ge.f32.partialorder %v10969_v8, 0.0  ;;  %v5513_v20 = vmul.f32 0.2, %v10969_v8  ;;  %v11228_v31 = vpop.f32.mrb[188].mxu1 }
 0x273   : > { %8585 = vst.msk [vmem:[%s11846_s24 + $0x2e8] sm:$0xf] %vm8398_vm1, %v10191_v15  ;;  %v10189_v21 = vpack.c.bf16 %v6022_v19, %v6022_v19  ;;  %v6278_v22 = vsel %vm5254_vm0, %v4527_v4, %v5766_v17  ;;  %vm5257_vm5 = vcmp.ge.f32.partialorder %v11225_v9, 0.0  ;;  %v5769_v23 = vmul.f32 0.2, %v11225_v9  ;;  %v3519_v35 = vpop.f32.mrb[189].mxu0 }
 0x274   : > { %8841 = vst.msk [vmem:[%s11846_s24 + $0x6e8] sm:$0xf] %vm8398_vm1, %v10447_v18  ;;  %v10445_v24 = vpack.c.bf16 %v6278_v22, %v6278_v22  ;;  %v6025_v25 = vsel %vm5001_vm4, %v10969_v8, %v5513_v20  ;;  %vm4999_vm6 = vcmp.ge.f32.partialorder %v3506_v13, 0.0  ;;  %v5511_v26 = vmul.f32 0.2, %v3506_v13  ;;  %v4543_v36 = vpop.f32.mrb[189].mxu1 }
 0x275   : > { %8583 = vst.msk [vmem:[%s11846_s24 + $0x2e0] sm:$0xf] %vm8398_vm1, %v10189_v21  ;;  %v10192_v27 = vpack.c.bf16 %v6025_v25, %v6025_v25  ;;  %v6281_v28 = vsel %vm5257_vm5, %v11225_v9, %v5769_v23  ;;  %vm5255_vm7 = vcmp.ge.f32.partialorder %v4530_v14, 0.0  ;;  %v5767_v29 = vmul.f32 0.2, %v4530_v14  ;;  %v10973_v40 = vpop.f32.mrb[190].mxu0 }
 0x276   : > { %8839 = vst.msk [vmem:[%s11846_s24 + $0x6e0] sm:$0xf] %vm8398_vm1, %v10445_v24  ;;  %v10448_v32 = vpack.c.bf16 %v6281_v28, %v6281_v28  ;;  %v6023_v33 = vsel %vm4999_vm6, %v3506_v13, %v5511_v26  ;;  %vm5004_vm8 = vcmp.ge.f32.partialorder %v10972_v30, 0.0  ;;  %v5516_v34 = vmul.f32 0.2, %v10972_v30  ;;  %v11229_v41 = vpop.f32.mrb[190].mxu1 }
 0x277   : > { %8586 = vst.msk [vmem:[%s11846_s24 + $0x2ec] sm:$0xf] %vm8398_vm1, %v10192_v27  ;;  %v10190_v37 = vpack.c.bf16 %v6023_v33, %v6023_v33  ;;  %v6279_v38 = vsel %vm5255_vm7, %v4530_v14, %v5767_v29  ;;  %vm5260_vm9 = vcmp.ge.f32.partialorder %v11228_v31, 0.0  ;;  %v5772_v39 = vmul.f32 0.2, %v11228_v31  ;;  %v3522_v45 = vpop.f32.mrb[191].mxu0 }
 0x278   : > { %8842 = vst.msk [vmem:[%s11846_s24 + $0x6ec] sm:$0xf] %vm8398_vm1, %v10448_v32  ;;  %v10446_v42 = vpack.c.bf16 %v6279_v38, %v6279_v38  ;;  %v6028_v43 = vsel %vm5004_vm8, %v10972_v30, %v5516_v34  ;;  %vm5002_vm10 = vcmp.ge.f32.partialorder %v3519_v35, 0.0  ;;  %v5514_v44 = vmul.f32 0.2, %v3519_v35  ;;  %v4546_v46 = vpop.f32.mrb[191].mxu1 }
 0x279   : > { %8584 = vst.msk [vmem:[%s11846_s24 + $0x2e4] sm:$0xf] %vm8398_vm1, %v10190_v37  ;;  %v10195_v47 = vpack.c.bf16 %v6028_v43, %v6028_v43  ;;  %v6284_v48 = vsel %vm5260_vm9, %v11228_v31, %v5772_v39  ;;  %vm5258_vm11 = vcmp.ge.f32.partialorder %v4543_v36, 0.0  ;;  %v5770_v49 = vmul.f32 0.2, %v4543_v36  ;;  %v10976_v62 = vpop.f32.mrb[192].mxu0 }
 0x27a   : > { %8840 = vst.msk [vmem:[%s11846_s24 + $0x6e4] sm:$0xf] %vm8398_vm1, %v10446_v42  ;;  %v10451_v50 = vpack.c.bf16 %v6284_v48, %v6284_v48  ;;  %v6026_v51 = vsel %vm5002_vm10, %v3519_v35, %v5514_v44  ;;  %vm5005_vm12 = vcmp.ge.f32.partialorder %v10973_v40, 0.0  ;;  %v5517_v52 = vmul.f32 0.2, %v10973_v40  ;;  %v11232_v63 = vpop.f32.mrb[192].mxu1 }
 0x27b   : > { %8589 = vst.msk [vmem:[%s11846_s24 + $0x2f8] sm:$0xf] %vm8398_vm1, %v10195_v47  ;;  %v10193_v53 = vpack.c.bf16 %v6026_v51, %v6026_v51  ;;  %v6282_v54 = vsel %vm5258_vm11, %v4543_v36, %v5770_v49  ;;  %vm5261_vm13 = vcmp.ge.f32.partialorder %v11229_v41, 0.0  ;;  %v5773_v55 = vmul.f32 0.2, %v11229_v41  ;;  %v3535_v3 = vpop.f32.mrb[193].mxu0 }
 0x27c   : > { %8845 = vst.msk [vmem:[%s11846_s24 + $0x6f8] sm:$0xf] %vm8398_vm1, %v10451_v50  ;;  %v10449_v56 = vpack.c.bf16 %v6282_v54, %v6282_v54  ;;  %v6029_v57 = vsel %vm5005_vm12, %v10973_v40, %v5517_v52  ;;  %vm5003_vm14 = vcmp.ge.f32.partialorder %v3522_v45, 0.0  ;;  %v5515_v58 = vmul.f32 0.2, %v3522_v45  ;;  %v4559_v4 = vpop.f32.mrb[193].mxu1 }
 0x27d   : > { %8587 = vst.msk [vmem:[%s11846_s24 + $0x2f0] sm:$0xf] %vm8398_vm1, %v10193_v53  ;;  %v10196_v59 = vpack.c.bf16 %v6029_v57, %v6029_v57  ;;  %v6285_v60 = vsel %vm5261_vm13, %v11229_v41, %v5773_v55  ;;  %vm5259_vm15 = vcmp.ge.f32.partialorder %v4546_v46, 0.0  ;;  %v5771_v61 = vmul.f32 0.2, %v4546_v46  ;;  %v10977_v8 = vpop.f32.mrb[194].mxu0 }
 0x27e   : > { %8843 = vst.msk [vmem:[%s11846_s24 + $0x6f0] sm:$0xf] %vm8398_vm1, %v10449_v56  ;;  %v10452_v0 = vpack.c.bf16 %v6285_v60, %v6285_v60  ;;  %v6027_v1 = vsel %vm5003_vm14, %v3522_v45, %v5515_v58  ;;  %vm5008_vm2 = vcmp.ge.f32.partialorder %v10976_v62, 0.0  ;;  %v5520_v2 = vmul.f32 0.2, %v10976_v62  ;;  %v11233_v9 = vpop.f32.mrb[194].mxu1 }
 0x27f   : > { %8590 = vst.msk [vmem:[%s11846_s24 + $0x2fc] sm:$0xf] %vm8398_vm1, %v10196_v59  ;;  %v10194_v5 = vpack.c.bf16 %v6027_v1, %v6027_v1  ;;  %v6283_v6 = vsel %vm5259_vm15, %v4546_v46, %v5771_v61  ;;  %vm5264_vm3 = vcmp.ge.f32.partialorder %v11232_v63, 0.0  ;;  %v5776_v7 = vmul.f32 0.2, %v11232_v63  ;;  %v3538_v13 = vpop.f32.mrb[195].mxu0 }
 0x280   : > { %8846 = vst.msk [vmem:[%s11846_s24 + $0x6fc] sm:$0xf] %vm8398_vm1, %v10452_v0  ;;  %v10450_v10 = vpack.c.bf16 %v6283_v6, %v6283_v6  ;;  %v6032_v11 = vsel %vm5008_vm2, %v10976_v62, %v5520_v2  ;;  %vm5006_vm0 = vcmp.ge.f32.partialorder %v3535_v3, 0.0  ;;  %v5518_v12 = vmul.f32 0.2, %v3535_v3  ;;  %v4562_v14 = vpop.f32.mrb[195].mxu1 }
 0x281   : > { %8588 = vst.msk [vmem:[%s11846_s24 + $0x2f4] sm:$0xf] %vm8398_vm1, %v10194_v5  ;;  %v10199_v15 = vpack.c.bf16 %v6032_v11, %v6032_v11  ;;  %v6288_v16 = vsel %vm5264_vm3, %v11232_v63, %v5776_v7  ;;  %vm5262_vm4 = vcmp.ge.f32.partialorder %v4559_v4, 0.0  ;;  %v5774_v17 = vmul.f32 0.2, %v4559_v4  ;;  %v10980_v30 = vpop.f32.mrb[196].mxu0 }
 0x282   : > { %8844 = vst.msk [vmem:[%s11846_s24 + $0x6f4] sm:$0xf] %vm8398_vm1, %v10450_v10  ;;  %v10455_v18 = vpack.c.bf16 %v6288_v16, %v6288_v16  ;;  %v6030_v19 = vsel %vm5006_vm0, %v3535_v3, %v5518_v12  ;;  %vm5009_vm5 = vcmp.ge.f32.partialorder %v10977_v8, 0.0  ;;  %v5521_v20 = vmul.f32 0.2, %v10977_v8  ;;  %v11236_v31 = vpop.f32.mrb[196].mxu1 }
 0x283   : > { %8593 = vst.msk [vmem:[%s11846_s24 + $0x308] sm:$0xf] %vm8398_vm1, %v10199_v15  ;;  %v10197_v21 = vpack.c.bf16 %v6030_v19, %v6030_v19  ;;  %v6286_v22 = vsel %vm5262_vm4, %v4559_v4, %v5774_v17  ;;  %vm5265_vm6 = vcmp.ge.f32.partialorder %v11233_v9, 0.0  ;;  %v5777_v23 = vmul.f32 0.2, %v11233_v9  ;;  %v3551_v35 = vpop.f32.mrb[197].mxu0 }
 0x284   : > { %8849 = vst.msk [vmem:[%s11846_s24 + $0x708] sm:$0xf] %vm8398_vm1, %v10455_v18  ;;  %v10453_v24 = vpack.c.bf16 %v6286_v22, %v6286_v22  ;;  %v6033_v25 = vsel %vm5009_vm5, %v10977_v8, %v5521_v20  ;;  %vm5007_vm7 = vcmp.ge.f32.partialorder %v3538_v13, 0.0  ;;  %v5519_v26 = vmul.f32 0.2, %v3538_v13  ;;  %v4575_v36 = vpop.f32.mrb[197].mxu1 }
 0x285   : > { %8591 = vst.msk [vmem:[%s11846_s24 + $0x300] sm:$0xf] %vm8398_vm1, %v10197_v21  ;;  %v10200_v27 = vpack.c.bf16 %v6033_v25, %v6033_v25  ;;  %v6289_v28 = vsel %vm5265_vm6, %v11233_v9, %v5777_v23  ;;  %vm5263_vm8 = vcmp.ge.f32.partialorder %v4562_v14, 0.0  ;;  %v5775_v29 = vmul.f32 0.2, %v4562_v14  ;;  %v10981_v40 = vpop.f32.mrb[198].mxu0 }
 0x286   : > { %8847 = vst.msk [vmem:[%s11846_s24 + $0x700] sm:$0xf] %vm8398_vm1, %v10453_v24  ;;  %v10456_v32 = vpack.c.bf16 %v6289_v28, %v6289_v28  ;;  %v6031_v33 = vsel %vm5007_vm7, %v3538_v13, %v5519_v26  ;;  %vm5012_vm9 = vcmp.ge.f32.partialorder %v10980_v30, 0.0  ;;  %v5524_v34 = vmul.f32 0.2, %v10980_v30  ;;  %v11237_v41 = vpop.f32.mrb[198].mxu1 }
 0x287   : > { %8594 = vst.msk [vmem:[%s11846_s24 + $0x30c] sm:$0xf] %vm8398_vm1, %v10200_v27  ;;  %v10198_v37 = vpack.c.bf16 %v6031_v33, %v6031_v33  ;;  %v6287_v38 = vsel %vm5263_vm8, %v4562_v14, %v5775_v29  ;;  %vm5268_vm10 = vcmp.ge.f32.partialorder %v11236_v31, 0.0  ;;  %v5780_v39 = vmul.f32 0.2, %v11236_v31  ;;  %v3554_v45 = vpop.f32.mrb[199].mxu0 }
 0x288   : > { %8850 = vst.msk [vmem:[%s11846_s24 + $0x70c] sm:$0xf] %vm8398_vm1, %v10456_v32  ;;  %v10454_v42 = vpack.c.bf16 %v6287_v38, %v6287_v38  ;;  %v6036_v43 = vsel %vm5012_vm9, %v10980_v30, %v5524_v34  ;;  %vm5010_vm11 = vcmp.ge.f32.partialorder %v3551_v35, 0.0  ;;  %v5522_v44 = vmul.f32 0.2, %v3551_v35  ;;  %v4578_v46 = vpop.f32.mrb[199].mxu1 }
 0x289   : > { %8592 = vst.msk [vmem:[%s11846_s24 + $0x304] sm:$0xf] %vm8398_vm1, %v10198_v37  ;;  %v10203_v47 = vpack.c.bf16 %v6036_v43, %v6036_v43  ;;  %v6292_v48 = vsel %vm5268_vm10, %v11236_v31, %v5780_v39  ;;  %vm5266_vm12 = vcmp.ge.f32.partialorder %v4575_v36, 0.0  ;;  %v5778_v49 = vmul.f32 0.2, %v4575_v36  ;;  %v10984_v62 = vpop.f32.mrb[200].mxu0 }
 0x28a   : > { %8848 = vst.msk [vmem:[%s11846_s24 + $0x704] sm:$0xf] %vm8398_vm1, %v10454_v42  ;;  %v10459_v50 = vpack.c.bf16 %v6292_v48, %v6292_v48  ;;  %v6034_v51 = vsel %vm5010_vm11, %v3551_v35, %v5522_v44  ;;  %vm5013_vm13 = vcmp.ge.f32.partialorder %v10981_v40, 0.0  ;;  %v5525_v52 = vmul.f32 0.2, %v10981_v40  ;;  %v11240_v63 = vpop.f32.mrb[200].mxu1 }
 0x28b   : > { %8597 = vst.msk [vmem:[%s11846_s24 + $0x318] sm:$0xf] %vm8398_vm1, %v10203_v47  ;;  %v10201_v53 = vpack.c.bf16 %v6034_v51, %v6034_v51  ;;  %v6290_v54 = vsel %vm5266_vm12, %v4575_v36, %v5778_v49  ;;  %vm5269_vm14 = vcmp.ge.f32.partialorder %v11237_v41, 0.0  ;;  %v5781_v55 = vmul.f32 0.2, %v11237_v41  ;;  %v3567_v3 = vpop.f32.mrb[201].mxu0 }
 0x28c   : > { %8853 = vst.msk [vmem:[%s11846_s24 + $0x718] sm:$0xf] %vm8398_vm1, %v10459_v50  ;;  %v10457_v56 = vpack.c.bf16 %v6290_v54, %v6290_v54  ;;  %v6037_v57 = vsel %vm5013_vm13, %v10981_v40, %v5525_v52  ;;  %vm5011_vm15 = vcmp.ge.f32.partialorder %v3554_v45, 0.0  ;;  %v5523_v58 = vmul.f32 0.2, %v3554_v45  ;;  %v4591_v4 = vpop.f32.mrb[201].mxu1 }
 0x28d   : > { %8595 = vst.msk [vmem:[%s11846_s24 + $0x310] sm:$0xf] %vm8398_vm1, %v10201_v53  ;;  %v10204_v59 = vpack.c.bf16 %v6037_v57, %v6037_v57  ;;  %v6293_v60 = vsel %vm5269_vm14, %v11237_v41, %v5781_v55  ;;  %vm5267_vm2 = vcmp.ge.f32.partialorder %v4578_v46, 0.0  ;;  %v5779_v61 = vmul.f32 0.2, %v4578_v46  ;;  %v10985_v8 = vpop.f32.mrb[202].mxu0 }
 0x28e   : > { %8851 = vst.msk [vmem:[%s11846_s24 + $0x710] sm:$0xf] %vm8398_vm1, %v10457_v56  ;;  %v10460_v0 = vpack.c.bf16 %v6293_v60, %v6293_v60  ;;  %v6035_v1 = vsel %vm5011_vm15, %v3554_v45, %v5523_v58  ;;  %vm5016_vm3 = vcmp.ge.f32.partialorder %v10984_v62, 0.0  ;;  %v5528_v2 = vmul.f32 0.2, %v10984_v62  ;;  %v11241_v9 = vpop.f32.mrb[202].mxu1 }
 0x28f   : > { %8598 = vst.msk [vmem:[%s11846_s24 + $0x31c] sm:$0xf] %vm8398_vm1, %v10204_v59  ;;  %v10202_v5 = vpack.c.bf16 %v6035_v1, %v6035_v1  ;;  %v6291_v6 = vsel %vm5267_vm2, %v4578_v46, %v5779_v61  ;;  %vm5272_vm0 = vcmp.ge.f32.partialorder %v11240_v63, 0.0  ;;  %v5784_v7 = vmul.f32 0.2, %v11240_v63  ;;  %v3570_v13 = vpop.f32.mrb[203].mxu0 }
 0x290   : > { %8854 = vst.msk [vmem:[%s11846_s24 + $0x71c] sm:$0xf] %vm8398_vm1, %v10460_v0  ;;  %v10458_v10 = vpack.c.bf16 %v6291_v6, %v6291_v6  ;;  %v6040_v11 = vsel %vm5016_vm3, %v10984_v62, %v5528_v2  ;;  %vm5014_vm4 = vcmp.ge.f32.partialorder %v3567_v3, 0.0  ;;  %v5526_v12 = vmul.f32 0.2, %v3567_v3  ;;  %v4594_v14 = vpop.f32.mrb[203].mxu1 }
 0x291   : > { %8596 = vst.msk [vmem:[%s11846_s24 + $0x314] sm:$0xf] %vm8398_vm1, %v10202_v5  ;;  %v10207_v15 = vpack.c.bf16 %v6040_v11, %v6040_v11  ;;  %v6296_v16 = vsel %vm5272_vm0, %v11240_v63, %v5784_v7  ;;  %vm5270_vm5 = vcmp.ge.f32.partialorder %v4591_v4, 0.0  ;;  %v5782_v17 = vmul.f32 0.2, %v4591_v4  ;;  %v10988_v30 = vpop.f32.mrb[204].mxu0 }
 0x292   : > { %8852 = vst.msk [vmem:[%s11846_s24 + $0x714] sm:$0xf] %vm8398_vm1, %v10458_v10  ;;  %v10463_v18 = vpack.c.bf16 %v6296_v16, %v6296_v16  ;;  %v6038_v19 = vsel %vm5014_vm4, %v3567_v3, %v5526_v12  ;;  %vm5017_vm6 = vcmp.ge.f32.partialorder %v10985_v8, 0.0  ;;  %v5529_v20 = vmul.f32 0.2, %v10985_v8  ;;  %v11244_v31 = vpop.f32.mrb[204].mxu1 }
 0x293   : > { %8601 = vst.msk [vmem:[%s11846_s24 + $0x328] sm:$0xf] %vm8398_vm1, %v10207_v15  ;;  %v10205_v21 = vpack.c.bf16 %v6038_v19, %v6038_v19  ;;  %v6294_v22 = vsel %vm5270_vm5, %v4591_v4, %v5782_v17  ;;  %vm5273_vm7 = vcmp.ge.f32.partialorder %v11241_v9, 0.0  ;;  %v5785_v23 = vmul.f32 0.2, %v11241_v9  ;;  %v3583_v35 = vpop.f32.mrb[205].mxu0 }
 0x294   : > { %8857 = vst.msk [vmem:[%s11846_s24 + $0x728] sm:$0xf] %vm8398_vm1, %v10463_v18  ;;  %v10461_v24 = vpack.c.bf16 %v6294_v22, %v6294_v22  ;;  %v6041_v25 = vsel %vm5017_vm6, %v10985_v8, %v5529_v20  ;;  %vm5015_vm8 = vcmp.ge.f32.partialorder %v3570_v13, 0.0  ;;  %v5527_v26 = vmul.f32 0.2, %v3570_v13  ;;  %v4607_v36 = vpop.f32.mrb[205].mxu1 }
 0x295   : > { %8599 = vst.msk [vmem:[%s11846_s24 + $0x320] sm:$0xf] %vm8398_vm1, %v10205_v21  ;;  %v10208_v27 = vpack.c.bf16 %v6041_v25, %v6041_v25  ;;  %v6297_v28 = vsel %vm5273_vm7, %v11241_v9, %v5785_v23  ;;  %vm5271_vm9 = vcmp.ge.f32.partialorder %v4594_v14, 0.0  ;;  %v5783_v29 = vmul.f32 0.2, %v4594_v14  ;;  %v10989_v40 = vpop.f32.mrb[206].mxu0 }
 0x296   : > { %8855 = vst.msk [vmem:[%s11846_s24 + $0x720] sm:$0xf] %vm8398_vm1, %v10461_v24  ;;  %v10464_v32 = vpack.c.bf16 %v6297_v28, %v6297_v28  ;;  %v6039_v33 = vsel %vm5015_vm8, %v3570_v13, %v5527_v26  ;;  %vm5020_vm10 = vcmp.ge.f32.partialorder %v10988_v30, 0.0  ;;  %v5532_v34 = vmul.f32 0.2, %v10988_v30  ;;  %v11245_v41 = vpop.f32.mrb[206].mxu1 }
 0x297   : > { %8602 = vst.msk [vmem:[%s11846_s24 + $0x32c] sm:$0xf] %vm8398_vm1, %v10208_v27  ;;  %v10206_v37 = vpack.c.bf16 %v6039_v33, %v6039_v33  ;;  %v6295_v38 = vsel %vm5271_vm9, %v4594_v14, %v5783_v29  ;;  %vm5276_vm11 = vcmp.ge.f32.partialorder %v11244_v31, 0.0  ;;  %v5788_v39 = vmul.f32 0.2, %v11244_v31  ;;  %v3586_v45 = vpop.f32.mrb[207].mxu0 }
 0x298   : > { %8858 = vst.msk [vmem:[%s11846_s24 + $0x72c] sm:$0xf] %vm8398_vm1, %v10464_v32  ;;  %v10462_v42 = vpack.c.bf16 %v6295_v38, %v6295_v38  ;;  %v6044_v43 = vsel %vm5020_vm10, %v10988_v30, %v5532_v34  ;;  %vm5018_vm12 = vcmp.ge.f32.partialorder %v3583_v35, 0.0  ;;  %v5530_v44 = vmul.f32 0.2, %v3583_v35  ;;  %v4610_v46 = vpop.f32.mrb[207].mxu1 }
 0x299   : > { %8600 = vst.msk [vmem:[%s11846_s24 + $0x324] sm:$0xf] %vm8398_vm1, %v10206_v37  ;;  %v10211_v47 = vpack.c.bf16 %v6044_v43, %v6044_v43  ;;  %v6300_v48 = vsel %vm5276_vm11, %v11244_v31, %v5788_v39  ;;  %vm5274_vm13 = vcmp.ge.f32.partialorder %v4607_v36, 0.0  ;;  %v5786_v49 = vmul.f32 0.2, %v4607_v36  ;;  %v10992_v62 = vpop.f32.mrb[208].mxu0 }
 0x29a   : > { %8856 = vst.msk [vmem:[%s11846_s24 + $0x724] sm:$0xf] %vm8398_vm1, %v10462_v42  ;;  %v10467_v50 = vpack.c.bf16 %v6300_v48, %v6300_v48  ;;  %v6042_v51 = vsel %vm5018_vm12, %v3583_v35, %v5530_v44  ;;  %vm5021_vm14 = vcmp.ge.f32.partialorder %v10989_v40, 0.0  ;;  %v5533_v52 = vmul.f32 0.2, %v10989_v40  ;;  %v11248_v63 = vpop.f32.mrb[208].mxu1 }
 0x29b   : > { %8605 = vst.msk [vmem:[%s11846_s24 + $0x338] sm:$0xf] %vm8398_vm1, %v10211_v47  ;;  %v10209_v53 = vpack.c.bf16 %v6042_v51, %v6042_v51  ;;  %v6298_v54 = vsel %vm5274_vm13, %v4607_v36, %v5786_v49  ;;  %vm5277_vm15 = vcmp.ge.f32.partialorder %v11245_v41, 0.0  ;;  %v5789_v55 = vmul.f32 0.2, %v11245_v41  ;;  %v3599_v3 = vpop.f32.mrb[209].mxu0 }
 0x29c   : > { %8861 = vst.msk [vmem:[%s11846_s24 + $0x738] sm:$0xf] %vm8398_vm1, %v10467_v50  ;;  %v10465_v56 = vpack.c.bf16 %v6298_v54, %v6298_v54  ;;  %v6045_v57 = vsel %vm5021_vm14, %v10989_v40, %v5533_v52  ;;  %vm5019_vm2 = vcmp.ge.f32.partialorder %v3586_v45, 0.0  ;;  %v5531_v58 = vmul.f32 0.2, %v3586_v45  ;;  %v4623_v4 = vpop.f32.mrb[209].mxu1 }
 0x29d   : > { %8603 = vst.msk [vmem:[%s11846_s24 + $0x330] sm:$0xf] %vm8398_vm1, %v10209_v53  ;;  %v10212_v59 = vpack.c.bf16 %v6045_v57, %v6045_v57  ;;  %v6301_v60 = vsel %vm5277_vm15, %v11245_v41, %v5789_v55  ;;  %vm5275_vm3 = vcmp.ge.f32.partialorder %v4610_v46, 0.0  ;;  %v5787_v61 = vmul.f32 0.2, %v4610_v46  ;;  %v10993_v8 = vpop.f32.mrb[210].mxu0 }
 0x29e   : > { %8859 = vst.msk [vmem:[%s11846_s24 + $0x730] sm:$0xf] %vm8398_vm1, %v10465_v56  ;;  %v10468_v0 = vpack.c.bf16 %v6301_v60, %v6301_v60  ;;  %v6043_v1 = vsel %vm5019_vm2, %v3586_v45, %v5531_v58  ;;  %vm5024_vm0 = vcmp.ge.f32.partialorder %v10992_v62, 0.0  ;;  %v5536_v2 = vmul.f32 0.2, %v10992_v62  ;;  %v11249_v9 = vpop.f32.mrb[210].mxu1 }
 0x29f   : > { %8606 = vst.msk [vmem:[%s11846_s24 + $0x33c] sm:$0xf] %vm8398_vm1, %v10212_v59  ;;  %v10210_v5 = vpack.c.bf16 %v6043_v1, %v6043_v1  ;;  %v6299_v6 = vsel %vm5275_vm3, %v4610_v46, %v5787_v61  ;;  %vm5280_vm4 = vcmp.ge.f32.partialorder %v11248_v63, 0.0  ;;  %v5792_v7 = vmul.f32 0.2, %v11248_v63  ;;  %v3602_v13 = vpop.f32.mrb[211].mxu0 }
 0x2a0   : > { %8862 = vst.msk [vmem:[%s11846_s24 + $0x73c] sm:$0xf] %vm8398_vm1, %v10468_v0  ;;  %v10466_v10 = vpack.c.bf16 %v6299_v6, %v6299_v6  ;;  %v6048_v11 = vsel %vm5024_vm0, %v10992_v62, %v5536_v2  ;;  %vm5022_vm5 = vcmp.ge.f32.partialorder %v3599_v3, 0.0  ;;  %v5534_v12 = vmul.f32 0.2, %v3599_v3  ;;  %v4626_v14 = vpop.f32.mrb[211].mxu1 }
 0x2a1   : > { %8604 = vst.msk [vmem:[%s11846_s24 + $0x334] sm:$0xf] %vm8398_vm1, %v10210_v5  ;;  %v10215_v15 = vpack.c.bf16 %v6048_v11, %v6048_v11  ;;  %v6304_v16 = vsel %vm5280_vm4, %v11248_v63, %v5792_v7  ;;  %vm5278_vm6 = vcmp.ge.f32.partialorder %v4623_v4, 0.0  ;;  %v5790_v17 = vmul.f32 0.2, %v4623_v4  ;;  %v10996_v30 = vpop.f32.mrb[212].mxu0 }
 0x2a2   : > { %8860 = vst.msk [vmem:[%s11846_s24 + $0x734] sm:$0xf] %vm8398_vm1, %v10466_v10  ;;  %v10471_v18 = vpack.c.bf16 %v6304_v16, %v6304_v16  ;;  %v6046_v19 = vsel %vm5022_vm5, %v3599_v3, %v5534_v12  ;;  %vm5025_vm7 = vcmp.ge.f32.partialorder %v10993_v8, 0.0  ;;  %v5537_v20 = vmul.f32 0.2, %v10993_v8  ;;  %v11252_v31 = vpop.f32.mrb[212].mxu1 }
 0x2a3   : > { %8609 = vst.msk [vmem:[%s11846_s24 + $0x348] sm:$0xf] %vm8398_vm1, %v10215_v15  ;;  %v10213_v21 = vpack.c.bf16 %v6046_v19, %v6046_v19  ;;  %v6302_v22 = vsel %vm5278_vm6, %v4623_v4, %v5790_v17  ;;  %vm5281_vm8 = vcmp.ge.f32.partialorder %v11249_v9, 0.0  ;;  %v5793_v23 = vmul.f32 0.2, %v11249_v9  ;;  %v3615_v35 = vpop.f32.mrb[213].mxu0 }
 0x2a4   : > { %8865 = vst.msk [vmem:[%s11846_s24 + $0x748] sm:$0xf] %vm8398_vm1, %v10471_v18  ;;  %v10469_v24 = vpack.c.bf16 %v6302_v22, %v6302_v22  ;;  %v6049_v25 = vsel %vm5025_vm7, %v10993_v8, %v5537_v20  ;;  %vm5023_vm9 = vcmp.ge.f32.partialorder %v3602_v13, 0.0  ;;  %v5535_v26 = vmul.f32 0.2, %v3602_v13  ;;  %v4639_v36 = vpop.f32.mrb[213].mxu1 }
 0x2a5   : > { %8607 = vst.msk [vmem:[%s11846_s24 + $0x340] sm:$0xf] %vm8398_vm1, %v10213_v21  ;;  %v10216_v27 = vpack.c.bf16 %v6049_v25, %v6049_v25  ;;  %v6305_v28 = vsel %vm5281_vm8, %v11249_v9, %v5793_v23  ;;  %vm5279_vm10 = vcmp.ge.f32.partialorder %v4626_v14, 0.0  ;;  %v5791_v29 = vmul.f32 0.2, %v4626_v14  ;;  %v10997_v40 = vpop.f32.mrb[214].mxu0 }
 0x2a6   : > { %8863 = vst.msk [vmem:[%s11846_s24 + $0x740] sm:$0xf] %vm8398_vm1, %v10469_v24  ;;  %v10472_v32 = vpack.c.bf16 %v6305_v28, %v6305_v28  ;;  %v6047_v33 = vsel %vm5023_vm9, %v3602_v13, %v5535_v26  ;;  %vm5028_vm11 = vcmp.ge.f32.partialorder %v10996_v30, 0.0  ;;  %v5540_v34 = vmul.f32 0.2, %v10996_v30  ;;  %v11253_v41 = vpop.f32.mrb[214].mxu1 }
 0x2a7   : > { %8610 = vst.msk [vmem:[%s11846_s24 + $0x34c] sm:$0xf] %vm8398_vm1, %v10216_v27  ;;  %v10214_v37 = vpack.c.bf16 %v6047_v33, %v6047_v33  ;;  %v6303_v38 = vsel %vm5279_vm10, %v4626_v14, %v5791_v29  ;;  %vm5284_vm12 = vcmp.ge.f32.partialorder %v11252_v31, 0.0  ;;  %v5796_v39 = vmul.f32 0.2, %v11252_v31  ;;  %v3618_v45 = vpop.f32.mrb[215].mxu0 }
 0x2a8   : > { %8866 = vst.msk [vmem:[%s11846_s24 + $0x74c] sm:$0xf] %vm8398_vm1, %v10472_v32  ;;  %v10470_v42 = vpack.c.bf16 %v6303_v38, %v6303_v38  ;;  %v6052_v43 = vsel %vm5028_vm11, %v10996_v30, %v5540_v34  ;;  %vm5026_vm13 = vcmp.ge.f32.partialorder %v3615_v35, 0.0  ;;  %v5538_v44 = vmul.f32 0.2, %v3615_v35  ;;  %v4642_v46 = vpop.f32.mrb[215].mxu1 }
 0x2a9   : > { %8608 = vst.msk [vmem:[%s11846_s24 + $0x344] sm:$0xf] %vm8398_vm1, %v10214_v37  ;;  %v10219_v47 = vpack.c.bf16 %v6052_v43, %v6052_v43  ;;  %v6308_v48 = vsel %vm5284_vm12, %v11252_v31, %v5796_v39  ;;  %vm5282_vm14 = vcmp.ge.f32.partialorder %v4639_v36, 0.0  ;;  %v5794_v49 = vmul.f32 0.2, %v4639_v36  ;;  %v11000_v62 = vpop.f32.mrb[216].mxu0 }
 0x2aa   : > { %8864 = vst.msk [vmem:[%s11846_s24 + $0x744] sm:$0xf] %vm8398_vm1, %v10470_v42  ;;  %v10475_v50 = vpack.c.bf16 %v6308_v48, %v6308_v48  ;;  %v6050_v51 = vsel %vm5026_vm13, %v3615_v35, %v5538_v44  ;;  %vm5029_vm15 = vcmp.ge.f32.partialorder %v10997_v40, 0.0  ;;  %v5541_v52 = vmul.f32 0.2, %v10997_v40  ;;  %v11256_v63 = vpop.f32.mrb[216].mxu1 }
 0x2ab   : > { %8613 = vst.msk [vmem:[%s11846_s24 + $0x358] sm:$0xf] %vm8398_vm1, %v10219_v47  ;;  %v10217_v53 = vpack.c.bf16 %v6050_v51, %v6050_v51  ;;  %v6306_v54 = vsel %vm5282_vm14, %v4639_v36, %v5794_v49  ;;  %vm5285_vm2 = vcmp.ge.f32.partialorder %v11253_v41, 0.0  ;;  %v5797_v55 = vmul.f32 0.2, %v11253_v41  ;;  %v3631_v3 = vpop.f32.mrb[217].mxu0 }
 0x2ac   : > { %8869 = vst.msk [vmem:[%s11846_s24 + $0x758] sm:$0xf] %vm8398_vm1, %v10475_v50  ;;  %v10473_v56 = vpack.c.bf16 %v6306_v54, %v6306_v54  ;;  %v6053_v57 = vsel %vm5029_vm15, %v10997_v40, %v5541_v52  ;;  %vm5027_vm3 = vcmp.ge.f32.partialorder %v3618_v45, 0.0  ;;  %v5539_v58 = vmul.f32 0.2, %v3618_v45  ;;  %v4655_v4 = vpop.f32.mrb[217].mxu1 }
 0x2ad   : > { %8611 = vst.msk [vmem:[%s11846_s24 + $0x350] sm:$0xf] %vm8398_vm1, %v10217_v53  ;;  %v10220_v59 = vpack.c.bf16 %v6053_v57, %v6053_v57  ;;  %v6309_v60 = vsel %vm5285_vm2, %v11253_v41, %v5797_v55  ;;  %vm5283_vm0 = vcmp.ge.f32.partialorder %v4642_v46, 0.0  ;;  %v5795_v61 = vmul.f32 0.2, %v4642_v46  ;;  %v11001_v8 = vpop.f32.mrb[218].mxu0 }
 0x2ae   : > { %8867 = vst.msk [vmem:[%s11846_s24 + $0x750] sm:$0xf] %vm8398_vm1, %v10473_v56  ;;  %v10476_v0 = vpack.c.bf16 %v6309_v60, %v6309_v60  ;;  %v6051_v1 = vsel %vm5027_vm3, %v3618_v45, %v5539_v58  ;;  %vm5032_vm4 = vcmp.ge.f32.partialorder %v11000_v62, 0.0  ;;  %v5544_v2 = vmul.f32 0.2, %v11000_v62  ;;  %v11257_v9 = vpop.f32.mrb[218].mxu1 }
 0x2af   : > { %8614 = vst.msk [vmem:[%s11846_s24 + $0x35c] sm:$0xf] %vm8398_vm1, %v10220_v59  ;;  %v10218_v5 = vpack.c.bf16 %v6051_v1, %v6051_v1  ;;  %v6307_v6 = vsel %vm5283_vm0, %v4642_v46, %v5795_v61  ;;  %vm5288_vm5 = vcmp.ge.f32.partialorder %v11256_v63, 0.0  ;;  %v5800_v7 = vmul.f32 0.2, %v11256_v63  ;;  %v3634_v13 = vpop.f32.mrb[219].mxu0 }
 0x2b0   : > { %8870 = vst.msk [vmem:[%s11846_s24 + $0x75c] sm:$0xf] %vm8398_vm1, %v10476_v0  ;;  %v10474_v10 = vpack.c.bf16 %v6307_v6, %v6307_v6  ;;  %v6056_v11 = vsel %vm5032_vm4, %v11000_v62, %v5544_v2  ;;  %vm5030_vm6 = vcmp.ge.f32.partialorder %v3631_v3, 0.0  ;;  %v5542_v12 = vmul.f32 0.2, %v3631_v3  ;;  %v4658_v14 = vpop.f32.mrb[219].mxu1 }
 0x2b1   : > { %8612 = vst.msk [vmem:[%s11846_s24 + $0x354] sm:$0xf] %vm8398_vm1, %v10218_v5  ;;  %v10223_v15 = vpack.c.bf16 %v6056_v11, %v6056_v11  ;;  %v6312_v16 = vsel %vm5288_vm5, %v11256_v63, %v5800_v7  ;;  %vm5286_vm7 = vcmp.ge.f32.partialorder %v4655_v4, 0.0  ;;  %v5798_v17 = vmul.f32 0.2, %v4655_v4  ;;  %v11004_v30 = vpop.f32.mrb[220].mxu0 }
 0x2b2   : > { %8868 = vst.msk [vmem:[%s11846_s24 + $0x754] sm:$0xf] %vm8398_vm1, %v10474_v10  ;;  %v10479_v18 = vpack.c.bf16 %v6312_v16, %v6312_v16  ;;  %v6054_v19 = vsel %vm5030_vm6, %v3631_v3, %v5542_v12  ;;  %vm5033_vm8 = vcmp.ge.f32.partialorder %v11001_v8, 0.0  ;;  %v5545_v20 = vmul.f32 0.2, %v11001_v8  ;;  %v11260_v31 = vpop.f32.mrb[220].mxu1 }
 0x2b3   : > { %8617 = vst.msk [vmem:[%s11846_s24 + $0x368] sm:$0xf] %vm8398_vm1, %v10223_v15  ;;  %v10221_v21 = vpack.c.bf16 %v6054_v19, %v6054_v19  ;;  %v6310_v22 = vsel %vm5286_vm7, %v4655_v4, %v5798_v17  ;;  %vm5289_vm9 = vcmp.ge.f32.partialorder %v11257_v9, 0.0  ;;  %v5801_v23 = vmul.f32 0.2, %v11257_v9  ;;  %v3647_v35 = vpop.f32.mrb[221].mxu0 }
 0x2b4   : > { %8873 = vst.msk [vmem:[%s11846_s24 + $0x768] sm:$0xf] %vm8398_vm1, %v10479_v18  ;;  %v10477_v24 = vpack.c.bf16 %v6310_v22, %v6310_v22  ;;  %v6057_v25 = vsel %vm5033_vm8, %v11001_v8, %v5545_v20  ;;  %vm5031_vm10 = vcmp.ge.f32.partialorder %v3634_v13, 0.0  ;;  %v5543_v26 = vmul.f32 0.2, %v3634_v13  ;;  %v4671_v36 = vpop.f32.mrb[221].mxu1 }
 0x2b5   : > { %8615 = vst.msk [vmem:[%s11846_s24 + $0x360] sm:$0xf] %vm8398_vm1, %v10221_v21  ;;  %v10224_v27 = vpack.c.bf16 %v6057_v25, %v6057_v25  ;;  %v6313_v28 = vsel %vm5289_vm9, %v11257_v9, %v5801_v23  ;;  %vm5287_vm11 = vcmp.ge.f32.partialorder %v4658_v14, 0.0  ;;  %v5799_v29 = vmul.f32 0.2, %v4658_v14  ;;  %v11005_v40 = vpop.f32.mrb[222].mxu0 }
 0x2b6   : > { %8871 = vst.msk [vmem:[%s11846_s24 + $0x760] sm:$0xf] %vm8398_vm1, %v10477_v24  ;;  %v10480_v32 = vpack.c.bf16 %v6313_v28, %v6313_v28  ;;  %v6055_v33 = vsel %vm5031_vm10, %v3634_v13, %v5543_v26  ;;  %vm5036_vm12 = vcmp.ge.f32.partialorder %v11004_v30, 0.0  ;;  %v5548_v34 = vmul.f32 0.2, %v11004_v30  ;;  %v11261_v41 = vpop.f32.mrb[222].mxu1 }
 0x2b7   : > { %8618 = vst.msk [vmem:[%s11846_s24 + $0x36c] sm:$0xf] %vm8398_vm1, %v10224_v27  ;;  %v10222_v37 = vpack.c.bf16 %v6055_v33, %v6055_v33  ;;  %v6311_v38 = vsel %vm5287_vm11, %v4658_v14, %v5799_v29  ;;  %vm5292_vm13 = vcmp.ge.f32.partialorder %v11260_v31, 0.0  ;;  %v5804_v39 = vmul.f32 0.2, %v11260_v31  ;;  %v3650_v45 = vpop.f32.mrb[223].mxu0 }
 0x2b8   : > { %8874 = vst.msk [vmem:[%s11846_s24 + $0x76c] sm:$0xf] %vm8398_vm1, %v10480_v32  ;;  %v10478_v42 = vpack.c.bf16 %v6311_v38, %v6311_v38  ;;  %v6060_v43 = vsel %vm5036_vm12, %v11004_v30, %v5548_v34  ;;  %vm5034_vm14 = vcmp.ge.f32.partialorder %v3647_v35, 0.0  ;;  %v5546_v44 = vmul.f32 0.2, %v3647_v35  ;;  %v4674_v46 = vpop.f32.mrb[223].mxu1 }
 0x2b9   : > { %8616 = vst.msk [vmem:[%s11846_s24 + $0x364] sm:$0xf] %vm8398_vm1, %v10222_v37  ;;  %v10227_v47 = vpack.c.bf16 %v6060_v43, %v6060_v43  ;;  %v6316_v48 = vsel %vm5292_vm13, %v11260_v31, %v5804_v39  ;;  %vm5290_vm15 = vcmp.ge.f32.partialorder %v4671_v36, 0.0  ;;  %v5802_v49 = vmul.f32 0.2, %v4671_v36  ;;  %v11008_v62 = vpop.f32.mrb[224].mxu0 }
 0x2ba   : > { %8872 = vst.msk [vmem:[%s11846_s24 + $0x764] sm:$0xf] %vm8398_vm1, %v10478_v42  ;;  %v10483_v50 = vpack.c.bf16 %v6316_v48, %v6316_v48  ;;  %v6058_v51 = vsel %vm5034_vm14, %v3647_v35, %v5546_v44  ;;  %vm5037_vm2 = vcmp.ge.f32.partialorder %v11005_v40, 0.0  ;;  %v5549_v52 = vmul.f32 0.2, %v11005_v40  ;;  %v11264_v63 = vpop.f32.mrb[224].mxu1 }
 0x2bb   : > { %8621 = vst.msk [vmem:[%s11846_s24 + $0x378] sm:$0xf] %vm8398_vm1, %v10227_v47  ;;  %v10225_v53 = vpack.c.bf16 %v6058_v51, %v6058_v51  ;;  %v6314_v54 = vsel %vm5290_vm15, %v4671_v36, %v5802_v49  ;;  %vm5293_vm3 = vcmp.ge.f32.partialorder %v11261_v41, 0.0  ;;  %v5805_v55 = vmul.f32 0.2, %v11261_v41  ;;  %v3663_v3 = vpop.f32.mrb[225].mxu0 }
 0x2bc   : > { %8877 = vst.msk [vmem:[%s11846_s24 + $0x778] sm:$0xf] %vm8398_vm1, %v10483_v50  ;;  %v10481_v56 = vpack.c.bf16 %v6314_v54, %v6314_v54  ;;  %v6061_v57 = vsel %vm5037_vm2, %v11005_v40, %v5549_v52  ;;  %vm5035_vm0 = vcmp.ge.f32.partialorder %v3650_v45, 0.0  ;;  %v5547_v58 = vmul.f32 0.2, %v3650_v45  ;;  %v4687_v4 = vpop.f32.mrb[225].mxu1 }
 0x2bd   : > { %8619 = vst.msk [vmem:[%s11846_s24 + $0x370] sm:$0xf] %vm8398_vm1, %v10225_v53  ;;  %v10228_v59 = vpack.c.bf16 %v6061_v57, %v6061_v57  ;;  %v6317_v60 = vsel %vm5293_vm3, %v11261_v41, %v5805_v55  ;;  %vm5291_vm4 = vcmp.ge.f32.partialorder %v4674_v46, 0.0  ;;  %v5803_v61 = vmul.f32 0.2, %v4674_v46  ;;  %v11009_v8 = vpop.f32.mrb[226].mxu0 }
 0x2be   : > { %8875 = vst.msk [vmem:[%s11846_s24 + $0x770] sm:$0xf] %vm8398_vm1, %v10481_v56  ;;  %v10484_v0 = vpack.c.bf16 %v6317_v60, %v6317_v60  ;;  %v6059_v1 = vsel %vm5035_vm0, %v3650_v45, %v5547_v58  ;;  %vm5040_vm5 = vcmp.ge.f32.partialorder %v11008_v62, 0.0  ;;  %v5552_v2 = vmul.f32 0.2, %v11008_v62  ;;  %v11265_v9 = vpop.f32.mrb[226].mxu1 }
 0x2bf   : > { %8622 = vst.msk [vmem:[%s11846_s24 + $0x37c] sm:$0xf] %vm8398_vm1, %v10228_v59  ;;  %v10226_v5 = vpack.c.bf16 %v6059_v1, %v6059_v1  ;;  %v6315_v6 = vsel %vm5291_vm4, %v4674_v46, %v5803_v61  ;;  %vm5296_vm6 = vcmp.ge.f32.partialorder %v11264_v63, 0.0  ;;  %v5808_v7 = vmul.f32 0.2, %v11264_v63  ;;  %v3666_v13 = vpop.f32.mrb[227].mxu0 }
 0x2c0   : > { %8878 = vst.msk [vmem:[%s11846_s24 + $0x77c] sm:$0xf] %vm8398_vm1, %v10484_v0  ;;  %v10482_v10 = vpack.c.bf16 %v6315_v6, %v6315_v6  ;;  %v6064_v11 = vsel %vm5040_vm5, %v11008_v62, %v5552_v2  ;;  %vm5038_vm7 = vcmp.ge.f32.partialorder %v3663_v3, 0.0  ;;  %v5550_v12 = vmul.f32 0.2, %v3663_v3  ;;  %v4690_v14 = vpop.f32.mrb[227].mxu1 }
 0x2c1   : > { %8620 = vst.msk [vmem:[%s11846_s24 + $0x374] sm:$0xf] %vm8398_vm1, %v10226_v5  ;;  %v10231_v15 = vpack.c.bf16 %v6064_v11, %v6064_v11  ;;  %v6320_v16 = vsel %vm5296_vm6, %v11264_v63, %v5808_v7  ;;  %vm5294_vm8 = vcmp.ge.f32.partialorder %v4687_v4, 0.0  ;;  %v5806_v17 = vmul.f32 0.2, %v4687_v4  ;;  %v11012_v30 = vpop.f32.mrb[228].mxu0 }
 0x2c2   : > { %8876 = vst.msk [vmem:[%s11846_s24 + $0x774] sm:$0xf] %vm8398_vm1, %v10482_v10  ;;  %v10487_v18 = vpack.c.bf16 %v6320_v16, %v6320_v16  ;;  %v6062_v19 = vsel %vm5038_vm7, %v3663_v3, %v5550_v12  ;;  %vm5041_vm9 = vcmp.ge.f32.partialorder %v11009_v8, 0.0  ;;  %v5553_v20 = vmul.f32 0.2, %v11009_v8  ;;  %v11268_v31 = vpop.f32.mrb[228].mxu1 }
 0x2c3   : > { %8625 = vst.msk [vmem:[%s11846_s24 + $0x388] sm:$0xf] %vm8398_vm1, %v10231_v15  ;;  %v10229_v21 = vpack.c.bf16 %v6062_v19, %v6062_v19  ;;  %v6318_v22 = vsel %vm5294_vm8, %v4687_v4, %v5806_v17  ;;  %vm5297_vm10 = vcmp.ge.f32.partialorder %v11265_v9, 0.0  ;;  %v5809_v23 = vmul.f32 0.2, %v11265_v9  ;;  %v3679_v35 = vpop.f32.mrb[229].mxu0 }
 0x2c4   : > { %8881 = vst.msk [vmem:[%s11846_s24 + $0x788] sm:$0xf] %vm8398_vm1, %v10487_v18  ;;  %v10485_v24 = vpack.c.bf16 %v6318_v22, %v6318_v22  ;;  %v6065_v25 = vsel %vm5041_vm9, %v11009_v8, %v5553_v20  ;;  %vm5039_vm11 = vcmp.ge.f32.partialorder %v3666_v13, 0.0  ;;  %v5551_v26 = vmul.f32 0.2, %v3666_v13  ;;  %v4703_v36 = vpop.f32.mrb[229].mxu1 }
 0x2c5   : > { %8623 = vst.msk [vmem:[%s11846_s24 + $0x380] sm:$0xf] %vm8398_vm1, %v10229_v21  ;;  %v10232_v27 = vpack.c.bf16 %v6065_v25, %v6065_v25  ;;  %v6321_v28 = vsel %vm5297_vm10, %v11265_v9, %v5809_v23  ;;  %vm5295_vm12 = vcmp.ge.f32.partialorder %v4690_v14, 0.0  ;;  %v5807_v29 = vmul.f32 0.2, %v4690_v14  ;;  %v11013_v40 = vpop.f32.mrb[230].mxu0 }
 0x2c6   : > { %8879 = vst.msk [vmem:[%s11846_s24 + $0x780] sm:$0xf] %vm8398_vm1, %v10485_v24  ;;  %v10488_v32 = vpack.c.bf16 %v6321_v28, %v6321_v28  ;;  %v6063_v33 = vsel %vm5039_vm11, %v3666_v13, %v5551_v26  ;;  %vm5044_vm13 = vcmp.ge.f32.partialorder %v11012_v30, 0.0  ;;  %v5556_v34 = vmul.f32 0.2, %v11012_v30  ;;  %v11269_v41 = vpop.f32.mrb[230].mxu1 }
 0x2c7   : > { %8626 = vst.msk [vmem:[%s11846_s24 + $0x38c] sm:$0xf] %vm8398_vm1, %v10232_v27  ;;  %v10230_v37 = vpack.c.bf16 %v6063_v33, %v6063_v33  ;;  %v6319_v38 = vsel %vm5295_vm12, %v4690_v14, %v5807_v29  ;;  %vm5300_vm14 = vcmp.ge.f32.partialorder %v11268_v31, 0.0  ;;  %v5812_v39 = vmul.f32 0.2, %v11268_v31  ;;  %v3682_v45 = vpop.f32.mrb[231].mxu0 }
 0x2c8   : > { %8882 = vst.msk [vmem:[%s11846_s24 + $0x78c] sm:$0xf] %vm8398_vm1, %v10488_v32  ;;  %v10486_v42 = vpack.c.bf16 %v6319_v38, %v6319_v38  ;;  %v6068_v43 = vsel %vm5044_vm13, %v11012_v30, %v5556_v34  ;;  %vm5042_vm15 = vcmp.ge.f32.partialorder %v3679_v35, 0.0  ;;  %v5554_v44 = vmul.f32 0.2, %v3679_v35  ;;  %v4706_v46 = vpop.f32.mrb[231].mxu1 }
 0x2c9   : > { %8624 = vst.msk [vmem:[%s11846_s24 + $0x384] sm:$0xf] %vm8398_vm1, %v10230_v37  ;;  %v10235_v47 = vpack.c.bf16 %v6068_v43, %v6068_v43  ;;  %v6324_v48 = vsel %vm5300_vm14, %v11268_v31, %v5812_v39  ;;  %vm5298_vm2 = vcmp.ge.f32.partialorder %v4703_v36, 0.0  ;;  %v5810_v49 = vmul.f32 0.2, %v4703_v36  ;;  %v11016_v62 = vpop.f32.mrb[232].mxu0 }
 0x2ca   : > { %8880 = vst.msk [vmem:[%s11846_s24 + $0x784] sm:$0xf] %vm8398_vm1, %v10486_v42  ;;  %v10491_v50 = vpack.c.bf16 %v6324_v48, %v6324_v48  ;;  %v6066_v51 = vsel %vm5042_vm15, %v3679_v35, %v5554_v44  ;;  %vm5045_vm3 = vcmp.ge.f32.partialorder %v11013_v40, 0.0  ;;  %v5557_v52 = vmul.f32 0.2, %v11013_v40  ;;  %v11272_v63 = vpop.f32.mrb[232].mxu1 }
 0x2cb   : > { %8629 = vst.msk [vmem:[%s11846_s24 + $0x398] sm:$0xf] %vm8398_vm1, %v10235_v47  ;;  %v10233_v53 = vpack.c.bf16 %v6066_v51, %v6066_v51  ;;  %v6322_v54 = vsel %vm5298_vm2, %v4703_v36, %v5810_v49  ;;  %vm5301_vm0 = vcmp.ge.f32.partialorder %v11269_v41, 0.0  ;;  %v5813_v55 = vmul.f32 0.2, %v11269_v41  ;;  %v3695_v3 = vpop.f32.mrb[233].mxu0 }
 0x2cc   : > { %8885 = vst.msk [vmem:[%s11846_s24 + $0x798] sm:$0xf] %vm8398_vm1, %v10491_v50  ;;  %v10489_v56 = vpack.c.bf16 %v6322_v54, %v6322_v54  ;;  %v6069_v57 = vsel %vm5045_vm3, %v11013_v40, %v5557_v52  ;;  %vm5043_vm4 = vcmp.ge.f32.partialorder %v3682_v45, 0.0  ;;  %v5555_v58 = vmul.f32 0.2, %v3682_v45  ;;  %v4719_v4 = vpop.f32.mrb[233].mxu1 }
 0x2cd   : > { %8627 = vst.msk [vmem:[%s11846_s24 + $0x390] sm:$0xf] %vm8398_vm1, %v10233_v53  ;;  %v10236_v59 = vpack.c.bf16 %v6069_v57, %v6069_v57  ;;  %v6325_v60 = vsel %vm5301_vm0, %v11269_v41, %v5813_v55  ;;  %vm5299_vm5 = vcmp.ge.f32.partialorder %v4706_v46, 0.0  ;;  %v5811_v61 = vmul.f32 0.2, %v4706_v46  ;;  %v11017_v8 = vpop.f32.mrb[234].mxu0 }
 0x2ce   : > { %8883 = vst.msk [vmem:[%s11846_s24 + $0x790] sm:$0xf] %vm8398_vm1, %v10489_v56  ;;  %v10492_v0 = vpack.c.bf16 %v6325_v60, %v6325_v60  ;;  %v6067_v1 = vsel %vm5043_vm4, %v3682_v45, %v5555_v58  ;;  %vm5048_vm6 = vcmp.ge.f32.partialorder %v11016_v62, 0.0  ;;  %v5560_v2 = vmul.f32 0.2, %v11016_v62  ;;  %v11273_v9 = vpop.f32.mrb[234].mxu1 }
 0x2cf   : > { %8630 = vst.msk [vmem:[%s11846_s24 + $0x39c] sm:$0xf] %vm8398_vm1, %v10236_v59  ;;  %v10234_v5 = vpack.c.bf16 %v6067_v1, %v6067_v1  ;;  %v6323_v6 = vsel %vm5299_vm5, %v4706_v46, %v5811_v61  ;;  %vm5304_vm7 = vcmp.ge.f32.partialorder %v11272_v63, 0.0  ;;  %v5816_v7 = vmul.f32 0.2, %v11272_v63  ;;  %v3698_v13 = vpop.f32.mrb[235].mxu0 }
 0x2d0   : > { %8886 = vst.msk [vmem:[%s11846_s24 + $0x79c] sm:$0xf] %vm8398_vm1, %v10492_v0  ;;  %v10490_v10 = vpack.c.bf16 %v6323_v6, %v6323_v6  ;;  %v6072_v11 = vsel %vm5048_vm6, %v11016_v62, %v5560_v2  ;;  %vm5046_vm8 = vcmp.ge.f32.partialorder %v3695_v3, 0.0  ;;  %v5558_v12 = vmul.f32 0.2, %v3695_v3  ;;  %v4722_v14 = vpop.f32.mrb[235].mxu1 }
 0x2d1   : > { %8628 = vst.msk [vmem:[%s11846_s24 + $0x394] sm:$0xf] %vm8398_vm1, %v10234_v5  ;;  %v10239_v15 = vpack.c.bf16 %v6072_v11, %v6072_v11  ;;  %v6328_v16 = vsel %vm5304_vm7, %v11272_v63, %v5816_v7  ;;  %vm5302_vm9 = vcmp.ge.f32.partialorder %v4719_v4, 0.0  ;;  %v5814_v17 = vmul.f32 0.2, %v4719_v4  ;;  %v11020_v30 = vpop.f32.mrb[236].mxu0 }
 0x2d2   : > { %8884 = vst.msk [vmem:[%s11846_s24 + $0x794] sm:$0xf] %vm8398_vm1, %v10490_v10  ;;  %v10495_v18 = vpack.c.bf16 %v6328_v16, %v6328_v16  ;;  %v6070_v19 = vsel %vm5046_vm8, %v3695_v3, %v5558_v12  ;;  %vm5049_vm10 = vcmp.ge.f32.partialorder %v11017_v8, 0.0  ;;  %v5561_v20 = vmul.f32 0.2, %v11017_v8  ;;  %v11276_v31 = vpop.f32.mrb[236].mxu1 }
 0x2d3   : > { %8633 = vst.msk [vmem:[%s11846_s24 + $0x3a8] sm:$0xf] %vm8398_vm1, %v10239_v15  ;;  %v10237_v21 = vpack.c.bf16 %v6070_v19, %v6070_v19  ;;  %v6326_v22 = vsel %vm5302_vm9, %v4719_v4, %v5814_v17  ;;  %vm5305_vm11 = vcmp.ge.f32.partialorder %v11273_v9, 0.0  ;;  %v5817_v23 = vmul.f32 0.2, %v11273_v9  ;;  %v3711_v35 = vpop.f32.mrb[237].mxu0 }
 0x2d4   : > { %8889 = vst.msk [vmem:[%s11846_s24 + $0x7a8] sm:$0xf] %vm8398_vm1, %v10495_v18  ;;  %v10493_v24 = vpack.c.bf16 %v6326_v22, %v6326_v22  ;;  %v6073_v25 = vsel %vm5049_vm10, %v11017_v8, %v5561_v20  ;;  %vm5047_vm12 = vcmp.ge.f32.partialorder %v3698_v13, 0.0  ;;  %v5559_v26 = vmul.f32 0.2, %v3698_v13  ;;  %v4735_v36 = vpop.f32.mrb[237].mxu1 }
 0x2d5   : > { %8631 = vst.msk [vmem:[%s11846_s24 + $0x3a0] sm:$0xf] %vm8398_vm1, %v10237_v21  ;;  %v10240_v27 = vpack.c.bf16 %v6073_v25, %v6073_v25  ;;  %v6329_v28 = vsel %vm5305_vm11, %v11273_v9, %v5817_v23  ;;  %vm5303_vm13 = vcmp.ge.f32.partialorder %v4722_v14, 0.0  ;;  %v5815_v29 = vmul.f32 0.2, %v4722_v14  ;;  %v11021_v40 = vpop.f32.mrb[238].mxu0 }
 0x2d6   : > { %8887 = vst.msk [vmem:[%s11846_s24 + $0x7a0] sm:$0xf] %vm8398_vm1, %v10493_v24  ;;  %v10496_v32 = vpack.c.bf16 %v6329_v28, %v6329_v28  ;;  %v6071_v33 = vsel %vm5047_vm12, %v3698_v13, %v5559_v26  ;;  %vm5052_vm14 = vcmp.ge.f32.partialorder %v11020_v30, 0.0  ;;  %v5564_v34 = vmul.f32 0.2, %v11020_v30  ;;  %v11277_v41 = vpop.f32.mrb[238].mxu1 }
 0x2d7   : > { %8634 = vst.msk [vmem:[%s11846_s24 + $0x3ac] sm:$0xf] %vm8398_vm1, %v10240_v27  ;;  %v10238_v37 = vpack.c.bf16 %v6071_v33, %v6071_v33  ;;  %v6327_v38 = vsel %vm5303_vm13, %v4722_v14, %v5815_v29  ;;  %vm5308_vm15 = vcmp.ge.f32.partialorder %v11276_v31, 0.0  ;;  %v5820_v39 = vmul.f32 0.2, %v11276_v31  ;;  %v3714_v45 = vpop.f32.mrb[239].mxu0 }
 0x2d8   : > { %8890 = vst.msk [vmem:[%s11846_s24 + $0x7ac] sm:$0xf] %vm8398_vm1, %v10496_v32  ;;  %v10494_v42 = vpack.c.bf16 %v6327_v38, %v6327_v38  ;;  %v6076_v43 = vsel %vm5052_vm14, %v11020_v30, %v5564_v34  ;;  %vm5050_vm2 = vcmp.ge.f32.partialorder %v3711_v35, 0.0  ;;  %v5562_v44 = vmul.f32 0.2, %v3711_v35  ;;  %v4738_v46 = vpop.f32.mrb[239].mxu1 }
 0x2d9   : > { %8632 = vst.msk [vmem:[%s11846_s24 + $0x3a4] sm:$0xf] %vm8398_vm1, %v10238_v37  ;;  %v10243_v47 = vpack.c.bf16 %v6076_v43, %v6076_v43  ;;  %v6332_v48 = vsel %vm5308_vm15, %v11276_v31, %v5820_v39  ;;  %vm5306_vm3 = vcmp.ge.f32.partialorder %v4735_v36, 0.0  ;;  %v5818_v49 = vmul.f32 0.2, %v4735_v36  ;;  %v11024_v62 = vpop.f32.mrb[240].mxu0 }
 0x2da   : > { %8888 = vst.msk [vmem:[%s11846_s24 + $0x7a4] sm:$0xf] %vm8398_vm1, %v10494_v42  ;;  %v10499_v50 = vpack.c.bf16 %v6332_v48, %v6332_v48  ;;  %v6074_v51 = vsel %vm5050_vm2, %v3711_v35, %v5562_v44  ;;  %vm5053_vm0 = vcmp.ge.f32.partialorder %v11021_v40, 0.0  ;;  %v5565_v52 = vmul.f32 0.2, %v11021_v40  ;;  %v11280_v63 = vpop.f32.mrb[240].mxu1 }
 0x2db   : > { %8637 = vst.msk [vmem:[%s11846_s24 + $0x3b8] sm:$0xf] %vm8398_vm1, %v10243_v47  ;;  %v10241_v53 = vpack.c.bf16 %v6074_v51, %v6074_v51  ;;  %v6330_v54 = vsel %vm5306_vm3, %v4735_v36, %v5818_v49  ;;  %vm5309_vm4 = vcmp.ge.f32.partialorder %v11277_v41, 0.0  ;;  %v5821_v55 = vmul.f32 0.2, %v11277_v41  ;;  %v3727_v3 = vpop.f32.mrb[241].mxu0 }
 0x2dc   : > { %8893 = vst.msk [vmem:[%s11846_s24 + $0x7b8] sm:$0xf] %vm8398_vm1, %v10499_v50  ;;  %v10497_v56 = vpack.c.bf16 %v6330_v54, %v6330_v54  ;;  %v6077_v57 = vsel %vm5053_vm0, %v11021_v40, %v5565_v52  ;;  %vm5051_vm5 = vcmp.ge.f32.partialorder %v3714_v45, 0.0  ;;  %v5563_v58 = vmul.f32 0.2, %v3714_v45  ;;  %v4751_v4 = vpop.f32.mrb[241].mxu1 }
 0x2dd   : > { %8635 = vst.msk [vmem:[%s11846_s24 + $0x3b0] sm:$0xf] %vm8398_vm1, %v10241_v53  ;;  %v10244_v59 = vpack.c.bf16 %v6077_v57, %v6077_v57  ;;  %v6333_v60 = vsel %vm5309_vm4, %v11277_v41, %v5821_v55  ;;  %vm5307_vm6 = vcmp.ge.f32.partialorder %v4738_v46, 0.0  ;;  %v5819_v61 = vmul.f32 0.2, %v4738_v46  ;;  %v11025_v8 = vpop.f32.mrb[242].mxu0 }
 0x2de   : > { %8891 = vst.msk [vmem:[%s11846_s24 + $0x7b0] sm:$0xf] %vm8398_vm1, %v10497_v56  ;;  %v10500_v0 = vpack.c.bf16 %v6333_v60, %v6333_v60  ;;  %v6075_v1 = vsel %vm5051_vm5, %v3714_v45, %v5563_v58  ;;  %vm5056_vm7 = vcmp.ge.f32.partialorder %v11024_v62, 0.0  ;;  %v5568_v2 = vmul.f32 0.2, %v11024_v62  ;;  %v11281_v9 = vpop.f32.mrb[242].mxu1 }
 0x2df   : > { %8638 = vst.msk [vmem:[%s11846_s24 + $0x3bc] sm:$0xf] %vm8398_vm1, %v10244_v59  ;;  %v10242_v5 = vpack.c.bf16 %v6075_v1, %v6075_v1  ;;  %v6331_v6 = vsel %vm5307_vm6, %v4738_v46, %v5819_v61  ;;  %vm5312_vm8 = vcmp.ge.f32.partialorder %v11280_v63, 0.0  ;;  %v5824_v7 = vmul.f32 0.2, %v11280_v63  ;;  %v3730_v13 = vpop.f32.mrb[243].mxu0 }
 0x2e0   : > { %8894 = vst.msk [vmem:[%s11846_s24 + $0x7bc] sm:$0xf] %vm8398_vm1, %v10500_v0  ;;  %v10498_v10 = vpack.c.bf16 %v6331_v6, %v6331_v6  ;;  %v6080_v11 = vsel %vm5056_vm7, %v11024_v62, %v5568_v2  ;;  %vm5054_vm9 = vcmp.ge.f32.partialorder %v3727_v3, 0.0  ;;  %v5566_v12 = vmul.f32 0.2, %v3727_v3  ;;  %v4754_v14 = vpop.f32.mrb[243].mxu1 }
 0x2e1   : > { %8636 = vst.msk [vmem:[%s11846_s24 + $0x3b4] sm:$0xf] %vm8398_vm1, %v10242_v5  ;;  %v10247_v15 = vpack.c.bf16 %v6080_v11, %v6080_v11  ;;  %v6336_v16 = vsel %vm5312_vm8, %v11280_v63, %v5824_v7  ;;  %vm5310_vm10 = vcmp.ge.f32.partialorder %v4751_v4, 0.0  ;;  %v5822_v17 = vmul.f32 0.2, %v4751_v4  ;;  %v11028_v30 = vpop.f32.mrb[244].mxu0 }
 0x2e2   : > { %8892 = vst.msk [vmem:[%s11846_s24 + $0x7b4] sm:$0xf] %vm8398_vm1, %v10498_v10  ;;  %v10503_v18 = vpack.c.bf16 %v6336_v16, %v6336_v16  ;;  %v6078_v19 = vsel %vm5054_vm9, %v3727_v3, %v5566_v12  ;;  %vm5057_vm11 = vcmp.ge.f32.partialorder %v11025_v8, 0.0  ;;  %v5569_v20 = vmul.f32 0.2, %v11025_v8  ;;  %v11284_v31 = vpop.f32.mrb[244].mxu1 }
 0x2e3   : > { %8641 = vst.msk [vmem:[%s11846_s24 + $0x3c8] sm:$0xf] %vm8398_vm1, %v10247_v15  ;;  %v10245_v21 = vpack.c.bf16 %v6078_v19, %v6078_v19  ;;  %v6334_v22 = vsel %vm5310_vm10, %v4751_v4, %v5822_v17  ;;  %vm5313_vm12 = vcmp.ge.f32.partialorder %v11281_v9, 0.0  ;;  %v5825_v23 = vmul.f32 0.2, %v11281_v9  ;;  %v3743_v35 = vpop.f32.mrb[245].mxu0 }
 0x2e4   : > { %8897 = vst.msk [vmem:[%s11846_s24 + $0x7c8] sm:$0xf] %vm8398_vm1, %v10503_v18  ;;  %v10501_v24 = vpack.c.bf16 %v6334_v22, %v6334_v22  ;;  %v6081_v25 = vsel %vm5057_vm11, %v11025_v8, %v5569_v20  ;;  %vm5055_vm13 = vcmp.ge.f32.partialorder %v3730_v13, 0.0  ;;  %v5567_v26 = vmul.f32 0.2, %v3730_v13  ;;  %v4767_v36 = vpop.f32.mrb[245].mxu1 }
 0x2e5   : > { %8639 = vst.msk [vmem:[%s11846_s24 + $0x3c0] sm:$0xf] %vm8398_vm1, %v10245_v21  ;;  %v10248_v27 = vpack.c.bf16 %v6081_v25, %v6081_v25  ;;  %v6337_v28 = vsel %vm5313_vm12, %v11281_v9, %v5825_v23  ;;  %vm5311_vm14 = vcmp.ge.f32.partialorder %v4754_v14, 0.0  ;;  %v5823_v29 = vmul.f32 0.2, %v4754_v14  ;;  %v11029_v40 = vpop.f32.mrb[246].mxu0 }
 0x2e6   : > { %8895 = vst.msk [vmem:[%s11846_s24 + $0x7c0] sm:$0xf] %vm8398_vm1, %v10501_v24  ;;  %v10504_v32 = vpack.c.bf16 %v6337_v28, %v6337_v28  ;;  %v6079_v33 = vsel %vm5055_vm13, %v3730_v13, %v5567_v26  ;;  %vm5060_vm15 = vcmp.ge.f32.partialorder %v11028_v30, 0.0  ;;  %v5572_v34 = vmul.f32 0.2, %v11028_v30  ;;  %v11285_v41 = vpop.f32.mrb[246].mxu1 }
 0x2e7   : > { %8642 = vst.msk [vmem:[%s11846_s24 + $0x3cc] sm:$0xf] %vm8398_vm1, %v10248_v27  ;;  %v10246_v37 = vpack.c.bf16 %v6079_v33, %v6079_v33  ;;  %v6335_v38 = vsel %vm5311_vm14, %v4754_v14, %v5823_v29  ;;  %vm5316_vm2 = vcmp.ge.f32.partialorder %v11284_v31, 0.0  ;;  %v5828_v39 = vmul.f32 0.2, %v11284_v31  ;;  %v3746_v45 = vpop.f32.mrb[247].mxu0 }
 0x2e8   : > { %8898 = vst.msk [vmem:[%s11846_s24 + $0x7cc] sm:$0xf] %vm8398_vm1, %v10504_v32  ;;  %v10502_v42 = vpack.c.bf16 %v6335_v38, %v6335_v38  ;;  %v6084_v43 = vsel %vm5060_vm15, %v11028_v30, %v5572_v34  ;;  %vm5058_vm3 = vcmp.ge.f32.partialorder %v3743_v35, 0.0  ;;  %v5570_v44 = vmul.f32 0.2, %v3743_v35  ;;  %v4770_v46 = vpop.f32.mrb[247].mxu1 }
 0x2e9   : > { %8640 = vst.msk [vmem:[%s11846_s24 + $0x3c4] sm:$0xf] %vm8398_vm1, %v10246_v37  ;;  %v10251_v47 = vpack.c.bf16 %v6084_v43, %v6084_v43  ;;  %v6340_v48 = vsel %vm5316_vm2, %v11284_v31, %v5828_v39  ;;  %vm5314_vm0 = vcmp.ge.f32.partialorder %v4767_v36, 0.0  ;;  %v5826_v49 = vmul.f32 0.2, %v4767_v36  ;;  %v11032_v62 = vpop.f32.mrb[248].mxu0 }
 0x2ea   : > { %8896 = vst.msk [vmem:[%s11846_s24 + $0x7c4] sm:$0xf] %vm8398_vm1, %v10502_v42  ;;  %v10507_v50 = vpack.c.bf16 %v6340_v48, %v6340_v48  ;;  %v6082_v51 = vsel %vm5058_vm3, %v3743_v35, %v5570_v44  ;;  %vm5061_vm4 = vcmp.ge.f32.partialorder %v11029_v40, 0.0  ;;  %v5573_v52 = vmul.f32 0.2, %v11029_v40  ;;  %v11288_v63 = vpop.f32.mrb[248].mxu1 }
 0x2eb   : > { %8645 = vst.msk [vmem:[%s11846_s24 + $0x3d8] sm:$0xf] %vm8398_vm1, %v10251_v47  ;;  %v10249_v53 = vpack.c.bf16 %v6082_v51, %v6082_v51  ;;  %v6338_v54 = vsel %vm5314_vm0, %v4767_v36, %v5826_v49  ;;  %vm5317_vm5 = vcmp.ge.f32.partialorder %v11285_v41, 0.0  ;;  %v5829_v55 = vmul.f32 0.2, %v11285_v41  ;;  %v3759_v3 = vpop.f32.mrb[249].mxu0 }
 0x2ec   : > { %8901 = vst.msk [vmem:[%s11846_s24 + $0x7d8] sm:$0xf] %vm8398_vm1, %v10507_v50  ;;  %v10505_v56 = vpack.c.bf16 %v6338_v54, %v6338_v54  ;;  %v6085_v57 = vsel %vm5061_vm4, %v11029_v40, %v5573_v52  ;;  %vm5059_vm6 = vcmp.ge.f32.partialorder %v3746_v45, 0.0  ;;  %v5571_v58 = vmul.f32 0.2, %v3746_v45  ;;  %v4783_v4 = vpop.f32.mrb[249].mxu1 }
 0x2ed   : > { %8643 = vst.msk [vmem:[%s11846_s24 + $0x3d0] sm:$0xf] %vm8398_vm1, %v10249_v53  ;;  %v10252_v59 = vpack.c.bf16 %v6085_v57, %v6085_v57  ;;  %v6341_v60 = vsel %vm5317_vm5, %v11285_v41, %v5829_v55  ;;  %vm5315_vm7 = vcmp.ge.f32.partialorder %v4770_v46, 0.0  ;;  %v5827_v61 = vmul.f32 0.2, %v4770_v46  ;;  %v11033_v8 = vpop.f32.mrb[250].mxu0 }
 0x2ee   : > { %8899 = vst.msk [vmem:[%s11846_s24 + $0x7d0] sm:$0xf] %vm8398_vm1, %v10505_v56  ;;  %v10508_v0 = vpack.c.bf16 %v6341_v60, %v6341_v60  ;;  %v6083_v1 = vsel %vm5059_vm6, %v3746_v45, %v5571_v58  ;;  %vm5064_vm8 = vcmp.ge.f32.partialorder %v11032_v62, 0.0  ;;  %v5576_v2 = vmul.f32 0.2, %v11032_v62  ;;  %v11289_v9 = vpop.f32.mrb[250].mxu1 }
 0x2ef   : > { %8646 = vst.msk [vmem:[%s11846_s24 + $0x3dc] sm:$0xf] %vm8398_vm1, %v10252_v59  ;;  %v10250_v5 = vpack.c.bf16 %v6083_v1, %v6083_v1  ;;  %v6339_v6 = vsel %vm5315_vm7, %v4770_v46, %v5827_v61  ;;  %vm5320_vm9 = vcmp.ge.f32.partialorder %v11288_v63, 0.0  ;;  %v5832_v7 = vmul.f32 0.2, %v11288_v63  ;;  %v3762_v13 = vpop.f32.mrb[251].mxu0 }
 0x2f0   : > { %8902 = vst.msk [vmem:[%s11846_s24 + $0x7dc] sm:$0xf] %vm8398_vm1, %v10508_v0  ;;  %v10506_v10 = vpack.c.bf16 %v6339_v6, %v6339_v6  ;;  %v6088_v11 = vsel %vm5064_vm8, %v11032_v62, %v5576_v2  ;;  %vm5062_vm10 = vcmp.ge.f32.partialorder %v3759_v3, 0.0  ;;  %v5574_v12 = vmul.f32 0.2, %v3759_v3  ;;  %v4786_v14 = vpop.f32.mrb[251].mxu1 }
 0x2f1   : > { %8644 = vst.msk [vmem:[%s11846_s24 + $0x3d4] sm:$0xf] %vm8398_vm1, %v10250_v5  ;;  %v10255_v15 = vpack.c.bf16 %v6088_v11, %v6088_v11  ;;  %v6344_v16 = vsel %vm5320_vm9, %v11288_v63, %v5832_v7  ;;  %vm5318_vm11 = vcmp.ge.f32.partialorder %v4783_v4, 0.0  ;;  %v5830_v17 = vmul.f32 0.2, %v4783_v4  ;;  %v11036_v30 = vpop.f32.mrb[252].mxu0 }
 0x2f2   : > { %8900 = vst.msk [vmem:[%s11846_s24 + $0x7d4] sm:$0xf] %vm8398_vm1, %v10506_v10  ;;  %v10511_v18 = vpack.c.bf16 %v6344_v16, %v6344_v16  ;;  %v6086_v19 = vsel %vm5062_vm10, %v3759_v3, %v5574_v12  ;;  %vm5065_vm12 = vcmp.ge.f32.partialorder %v11033_v8, 0.0  ;;  %v5577_v20 = vmul.f32 0.2, %v11033_v8  ;;  %v11292_v31 = vpop.f32.mrb[252].mxu1 }
 0x2f3   : > { %8649 = vst.msk [vmem:[%s11846_s24 + $0x3e8] sm:$0xf] %vm8398_vm1, %v10255_v15  ;;  %v10253_v21 = vpack.c.bf16 %v6086_v19, %v6086_v19  ;;  %v6342_v22 = vsel %vm5318_vm11, %v4783_v4, %v5830_v17  ;;  %vm5321_vm13 = vcmp.ge.f32.partialorder %v11289_v9, 0.0  ;;  %v5833_v23 = vmul.f32 0.2, %v11289_v9  ;;  %v3775_v35 = vpop.f32.mrb[253].mxu0 }
 0x2f4   : > { %8905 = vst.msk [vmem:[%s11846_s24 + $0x7e8] sm:$0xf] %vm8398_vm1, %v10511_v18  ;;  %v10509_v24 = vpack.c.bf16 %v6342_v22, %v6342_v22  ;;  %v6089_v25 = vsel %vm5065_vm12, %v11033_v8, %v5577_v20  ;;  %vm5063_vm14 = vcmp.ge.f32.partialorder %v3762_v13, 0.0  ;;  %v5575_v26 = vmul.f32 0.2, %v3762_v13  ;;  %v4799_v36 = vpop.f32.mrb[253].mxu1 }
 0x2f5   : > { %8647 = vst.msk [vmem:[%s11846_s24 + $0x3e0] sm:$0xf] %vm8398_vm1, %v10253_v21  ;;  %v10256_v27 = vpack.c.bf16 %v6089_v25, %v6089_v25  ;;  %v6345_v28 = vsel %vm5321_vm13, %v11289_v9, %v5833_v23  ;;  %vm5319_vm15 = vcmp.ge.f32.partialorder %v4786_v14, 0.0  ;;  %v5831_v29 = vmul.f32 0.2, %v4786_v14  ;;  %v11037_v40 = vpop.f32.mrb[254].mxu0 }
 0x2f6   : > { %8903 = vst.msk [vmem:[%s11846_s24 + $0x7e0] sm:$0xf] %vm8398_vm1, %v10509_v24  ;;  %v10512_v32 = vpack.c.bf16 %v6345_v28, %v6345_v28  ;;  %v6087_v33 = vsel %vm5063_vm14, %v3762_v13, %v5575_v26  ;;  %vm5068_vm2 = vcmp.ge.f32.partialorder %v11036_v30, 0.0  ;;  %v5580_v34 = vmul.f32 0.2, %v11036_v30  ;;  %v11293_v41 = vpop.f32.mrb[254].mxu1 }
 0x2f7   : > { %8650 = vst.msk [vmem:[%s11846_s24 + $0x3ec] sm:$0xf] %vm8398_vm1, %v10256_v27  ;;  %v10254_v37 = vpack.c.bf16 %v6087_v33, %v6087_v33  ;;  %v6343_v38 = vsel %vm5319_vm15, %v4786_v14, %v5831_v29  ;;  %vm5324_vm3 = vcmp.ge.f32.partialorder %v11292_v31, 0.0  ;;  %v5836_v39 = vmul.f32 0.2, %v11292_v31  ;;  %v3778_v45 = vpop.f32.mrb[255].mxu0 }
 0x2f8   : > { %8906 = vst.msk [vmem:[%s11846_s24 + $0x7ec] sm:$0xf] %vm8398_vm1, %v10512_v32  ;;  %v10510_v42 = vpack.c.bf16 %v6343_v38, %v6343_v38  ;;  %v6092_v43 = vsel %vm5068_vm2, %v11036_v30, %v5580_v34  ;;  %vm5066_vm0 = vcmp.ge.f32.partialorder %v3775_v35, 0.0  ;;  %v5578_v44 = vmul.f32 0.2, %v3775_v35  ;;  %v4802_v46 = vpop.f32.mrb[255].mxu1 }
 0x2f9   : > { %8648 = vst.msk [vmem:[%s11846_s24 + $0x3e4] sm:$0xf] %vm8398_vm1, %v10254_v37  ;;  %v10259_v47 = vpack.c.bf16 %v6092_v43, %v6092_v43  ;;  %v6348_v48 = vsel %vm5324_vm3, %v11292_v31, %v5836_v39  ;;  %vm5322_vm4 = vcmp.ge.f32.partialorder %v4799_v36, 0.0  ;;  %v5834_v49 = vmul.f32 0.2, %v4799_v36 }
 0x2fa   : > { %8904 = vst.msk [vmem:[%s11846_s24 + $0x7e4] sm:$0xf] %vm8398_vm1, %v10510_v42  ;;  %v10515_v50 = vpack.c.bf16 %v6348_v48, %v6348_v48  ;;  %v6090_v51 = vsel %vm5066_vm0, %v3775_v35, %v5578_v44  ;;  %vm5069_vm5 = vcmp.ge.f32.partialorder %v11037_v40, 0.0  ;;  %v5581_v52 = vmul.f32 0.2, %v11037_v40 }
 0x2fb   : > { %8653 = vst.msk [vmem:[%s11846_s24 + $0x3f8] sm:$0xf] %vm8398_vm1, %v10259_v47  ;;  %v10257_v53 = vpack.c.bf16 %v6090_v51, %v6090_v51  ;;  %v6346_v54 = vsel %vm5322_vm4, %v4799_v36, %v5834_v49  ;;  %vm5325_vm6 = vcmp.ge.f32.partialorder %v11293_v41, 0.0  ;;  %v5837_v55 = vmul.f32 0.2, %v11293_v41 }
 0x2fc   : > { %8909 = vst.msk [vmem:[%s11846_s24 + $0x7f8] sm:$0xf] %vm8398_vm1, %v10515_v50  ;;  %v10513_v56 = vpack.c.bf16 %v6346_v54, %v6346_v54  ;;  %v6093_v57 = vsel %vm5069_vm5, %v11037_v40, %v5581_v52  ;;  %vm5067_vm7 = vcmp.ge.f32.partialorder %v3778_v45, 0.0  ;;  %v5579_v58 = vmul.f32 0.2, %v3778_v45 }
 0x2fd   : > { %8651 = vst.msk [vmem:[%s11846_s24 + $0x3f0] sm:$0xf] %vm8398_vm1, %v10257_v53  ;;  %v10260_v59 = vpack.c.bf16 %v6093_v57, %v6093_v57  ;;  %v6349_v60 = vsel %vm5325_vm6, %v11293_v41, %v5837_v55  ;;  %vm5323_vm8 = vcmp.ge.f32.partialorder %v4802_v46, 0.0  ;;  %v5835_v61 = vmul.f32 0.2, %v4802_v46 }
 0x2fe   : > { %8907 = vst.msk [vmem:[%s11846_s24 + $0x7f0] sm:$0xf] %vm8398_vm1, %v10513_v56  ;;  %v10516_v62 = vpack.c.bf16 %v6349_v60, %v6349_v60  ;;  %v6091_v63 = vsel %vm5067_vm7, %v3778_v45, %v5579_v58 }
 0x2ff   : > { %8654 = vst.msk [vmem:[%s11846_s24 + $0x3fc] sm:$0xf] %vm8398_vm1, %v10260_v59  ;;  %v10258_v0 = vpack.c.bf16 %v6091_v63, %v6091_v63  ;;  %v6347_v1 = vsel %vm5323_vm8, %v4802_v46, %v5835_v61 }
 0x300   : > { %8910 = vst.msk [vmem:[%s11846_s24 + $0x7fc] sm:$0xf] %vm8398_vm1, %v10516_v62  ;;  %v10514_v2 = vpack.c.bf16 %v6347_v1, %v6347_v1 }
 0x301   : > { %8652 = vst.msk [vmem:[%s11846_s24 + $0x3f4] sm:$0xf] %vm8398_vm1, %v10258_v0 }
 0x302   : > { %8908 = vst.msk [vmem:[%s11846_s24 + $0x7f4] sm:$0xf] %vm8398_vm1, %v10514_v2 }
 0x303 PF: > { %s12_s9 = sadd.s32 1, %s11573_s9  }
 0x304   : > { %p9_p4 = scmp.ge.s32.totalorder %s12_s9, 4  }
 0x306   :  { %11 = sbr.rel (!%p9_p4) target bundleno = 1 (0x1), region = 58 }

</bundles_post_ra>
